<compile_context>
chip_gen: v7x
topology: tpu7x:2x2x1
jax: 0.10.0
libtpu: 0.0.40
codegen_flags: <defaults>
</compile_context>

<pallas_src>
from collections import namedtuple

import jax
import jax.numpy as jnp
from jax.experimental import pallas as pl
from jax.experimental.pallas import tpu as pltpu


# ----------------------------------------------------------------------------
# device-derived VMEM budget & tile sizing helpers
# ----------------------------------------------------------------------------
_VMEM_LIMIT_CACHE = [None]


def _vmem_limit_bytes():
    """Scoped-VMEM request derived from the actual part (v7x has 64 MiB/TC)."""
    if _VMEM_LIMIT_CACHE[0] is None:
        cap = None
        try:
            cap = getattr(pltpu.get_tpu_info(), "vmem_capacity_bytes", None)
        except Exception:
            cap = None
        if not cap:
            cap = 64 * 1024 * 1024          # conservative (v7x-sized) fallback
        _VMEM_LIMIT_CACHE[0] = int(min(cap * 3 // 4, 96 * 1024 * 1024))
    return _VMEM_LIMIT_CACHE[0]


def _row_tile(h, per_row_bytes, budget_bytes):
    """Largest divisor of `h` whose row tile fits the byte budget."""
    t = max(1, min(h, budget_bytes // max(per_row_bytes, 1)))
    while h % t:
        t -= 1
    return t


# ----------------------------------------------------------------------------
# Pallas kernels
# ----------------------------------------------------------------------------
def _conv3x3_kernel(x_ref, w_ref, b_ref, o_ref):
    """Reflect-padded 3x3 conv + bias + ReLU on one (batch, row-tile) block.

    x_ref: (1, TH, W+2, 3*Cin) bf16 -- the 3 row taps stacked on the channel axis
    w_ref: (3, 3*Cin, Cout)    bf16 -- one (3*Cin, Cout) matrix per column tap
    b_ref: (1, Cout)           f32
    o_ref: (1, TH, W, Cout)    bf16
    """
    th = o_ref.shape[1]
    w_out = o_ref.shape[2]
    cout = o_ref.shape[3]

    x = x_ref[0]                               # (TH, W+2, 3*Cin)
    kc = x.shape[-1]
    m = th * w_out

    def tap(kw):
        # column tap: static slice of the VMEM tile; reshape is layout-trivial
        # (wrapper guarantees W % 8 == 0 or TH == 1).
        cols = x[:, kw:kw + w_out, :].reshape(m, kc)
        return jnp.dot(cols, w_ref[kw], preferred_element_type=jnp.float32)

    acc = tap(0) + tap(1) + tap(2) + b_ref[...]          # f32 epilogue
    acc = jnp.maximum(acc, 0.0)                           # every conv has ReLU
    o_ref[0] = acc.reshape(th, w_out, cout).astype(o_ref.dtype)


def _maxpool_kernel(x_ref, o_ref):
    """2x2 stride-2 max-pool (ceil-mode handled by -inf padding in glue).

    x_ref: (1, 2*TH, Wo, 2*C)  -- column pairs pre-folded onto the lane axis
    o_ref: (1, TH, Wo, C)
    """
    th = o_ref.shape[1]
    wo = o_ref.shape[2]
    c = o_ref.shape[3]
    x = x_ref[0]                                          # (2*TH, Wo, 2*C)
    col = jnp.maximum(x[:, :, :c], x[:, :, c:])           # max over column pairs
    o_ref[0] = jnp.max(col.reshape(th, 2, wo, c), axis=1)  # max over row pairs


# ----------------------------------------------------------------------------
# Wrappers (glue: reflect pad / row-tap stacking / reshapes in plain JAX)
# ----------------------------------------------------------------------------
def conv3x3_pallas(x, w_hwio, b):
    """x: (N,H,W,Cin) NHWC.  w: (3,3,Cin,Cout) HWIO.  b: (Cout,).  -> bf16 NHWC."""
    N, H, W, Cin = x.shape
    Cout = w_hwio.shape[-1]

    xp = jnp.pad(x.astype(jnp.bfloat16), ((0, 0), (1, 1), (1, 1), (0, 0)),
                 mode="reflect")                           # (N, H+2, W+2, Cin)
    # glue: stack only the 3 *row* taps on channels (3x, not 9x, duplication)
    xr = jnp.concatenate([xp[:, kh:kh + H] for kh in range(3)], axis=-1)
    # weights: (kh,kw,cin,cout) -> (kw, kh*Cin+cin, cout) to match xr's channels
    w3 = jnp.transpose(w_hwio, (1, 0, 2, 3)).reshape(3, 3 * Cin, Cout)
    w3 = w3.astype(jnp.bfloat16)
    b2 = b.reshape(1, Cout).astype(jnp.float32)

    # row tile: keep the in-kernel spatial flatten layout-trivial and fit a
    # small per-tile VMEM budget (input + bf16 output + f32 accumulator).
    if W % 8:
        th = 1
    else:
        per_row = (W + 2) * 3 * Cin * 2 + W * Cout * (2 + 4)
        th = _row_tile(H, per_row, 3 * 1024 * 1024)
    grid = (N, H // th)

    return pl.pallas_call(
        _conv3x3_kernel,
        out_shape=jax.ShapeDtypeStruct((N, H, W, Cout), jnp.bfloat16),
        grid=grid,
        in_specs=[
            pl.BlockSpec((1, th, W + 2, 3 * Cin), lambda n, r: (n, r, 0, 0)),
            pl.BlockSpec((3, 3 * Cin, Cout), lambda n, r: (0, 0, 0)),
            pl.BlockSpec((1, Cout), lambda n, r: (0, 0)),
        ],
        out_specs=pl.BlockSpec((1, th, W, Cout), lambda n, r: (n, r, 0, 0)),
        compiler_params=pltpu.CompilerParams(
            dimension_semantics=("parallel", "parallel"),
            vmem_limit_bytes=_vmem_limit_bytes()),
    )(xr, w3, b2)


def maxpool2x2_ceil(x):
    """MaxPool2d(kernel=2, stride=2, ceil_mode=True) in NHWC."""
    N, H, W, C = x.shape
    Ho, Wo = -(-H // 2), -(-W // 2)
    ph, pw = Ho * 2 - H, Wo * 2 - W
    if ph or pw:  # ceil_mode: pad with -inf (never wins against real values)
        x = jnp.pad(x, ((0, 0), (0, ph), (0, pw), (0, 0)),
                    constant_values=-jnp.inf)
    # free, order-preserving reshape: adjacent column pairs land on the lane axis
    x = x.reshape(N, 2 * Ho, Wo, 2 * C)

    per_row = 5 * Wo * C * x.dtype.itemsize
    th = _row_tile(Ho, per_row, 2 * 1024 * 1024)
    grid = (N, Ho // th)

    return pl.pallas_call(
        _maxpool_kernel,
        out_shape=jax.ShapeDtypeStruct((N, Ho, Wo, C), x.dtype),
        grid=grid,
        in_specs=[pl.BlockSpec((1, 2 * th, Wo, 2 * C), lambda n, r: (n, r, 0, 0))],
        out_specs=pl.BlockSpec((1, th, Wo, C), lambda n, r: (n, r, 0, 0)),
        compiler_params=pltpu.CompilerParams(
            dimension_semantics=("parallel", "parallel"),
            vmem_limit_bytes=_vmem_limit_bytes()),
    )(x)


# ----------------------------------------------------------------------------
# Parameters (deterministic synthetic init; shapes follow the PyTorch module)
# ----------------------------------------------------------------------------
_CONV_SPECS = {
    # name: (Cout, Cin, k) -- indices follow the nn.Sequential positions
    "conv0": (3, 3, 1),
    "conv2": (64, 3, 3),
    "conv5": (64, 64, 3),
    "conv9": (128, 64, 3),
    "conv12": (128, 128, 3),
    "conv16": (256, 128, 3),
    "conv19": (256, 256, 3),
    "conv22": (256, 256, 3),
    "conv25": (256, 256, 3),
    "conv29": (512, 256, 3),
    "conv32": (512, 512, 3),
    "conv35": (512, 512, 3),
    "conv38": (512, 512, 3),
    "conv42": (512, 512, 3),
}


def init_params(key):
    params = {}
    for name, (cout, cin, k) in _CONV_SPECS.items():
        key, wk, bk = jax.random.split(key, 3)
        fan_in = cin * k * k
        w_oihw = jax.random.normal(wk, (cout, cin, k, k), jnp.float32)
        w_oihw = w_oihw * (2.0 / fan_in) ** 0.5
        b = jax.random.normal(bk, (cout,), jnp.float32) * 0.01
        params[name] = (jnp.transpose(w_oihw, (2, 3, 1, 0)), b)   # OIHW -> HWIO
    return params


def _fold_conv0_into_conv2(params):
    """conv0 is a 1x1 linear map applied before reflection padding; it commutes
    with the padding, so it folds exactly into conv2's weights and bias."""
    w0, b0 = params["conv0"]            # (1,1,3,3) HWIO, (3,)
    w2, b2 = params["conv2"]            # (3,3,3,64) HWIO, (64,)
    a = w0[0, 0]                        # (cin_in, cin_mid)
    w2f = jnp.einsum("hwmc,im->hwic", w2, a)
    b2f = b2 + jnp.einsum("hwmc,m->c", w2, b0)
    out = dict(params)
    out["conv2"] = (w2f, b2f)
    out.pop("conv0")
    return out


# ----------------------------------------------------------------------------
# Model
# ----------------------------------------------------------------------------
class NormalisedVGG:
    def __init__(self, params):
        self.p = _fold_conv0_into_conv2(params)

    def _conv(self, x, name):
        w, b = self.p[name]
        return conv3x3_pallas(x, w, b)

    @staticmethod
    def _to_nchw(x):
        return jnp.transpose(x, (0, 3, 1, 2)).astype(jnp.float32)

    def __call__(self, x_nchw, target="relu3_1"):
        x = jnp.transpose(x_nchw, (0, 2, 3, 1))        # NCHW -> NHWC
        # net[:4]: Conv(3,3,1) [folded], ReflPad, Conv(3,64,3), ReLU
        relu1_1 = self._conv(x, "conv2")
        if target == "relu1_1":
            return self._to_nchw(relu1_1)
        # net[4:11]
        h = self._conv(relu1_1, "conv5")
        h = maxpool2x2_ceil(h)
        relu2_1 = self._conv(h, "conv9")
        if target == "relu2_1":
            return self._to_nchw(relu2_1)
        # net[11:18]
        h = self._conv(relu2_1, "conv12")
        h = maxpool2x2_ceil(h)
        relu3_1 = self._conv(h, "conv16")
        if target == "relu3_1":
            return self._to_nchw(relu3_1)
        # net[18:31]
        h = self._conv(relu3_1, "conv19")
        h = self._conv(h, "conv22")
        h = self._conv(h, "conv25")
        h = maxpool2x2_ceil(h)
        relu4_1 = self._conv(h, "conv29")
        if target == "relu4_1":
            return self._to_nchw(relu4_1)
        # net[31:]
        h = self._conv(relu4_1, "conv32")
        h = self._conv(h, "conv35")
        h = self._conv(h, "conv38")
        h = maxpool2x2_ceil(h)
        relu5_1 = self._conv(h, "conv42")
        Out = namedtuple("out", ["relu1_1", "relu2_1", "relu3_1",
                                 "relu4_1", "relu5_1"])
        return Out(*(self._to_nchw(t) for t in
                     (relu1_1, relu2_1, relu3_1, relu4_1, relu5_1)))


# ----------------------------------------------------------------------------
if __name__ == "__main__":
    key = jax.random.PRNGKey(0)
    pkey, xkey = jax.random.split(key)
    params = init_params(pkey)
    model = NormalisedVGG(params)

    # PyTorch-style NCHW input: batch=2, 3 channels, 16x16 spatial.
    x = jax.random.normal(xkey, (2, 3, 16, 16), jnp.float32)

    y3 = jax.jit(lambda inp: model(inp, target="relu3_1"))(x)
    y3 = jax.block_until_ready(y3)
    assert y3.shape == (2, 256, 4, 4), y3.shape          # 16 -> pool -> pool -> 4
    assert bool(jnp.all(jnp.isfinite(y3)))

    y4 = jax.jit(lambda inp: model(inp, target="relu4_1"))(x)
    y4 = jax.block_until_ready(y4)
    assert y4.shape == (2, 512, 2, 2), y4.shape
    assert bool(jnp.all(jnp.isfinite(y4)))

    print("KERNEL_OK")
</pallas_src>

<mosaic_0001>
module attributes {stable_mosaic.version = 11 : i64} {
  func.func @_conv3x3_kernel(%arg0: i32, %arg1: i32, %arg2: memref<1x16x18x9xbf16, #tpu.memory_space<vmem>>, %arg3: memref<3x9x64xbf16, #tpu.memory_space<vmem>>, %arg4: memref<1x64xf32, #tpu.memory_space<vmem>>, %arg5: memref<1x16x16x64xbf16, #tpu.memory_space<vmem>>) attributes {dimension_semantics = [#tpu.dimension_semantics<parallel>, #tpu.dimension_semantics<parallel>], iteration_bounds = array<i64: 2, 1>, scalar_prefetch = 0 : i64, scratch_operands = 0 : i64, tpu.core_type = #tpu.core_type<tc>, window_params = [{transform_indices = @transform_0, window_bounds = array<i64: 1, 16, 18, 9>}, {pipeline_mode = #tpu.pipeline_mode<synchronous>, transform_indices = @transform_1, window_bounds = array<i64: 3, 9, 64>}, {pipeline_mode = #tpu.pipeline_mode<synchronous>, transform_indices = @transform_2, window_bounds = array<i64: 1, 64>}, {transform_indices = @transform_3, window_bounds = array<i64: 1, 16, 16, 64>}]} {
    %c0 = arith.constant 0 : index
    %c0_0 = arith.constant 0 : index
    %c0_1 = arith.constant 0 : index
    %c0_2 = arith.constant 0 : index
    %0 = vector.load %arg2[%c0, %c0_0, %c0_1, %c0_2] : memref<1x16x18x9xbf16, #tpu.memory_space<vmem>>, vector<1x16x18x9xbf16>
    %1 = vector.shape_cast %0 : vector<1x16x18x9xbf16> to vector<16x18x9xbf16>
    %2 = vector.extract_strided_slice %1 {offsets = [0, 0, 0], sizes = [16, 16, 9], strides = [1, 1, 1]} : vector<16x18x9xbf16> to vector<16x16x9xbf16>
    %3 = vector.shape_cast %2 : vector<16x16x9xbf16> to vector<256x9xbf16>
    %c0_3 = arith.constant 0 : index
    %c0_4 = arith.constant 0 : index
    %c0_5 = arith.constant 0 : index
    %4 = vector.load %arg3[%c0_3, %c0_4, %c0_5] : memref<3x9x64xbf16, #tpu.memory_space<vmem>>, vector<1x9x64xbf16>
    %5 = vector.shape_cast %4 : vector<1x9x64xbf16> to vector<9x64xbf16>
    %cst = arith.constant dense<0.000000e+00> : vector<256x64xf32>
    %6 = tpu.matmul %3, %5, %cst {dimension_numbers = #tpu.dot_dimension_numbers<[1], [0], [0], [1], [0, 0, 1, 1], [], []>} : vector<256x9xbf16>, vector<9x64xbf16>, vector<256x64xf32> -> vector<256x64xf32>
    %7 = vector.extract_strided_slice %1 {offsets = [0, 1, 0], sizes = [16, 16, 9], strides = [1, 1, 1]} : vector<16x18x9xbf16> to vector<16x16x9xbf16>
    %8 = vector.shape_cast %7 : vector<16x16x9xbf16> to vector<256x9xbf16>
    %c1 = arith.constant 1 : index
    %c0_6 = arith.constant 0 : index
    %c0_7 = arith.constant 0 : index
    %9 = vector.load %arg3[%c1, %c0_6, %c0_7] : memref<3x9x64xbf16, #tpu.memory_space<vmem>>, vector<1x9x64xbf16>
    %10 = vector.shape_cast %9 : vector<1x9x64xbf16> to vector<9x64xbf16>
    %cst_8 = arith.constant dense<0.000000e+00> : vector<256x64xf32>
    %11 = tpu.matmul %8, %10, %cst_8 {dimension_numbers = #tpu.dot_dimension_numbers<[1], [0], [0], [1], [0, 0, 1, 1], [], []>} : vector<256x9xbf16>, vector<9x64xbf16>, vector<256x64xf32> -> vector<256x64xf32>
    %12 = arith.addf %6, %11 : vector<256x64xf32>
    %13 = vector.extract_strided_slice %1 {offsets = [0, 2, 0], sizes = [16, 16, 9], strides = [1, 1, 1]} : vector<16x18x9xbf16> to vector<16x16x9xbf16>
    %14 = vector.shape_cast %13 : vector<16x16x9xbf16> to vector<256x9xbf16>
    %c2 = arith.constant 2 : index
    %c0_9 = arith.constant 0 : index
    %c0_10 = arith.constant 0 : index
    %15 = vector.load %arg3[%c2, %c0_9, %c0_10] : memref<3x9x64xbf16, #tpu.memory_space<vmem>>, vector<1x9x64xbf16>
    %16 = vector.shape_cast %15 : vector<1x9x64xbf16> to vector<9x64xbf16>
    %cst_11 = arith.constant dense<0.000000e+00> : vector<256x64xf32>
    %17 = tpu.matmul %14, %16, %cst_11 {dimension_numbers = #tpu.dot_dimension_numbers<[1], [0], [0], [1], [0, 0, 1, 1], [], []>} : vector<256x9xbf16>, vector<9x64xbf16>, vector<256x64xf32> -> vector<256x64xf32>
    %18 = arith.addf %12, %17 : vector<256x64xf32>
    %c0_12 = arith.constant 0 : index
    %c0_13 = arith.constant 0 : index
    %19 = vector.load %arg4[%c0_12, %c0_13] : memref<1x64xf32, #tpu.memory_space<vmem>>, vector<1x64xf32>
    %20 = vector.broadcast %19 : vector<1x64xf32> to vector<256x64xf32>
    %21 = arith.addf %18, %20 : vector<256x64xf32>
    %cst_14 = arith.constant 0.000000e+00 : f32
    %22 = vector.broadcast %cst_14 : f32 to vector<256x64xf32>
    %23 = arith.maximumf %21, %22 : vector<256x64xf32>
    %24 = vector.shape_cast %23 : vector<256x64xf32> to vector<16x16x64xf32>
    %25 = arith.truncf %24 : vector<16x16x64xf32> to vector<16x16x64xbf16>
    %c0_15 = arith.constant 0 : index
    %c0_16 = arith.constant 0 : index
    %c0_17 = arith.constant 0 : index
    %c0_18 = arith.constant 0 : index
    %26 = vector.load %arg5[%c0_15, %c0_16, %c0_17, %c0_18] : memref<1x16x16x64xbf16, #tpu.memory_space<vmem>>, vector<1x16x16x64xbf16>
    %27 = vector.shape_cast %26 : vector<1x16x16x64xbf16> to vector<16x16x64xbf16>
    %28 = vector.shape_cast %25 : vector<16x16x64xbf16> to vector<1x16x16x64xbf16>
    tpu.vector_store %arg5[%c0_15, %c0_16, %c0_17, %c0_18], %28 {strides = array<i32>} : memref<1x16x16x64xbf16, #tpu.memory_space<vmem>>, vector<1x16x16x64xbf16>,
    return
  }
  func.func @transform_0(%arg0: i32, %arg1: i32) -> (i32, i32, i32, i32) {
    %c0_i32 = arith.constant 0 : i32
    %c0_i32_0 = arith.constant 0 : i32
    %c0_i32_1 = arith.constant 0 : i32
    return %arg0, %arg1, %c0_i32, %c0_i32_0 : i32, i32, i32, i32
  }
  func.func @transform_1(%arg0: i32, %arg1: i32) -> (i32, i32, i32) {
    %c0_i32 = arith.constant 0 : i32
    %c0_i32_0 = arith.constant 0 : i32
    %c0_i32_1 = arith.constant 0 : i32
    %c0_i32_2 = arith.constant 0 : i32
    return %c0_i32, %c0_i32_0, %c0_i32_1 : i32, i32, i32
  }
  func.func @transform_2(%arg0: i32, %arg1: i32) -> (i32, i32) {
    %c0_i32 = arith.constant 0 : i32
    %c0_i32_0 = arith.constant 0 : i32
    %c0_i32_1 = arith.constant 0 : i32
    return %c0_i32, %c0_i32_0 : i32, i32
  }
  func.func @transform_3(%arg0: i32, %arg1: i32) -> (i32, i32, i32, i32) {
    %c0_i32 = arith.constant 0 : i32
    %c0_i32_0 = arith.constant 0 : i32
    %c0_i32_1 = arith.constant 0 : i32
    return %arg0, %arg1, %c0_i32, %c0_i32_0 : i32, i32, i32, i32
  }
}

module attributes {stable_mosaic.version = 11 : i64} {
  func.func @_conv3x3_kernel(%arg0: i32, %arg1: i32, %arg2: memref<1x16x18x192xbf16, #tpu.memory_space<vmem>>, %arg3: memref<3x192x64xbf16, #tpu.memory_space<vmem>>, %arg4: memref<1x64xf32, #tpu.memory_space<vmem>>, %arg5: memref<1x16x16x64xbf16, #tpu.memory_space<vmem>>) attributes {dimension_semantics = [#tpu.dimension_semantics<parallel>, #tpu.dimension_semantics<parallel>], iteration_bounds = array<i64: 2, 1>, scalar_prefetch = 0 : i64, scratch_operands = 0 : i64, tpu.core_type = #tpu.core_type<tc>, window_params = [{transform_indices = @transform_0, window_bounds = array<i64: 1, 16, 18, 192>}, {pipeline_mode = #tpu.pipeline_mode<synchronous>, transform_indices = @transform_1, window_bounds = array<i64: 3, 192, 64>}, {pipeline_mode = #tpu.pipeline_mode<synchronous>, transform_indices = @transform_2, window_bounds = array<i64: 1, 64>}, {transform_indices = @transform_3, window_bounds = array<i64: 1, 16, 16, 64>}]} {
    %c0 = arith.constant 0 : index
    %c0_0 = arith.constant 0 : index
    %c0_1 = arith.constant 0 : index
    %c0_2 = arith.constant 0 : index
    %0 = vector.load %arg2[%c0, %c0_0, %c0_1, %c0_2] : memref<1x16x18x192xbf16, #tpu.memory_space<vmem>>, vector<1x16x18x192xbf16>
    %1 = vector.shape_cast %0 : vector<1x16x18x192xbf16> to vector<16x18x192xbf16>
    %2 = vector.extract_strided_slice %1 {offsets = [0, 0, 0], sizes = [16, 16, 192], strides = [1, 1, 1]} : vector<16x18x192xbf16> to vector<16x16x192xbf16>
    %3 = vector.shape_cast %2 : vector<16x16x192xbf16> to vector<256x192xbf16>
    %c0_3 = arith.constant 0 : index
    %c0_4 = arith.constant 0 : index
    %c0_5 = arith.constant 0 : index
    %4 = vector.load %arg3[%c0_3, %c0_4, %c0_5] : memref<3x192x64xbf16, #tpu.memory_space<vmem>>, vector<1x192x64xbf16>
    %5 = vector.shape_cast %4 : vector<1x192x64xbf16> to vector<192x64xbf16>
    %cst = arith.constant dense<0.000000e+00> : vector<256x64xf32>
    %6 = tpu.matmul %3, %5, %cst {dimension_numbers = #tpu.dot_dimension_numbers<[1], [0], [0], [1], [0, 0, 1, 1], [], []>} : vector<256x192xbf16>, vector<192x64xbf16>, vector<256x64xf32> -> vector<256x64xf32>
    %7 = vector.extract_strided_slice %1 {offsets = [0, 1, 0], sizes = [16, 16, 192], strides = [1, 1, 1]} : vector<16x18x192xbf16> to vector<16x16x192xbf16>
    %8 = vector.shape_cast %7 : vector<16x16x192xbf16> to vector<256x192xbf16>
    %c1 = arith.constant 1 : index
    %c0_6 = arith.constant 0 : index
    %c0_7 = arith.constant 0 : index
    %9 = vector.load %arg3[%c1, %c0_6, %c0_7] : memref<3x192x64xbf16, #tpu.memory_space<vmem>>, vector<1x192x64xbf16>
    %10 = vector.shape_cast %9 : vector<1x192x64xbf16> to vector<192x64xbf16>
    %cst_8 = arith.constant dense<0.000000e+00> : vector<256x64xf32>
    %11 = tpu.matmul %8, %10, %cst_8 {dimension_numbers = #tpu.dot_dimension_numbers<[1], [0], [0], [1], [0, 0, 1, 1], [], []>} : vector<256x192xbf16>, vector<192x64xbf16>, vector<256x64xf32> -> vector<256x64xf32>
    %12 = arith.addf %6, %11 : vector<256x64xf32>
    %13 = vector.extract_strided_slice %1 {offsets = [0, 2, 0], sizes = [16, 16, 192], strides = [1, 1, 1]} : vector<16x18x192xbf16> to vector<16x16x192xbf16>
    %14 = vector.shape_cast %13 : vector<16x16x192xbf16> to vector<256x192xbf16>
    %c2 = arith.constant 2 : index
    %c0_9 = arith.constant 0 : index
    %c0_10 = arith.constant 0 : index
    %15 = vector.load %arg3[%c2, %c0_9, %c0_10] : memref<3x192x64xbf16, #tpu.memory_space<vmem>>, vector<1x192x64xbf16>
    %16 = vector.shape_cast %15 : vector<1x192x64xbf16> to vector<192x64xbf16>
    %cst_11 = arith.constant dense<0.000000e+00> : vector<256x64xf32>
    %17 = tpu.matmul %14, %16, %cst_11 {dimension_numbers = #tpu.dot_dimension_numbers<[1], [0], [0], [1], [0, 0, 1, 1], [], []>} : vector<256x192xbf16>, vector<192x64xbf16>, vector<256x64xf32> -> vector<256x64xf32>
    %18 = arith.addf %12, %17 : vector<256x64xf32>
    %c0_12 = arith.constant 0 : index
    %c0_13 = arith.constant 0 : index
    %19 = vector.load %arg4[%c0_12, %c0_13] : memref<1x64xf32, #tpu.memory_space<vmem>>, vector<1x64xf32>
    %20 = vector.broadcast %19 : vector<1x64xf32> to vector<256x64xf32>
    %21 = arith.addf %18, %20 : vector<256x64xf32>
    %cst_14 = arith.constant 0.000000e+00 : f32
    %22 = vector.broadcast %cst_14 : f32 to vector<256x64xf32>
    %23 = arith.maximumf %21, %22 : vector<256x64xf32>
    %24 = vector.shape_cast %23 : vector<256x64xf32> to vector<16x16x64xf32>
    %25 = arith.truncf %24 : vector<16x16x64xf32> to vector<16x16x64xbf16>
    %c0_15 = arith.constant 0 : index
    %c0_16 = arith.constant 0 : index
    %c0_17 = arith.constant 0 : index
    %c0_18 = arith.constant 0 : index
    %26 = vector.load %arg5[%c0_15, %c0_16, %c0_17, %c0_18] : memref<1x16x16x64xbf16, #tpu.memory_space<vmem>>, vector<1x16x16x64xbf16>
    %27 = vector.shape_cast %26 : vector<1x16x16x64xbf16> to vector<16x16x64xbf16>
    %28 = vector.shape_cast %25 : vector<16x16x64xbf16> to vector<1x16x16x64xbf16>
    tpu.vector_store %arg5[%c0_15, %c0_16, %c0_17, %c0_18], %28 {strides = array<i32>} : memref<1x16x16x64xbf16, #tpu.memory_space<vmem>>, vector<1x16x16x64xbf16>,
    return
  }
  func.func @transform_0(%arg0: i32, %arg1: i32) -> (i32, i32, i32, i32) {
    %c0_i32 = arith.constant 0 : i32
    %c0_i32_0 = arith.constant 0 : i32
    %c0_i32_1 = arith.constant 0 : i32
    return %arg0, %arg1, %c0_i32, %c0_i32_0 : i32, i32, i32, i32
  }
  func.func @transform_1(%arg0: i32, %arg1: i32) -> (i32, i32, i32) {
    %c0_i32 = arith.constant 0 : i32
    %c0_i32_0 = arith.constant 0 : i32
    %c0_i32_1 = arith.constant 0 : i32
    %c0_i32_2 = arith.constant 0 : i32
    return %c0_i32, %c0_i32_0, %c0_i32_1 : i32, i32, i32
  }
  func.func @transform_2(%arg0: i32, %arg1: i32) -> (i32, i32) {
    %c0_i32 = arith.constant 0 : i32
    %c0_i32_0 = arith.constant 0 : i32
    %c0_i32_1 = arith.constant 0 : i32
    return %c0_i32, %c0_i32_0 : i32, i32
  }
  func.func @transform_3(%arg0: i32, %arg1: i32) -> (i32, i32, i32, i32) {
    %c0_i32 = arith.constant 0 : i32
    %c0_i32_0 = arith.constant 0 : i32
    %c0_i32_1 = arith.constant 0 : i32
    return %arg0, %arg1, %c0_i32, %c0_i32_0 : i32, i32, i32, i32
  }
}

module attributes {stable_mosaic.version = 11 : i64} {
  func.func @_maxpool_kernel(%arg0: i32, %arg1: i32, %arg2: memref<1x16x8x128xbf16, #tpu.memory_space<vmem>>, %arg3: memref<1x8x8x64xbf16, #tpu.memory_space<vmem>>) attributes {dimension_semantics = [#tpu.dimension_semantics<parallel>, #tpu.dimension_semantics<parallel>], iteration_bounds = array<i64: 2, 1>, scalar_prefetch = 0 : i64, scratch_operands = 0 : i64, tpu.core_type = #tpu.core_type<tc>, window_params = [{transform_indices = @transform_0, window_bounds = array<i64: 1, 16, 8, 128>}, {transform_indices = @transform_1, window_bounds = array<i64: 1, 8, 8, 64>}]} {
    %c0 = arith.constant 0 : index
    %c0_0 = arith.constant 0 : index
    %c0_1 = arith.constant 0 : index
    %c0_2 = arith.constant 0 : index
    %0 = vector.load %arg2[%c0, %c0_0, %c0_1, %c0_2] : memref<1x16x8x128xbf16, #tpu.memory_space<vmem>>, vector<1x16x8x128xbf16>
    %1 = vector.shape_cast %0 : vector<1x16x8x128xbf16> to vector<16x8x128xbf16>
    %2 = vector.extract_strided_slice %1 {offsets = [0, 0, 0], sizes = [16, 8, 64], strides = [1, 1, 1]} : vector<16x8x128xbf16> to vector<16x8x64xbf16>
    %3 = vector.extract_strided_slice %1 {offsets = [0, 0, 64], sizes = [16, 8, 64], strides = [1, 1, 1]} : vector<16x8x128xbf16> to vector<16x8x64xbf16>
    %4 = arith.maximumf %2, %3 : vector<16x8x64xbf16>
    %5 = vector.shape_cast %4 : vector<16x8x64xbf16> to vector<8x2x8x64xbf16>
    %cst = arith.constant dense<0xFF80> : vector<8x8x64xbf16>
    %6 = vector.multi_reduction <maximumf>, %5, %cst [1] : vector<8x2x8x64xbf16> to vector<8x8x64xbf16>
    %c0_3 = arith.constant 0 : index
    %c0_4 = arith.constant 0 : index
    %c0_5 = arith.constant 0 : index
    %c0_6 = arith.constant 0 : index
    %7 = vector.load %arg3[%c0_3, %c0_4, %c0_5, %c0_6] : memref<1x8x8x64xbf16, #tpu.memory_space<vmem>>, vector<1x8x8x64xbf16>
    %8 = vector.shape_cast %7 : vector<1x8x8x64xbf16> to vector<8x8x64xbf16>
    %9 = vector.shape_cast %6 : vector<8x8x64xbf16> to vector<1x8x8x64xbf16>
    tpu.vector_store %arg3[%c0_3, %c0_4, %c0_5, %c0_6], %9 {strides = array<i32>} : memref<1x8x8x64xbf16, #tpu.memory_space<vmem>>, vector<1x8x8x64xbf16>,
    return
  }
  func.func @transform_0(%arg0: i32, %arg1: i32) -> (i32, i32, i32, i32) {
    %c0_i32 = arith.constant 0 : i32
    %c0_i32_0 = arith.constant 0 : i32
    %c0_i32_1 = arith.constant 0 : i32
    return %arg0, %arg1, %c0_i32, %c0_i32_0 : i32, i32, i32, i32
  }
  func.func @transform_1(%arg0: i32, %arg1: i32) -> (i32, i32, i32, i32) {
    %c0_i32 = arith.constant 0 : i32
    %c0_i32_0 = arith.constant 0 : i32
    %c0_i32_1 = arith.constant 0 : i32
    return %arg0, %arg1, %c0_i32, %c0_i32_0 : i32, i32, i32, i32
  }
}

module attributes {stable_mosaic.version = 11 : i64} {
  func.func @_conv3x3_kernel(%arg0: i32, %arg1: i32, %arg2: memref<1x8x10x192xbf16, #tpu.memory_space<vmem>>, %arg3: memref<3x192x128xbf16, #tpu.memory_space<vmem>>, %arg4: memref<1x128xf32, #tpu.memory_space<vmem>>, %arg5: memref<1x8x8x128xbf16, #tpu.memory_space<vmem>>) attributes {dimension_semantics = [#tpu.dimension_semantics<parallel>, #tpu.dimension_semantics<parallel>], iteration_bounds = array<i64: 2, 1>, scalar_prefetch = 0 : i64, scratch_operands = 0 : i64, tpu.core_type = #tpu.core_type<tc>, window_params = [{transform_indices = @transform_0, window_bounds = array<i64: 1, 8, 10, 192>}, {pipeline_mode = #tpu.pipeline_mode<synchronous>, transform_indices = @transform_1, window_bounds = array<i64: 3, 192, 128>}, {pipeline_mode = #tpu.pipeline_mode<synchronous>, transform_indices = @transform_2, window_bounds = array<i64: 1, 128>}, {transform_indices = @transform_3, window_bounds = array<i64: 1, 8, 8, 128>}]} {
    %c0 = arith.constant 0 : index
    %c0_0 = arith.constant 0 : index
    %c0_1 = arith.constant 0 : index
    %c0_2 = arith.constant 0 : index
    %0 = vector.load %arg2[%c0, %c0_0, %c0_1, %c0_2] : memref<1x8x10x192xbf16, #tpu.memory_space<vmem>>, vector<1x8x10x192xbf16>
    %1 = vector.shape_cast %0 : vector<1x8x10x192xbf16> to vector<8x10x192xbf16>
    %2 = vector.extract_strided_slice %1 {offsets = [0, 0, 0], sizes = [8, 8, 192], strides = [1, 1, 1]} : vector<8x10x192xbf16> to vector<8x8x192xbf16>
    %3 = vector.shape_cast %2 : vector<8x8x192xbf16> to vector<64x192xbf16>
    %c0_3 = arith.constant 0 : index
    %c0_4 = arith.constant 0 : index
    %c0_5 = arith.constant 0 : index
    %4 = vector.load %arg3[%c0_3, %c0_4, %c0_5] : memref<3x192x128xbf16, #tpu.memory_space<vmem>>, vector<1x192x128xbf16>
    %5 = vector.shape_cast %4 : vector<1x192x128xbf16> to vector<192x128xbf16>
    %cst = arith.constant dense<0.000000e+00> : vector<64x128xf32>
    %6 = tpu.matmul %3, %5, %cst {dimension_numbers = #tpu.dot_dimension_numbers<[1], [0], [0], [1], [0, 0, 1, 1], [], []>} : vector<64x192xbf16>, vector<192x128xbf16>, vector<64x128xf32> -> vector<64x128xf32>
    %7 = vector.extract_strided_slice %1 {offsets = [0, 1, 0], sizes = [8, 8, 192], strides = [1, 1, 1]} : vector<8x10x192xbf16> to vector<8x8x192xbf16>
    %8 = vector.shape_cast %7 : vector<8x8x192xbf16> to vector<64x192xbf16>
    %c1 = arith.constant 1 : index
    %c0_6 = arith.constant 0 : index
    %c0_7 = arith.constant 0 : index
    %9 = vector.load %arg3[%c1, %c0_6, %c0_7] : memref<3x192x128xbf16, #tpu.memory_space<vmem>>, vector<1x192x128xbf16>
    %10 = vector.shape_cast %9 : vector<1x192x128xbf16> to vector<192x128xbf16>
    %cst_8 = arith.constant dense<0.000000e+00> : vector<64x128xf32>
    %11 = tpu.matmul %8, %10, %cst_8 {dimension_numbers = #tpu.dot_dimension_numbers<[1], [0], [0], [1], [0, 0, 1, 1], [], []>} : vector<64x192xbf16>, vector<192x128xbf16>, vector<64x128xf32> -> vector<64x128xf32>
    %12 = arith.addf %6, %11 : vector<64x128xf32>
    %13 = vector.extract_strided_slice %1 {offsets = [0, 2, 0], sizes = [8, 8, 192], strides = [1, 1, 1]} : vector<8x10x192xbf16> to vector<8x8x192xbf16>
    %14 = vector.shape_cast %13 : vector<8x8x192xbf16> to vector<64x192xbf16>
    %c2 = arith.constant 2 : index
    %c0_9 = arith.constant 0 : index
    %c0_10 = arith.constant 0 : index
    %15 = vector.load %arg3[%c2, %c0_9, %c0_10] : memref<3x192x128xbf16, #tpu.memory_space<vmem>>, vector<1x192x128xbf16>
    %16 = vector.shape_cast %15 : vector<1x192x128xbf16> to vector<192x128xbf16>
    %cst_11 = arith.constant dense<0.000000e+00> : vector<64x128xf32>
    %17 = tpu.matmul %14, %16, %cst_11 {dimension_numbers = #tpu.dot_dimension_numbers<[1], [0], [0], [1], [0, 0, 1, 1], [], []>} : vector<64x192xbf16>, vector<192x128xbf16>, vector<64x128xf32> -> vector<64x128xf32>
    %18 = arith.addf %12, %17 : vector<64x128xf32>
    %c0_12 = arith.constant 0 : index
    %c0_13 = arith.constant 0 : index
    %19 = vector.load %arg4[%c0_12, %c0_13] : memref<1x128xf32, #tpu.memory_space<vmem>>, vector<1x128xf32>
    %20 = vector.broadcast %19 : vector<1x128xf32> to vector<64x128xf32>
    %21 = arith.addf %18, %20 : vector<64x128xf32>
    %cst_14 = arith.constant 0.000000e+00 : f32
    %22 = vector.broadcast %cst_14 : f32 to vector<64x128xf32>
    %23 = arith.maximumf %21, %22 : vector<64x128xf32>
    %24 = vector.shape_cast %23 : vector<64x128xf32> to vector<8x8x128xf32>
    %25 = arith.truncf %24 : vector<8x8x128xf32> to vector<8x8x128xbf16>
    %c0_15 = arith.constant 0 : index
    %c0_16 = arith.constant 0 : index
    %c0_17 = arith.constant 0 : index
    %c0_18 = arith.constant 0 : index
    %26 = vector.load %arg5[%c0_15, %c0_16, %c0_17, %c0_18] : memref<1x8x8x128xbf16, #tpu.memory_space<vmem>>, vector<1x8x8x128xbf16>
    %27 = vector.shape_cast %26 : vector<1x8x8x128xbf16> to vector<8x8x128xbf16>
    %28 = vector.shape_cast %25 : vector<8x8x128xbf16> to vector<1x8x8x128xbf16>
    tpu.vector_store %arg5[%c0_15, %c0_16, %c0_17, %c0_18], %28 {strides = array<i32>} : memref<1x8x8x128xbf16, #tpu.memory_space<vmem>>, vector<1x8x8x128xbf16>,
    return
  }
  func.func @transform_0(%arg0: i32, %arg1: i32) -> (i32, i32, i32, i32) {
    %c0_i32 = arith.constant 0 : i32
    %c0_i32_0 = arith.constant 0 : i32
    %c0_i32_1 = arith.constant 0 : i32
    return %arg0, %arg1, %c0_i32, %c0_i32_0 : i32, i32, i32, i32
  }
  func.func @transform_1(%arg0: i32, %arg1: i32) -> (i32, i32, i32) {
    %c0_i32 = arith.constant 0 : i32
    %c0_i32_0 = arith.constant 0 : i32
    %c0_i32_1 = arith.constant 0 : i32
    %c0_i32_2 = arith.constant 0 : i32
    return %c0_i32, %c0_i32_0, %c0_i32_1 : i32, i32, i32
  }
  func.func @transform_2(%arg0: i32, %arg1: i32) -> (i32, i32) {
    %c0_i32 = arith.constant 0 : i32
    %c0_i32_0 = arith.constant 0 : i32
    %c0_i32_1 = arith.constant 0 : i32
    return %c0_i32, %c0_i32_0 : i32, i32
  }
  func.func @transform_3(%arg0: i32, %arg1: i32) -> (i32, i32, i32, i32) {
    %c0_i32 = arith.constant 0 : i32
    %c0_i32_0 = arith.constant 0 : i32
    %c0_i32_1 = arith.constant 0 : i32
    return %arg0, %arg1, %c0_i32, %c0_i32_0 : i32, i32, i32, i32
  }
}

module attributes {stable_mosaic.version = 11 : i64} {
  func.func @_conv3x3_kernel(%arg0: i32, %arg1: i32, %arg2: memref<1x8x10x384xbf16, #tpu.memory_space<vmem>>, %arg3: memref<3x384x128xbf16, #tpu.memory_space<vmem>>, %arg4: memref<1x128xf32, #tpu.memory_space<vmem>>, %arg5: memref<1x8x8x128xbf16, #tpu.memory_space<vmem>>) attributes {dimension_semantics = [#tpu.dimension_semantics<parallel>, #tpu.dimension_semantics<parallel>], iteration_bounds = array<i64: 2, 1>, scalar_prefetch = 0 : i64, scratch_operands = 0 : i64, tpu.core_type = #tpu.core_type<tc>, window_params = [{transform_indices = @transform_0, window_bounds = array<i64: 1, 8, 10, 384>}, {pipeline_mode = #tpu.pipeline_mode<synchronous>, transform_indices = @transform_1, window_bounds = array<i64: 3, 384, 128>}, {pipeline_mode = #tpu.pipeline_mode<synchronous>, transform_indices = @transform_2, window_bounds = array<i64: 1, 128>}, {transform_indices = @transform_3, window_bounds = array<i64: 1, 8, 8, 128>}]} {
    %c0 = arith.constant 0 : index
    %c0_0 = arith.constant 0 : index
    %c0_1 = arith.constant 0 : index
    %c0_2 = arith.constant 0 : index
    %0 = vector.load %arg2[%c0, %c0_0, %c0_1, %c0_2] : memref<1x8x10x384xbf16, #tpu.memory_space<vmem>>, vector<1x8x10x384xbf16>
    %1 = vector.shape_cast %0 : vector<1x8x10x384xbf16> to vector<8x10x384xbf16>
    %2 = vector.extract_strided_slice %1 {offsets = [0, 0, 0], sizes = [8, 8, 384], strides = [1, 1, 1]} : vector<8x10x384xbf16> to vector<8x8x384xbf16>
    %3 = vector.shape_cast %2 : vector<8x8x384xbf16> to vector<64x384xbf16>
    %c0_3 = arith.constant 0 : index
    %c0_4 = arith.constant 0 : index
    %c0_5 = arith.constant 0 : index
    %4 = vector.load %arg3[%c0_3, %c0_4, %c0_5] : memref<3x384x128xbf16, #tpu.memory_space<vmem>>, vector<1x384x128xbf16>
    %5 = vector.shape_cast %4 : vector<1x384x128xbf16> to vector<384x128xbf16>
    %cst = arith.constant dense<0.000000e+00> : vector<64x128xf32>
    %6 = tpu.matmul %3, %5, %cst {dimension_numbers = #tpu.dot_dimension_numbers<[1], [0], [0], [1], [0, 0, 1, 1], [], []>} : vector<64x384xbf16>, vector<384x128xbf16>, vector<64x128xf32> -> vector<64x128xf32>
    %7 = vector.extract_strided_slice %1 {offsets = [0, 1, 0], sizes = [8, 8, 384], strides = [1, 1, 1]} : vector<8x10x384xbf16> to vector<8x8x384xbf16>
    %8 = vector.shape_cast %7 : vector<8x8x384xbf16> to vector<64x384xbf16>
    %c1 = arith.constant 1 : index
    %c0_6 = arith.constant 0 : index
    %c0_7 = arith.constant 0 : index
    %9 = vector.load %arg3[%c1, %c0_6, %c0_7] : memref<3x384x128xbf16, #tpu.memory_space<vmem>>, vector<1x384x128xbf16>
    %10 = vector.shape_cast %9 : vector<1x384x128xbf16> to vector<384x128xbf16>
    %cst_8 = arith.constant dense<0.000000e+00> : vector<64x128xf32>
    %11 = tpu.matmul %8, %10, %cst_8 {dimension_numbers = #tpu.dot_dimension_numbers<[1], [0], [0], [1], [0, 0, 1, 1], [], []>} : vector<64x384xbf16>, vector<384x128xbf16>, vector<64x128xf32> -> vector<64x128xf32>
    %12 = arith.addf %6, %11 : vector<64x128xf32>
    %13 = vector.extract_strided_slice %1 {offsets = [0, 2, 0], sizes = [8, 8, 384], strides = [1, 1, 1]} : vector<8x10x384xbf16> to vector<8x8x384xbf16>
    %14 = vector.shape_cast %13 : vector<8x8x384xbf16> to vector<64x384xbf16>
    %c2 = arith.constant 2 : index
    %c0_9 = arith.constant 0 : index
    %c0_10 = arith.constant 0 : index
    %15 = vector.load %arg3[%c2, %c0_9, %c0_10] : memref<3x384x128xbf16, #tpu.memory_space<vmem>>, vector<1x384x128xbf16>
    %16 = vector.shape_cast %15 : vector<1x384x128xbf16> to vector<384x128xbf16>
    %cst_11 = arith.constant dense<0.000000e+00> : vector<64x128xf32>
    %17 = tpu.matmul %14, %16, %cst_11 {dimension_numbers = #tpu.dot_dimension_numbers<[1], [0], [0], [1], [0, 0, 1, 1], [], []>} : vector<64x384xbf16>, vector<384x128xbf16>, vector<64x128xf32> -> vector<64x128xf32>
    %18 = arith.addf %12, %17 : vector<64x128xf32>
    %c0_12 = arith.constant 0 : index
    %c0_13 = arith.constant 0 : index
    %19 = vector.load %arg4[%c0_12, %c0_13] : memref<1x128xf32, #tpu.memory_space<vmem>>, vector<1x128xf32>
    %20 = vector.broadcast %19 : vector<1x128xf32> to vector<64x128xf32>
    %21 = arith.addf %18, %20 : vector<64x128xf32>
    %cst_14 = arith.constant 0.000000e+00 : f32
    %22 = vector.broadcast %cst_14 : f32 to vector<64x128xf32>
    %23 = arith.maximumf %21, %22 : vector<64x128xf32>
    %24 = vector.shape_cast %23 : vector<64x128xf32> to vector<8x8x128xf32>
    %25 = arith.truncf %24 : vector<8x8x128xf32> to vector<8x8x128xbf16>
    %c0_15 = arith.constant 0 : index
    %c0_16 = arith.constant 0 : index
    %c0_17 = arith.constant 0 : index
    %c0_18 = arith.constant 0 : index
    %26 = vector.load %arg5[%c0_15, %c0_16, %c0_17, %c0_18] : memref<1x8x8x128xbf16, #tpu.memory_space<vmem>>, vector<1x8x8x128xbf16>
    %27 = vector.shape_cast %26 : vector<1x8x8x128xbf16> to vector<8x8x128xbf16>
    %28 = vector.shape_cast %25 : vector<8x8x128xbf16> to vector<1x8x8x128xbf16>
    tpu.vector_store %arg5[%c0_15, %c0_16, %c0_17, %c0_18], %28 {strides = array<i32>} : memref<1x8x8x128xbf16, #tpu.memory_space<vmem>>, vector<1x8x8x128xbf16>,
    return
  }
  func.func @transform_0(%arg0: i32, %arg1: i32) -> (i32, i32, i32, i32) {
    %c0_i32 = arith.constant 0 : i32
    %c0_i32_0 = arith.constant 0 : i32
    %c0_i32_1 = arith.constant 0 : i32
    return %arg0, %arg1, %c0_i32, %c0_i32_0 : i32, i32, i32, i32
  }
  func.func @transform_1(%arg0: i32, %arg1: i32) -> (i32, i32, i32) {
    %c0_i32 = arith.constant 0 : i32
    %c0_i32_0 = arith.constant 0 : i32
    %c0_i32_1 = arith.constant 0 : i32
    %c0_i32_2 = arith.constant 0 : i32
    return %c0_i32, %c0_i32_0, %c0_i32_1 : i32, i32, i32
  }
  func.func @transform_2(%arg0: i32, %arg1: i32) -> (i32, i32) {
    %c0_i32 = arith.constant 0 : i32
    %c0_i32_0 = arith.constant 0 : i32
    %c0_i32_1 = arith.constant 0 : i32
    return %c0_i32, %c0_i32_0 : i32, i32
  }
  func.func @transform_3(%arg0: i32, %arg1: i32) -> (i32, i32, i32, i32) {
    %c0_i32 = arith.constant 0 : i32
    %c0_i32_0 = arith.constant 0 : i32
    %c0_i32_1 = arith.constant 0 : i32
    return %arg0, %arg1, %c0_i32, %c0_i32_0 : i32, i32, i32, i32
  }
}

module attributes {stable_mosaic.version = 11 : i64} {
  func.func @_maxpool_kernel(%arg0: i32, %arg1: i32, %arg2: memref<1x8x4x256xbf16, #tpu.memory_space<vmem>>, %arg3: memref<1x4x4x128xbf16, #tpu.memory_space<vmem>>) attributes {dimension_semantics = [#tpu.dimension_semantics<parallel>, #tpu.dimension_semantics<parallel>], iteration_bounds = array<i64: 2, 1>, scalar_prefetch = 0 : i64, scratch_operands = 0 : i64, tpu.core_type = #tpu.core_type<tc>, window_params = [{transform_indices = @transform_0, window_bounds = array<i64: 1, 8, 4, 256>}, {transform_indices = @transform_1, window_bounds = array<i64: 1, 4, 4, 128>}]} {
    %c0 = arith.constant 0 : index
    %c0_0 = arith.constant 0 : index
    %c0_1 = arith.constant 0 : index
    %c0_2 = arith.constant 0 : index
    %0 = vector.load %arg2[%c0, %c0_0, %c0_1, %c0_2] : memref<1x8x4x256xbf16, #tpu.memory_space<vmem>>, vector<1x8x4x256xbf16>
    %1 = vector.shape_cast %0 : vector<1x8x4x256xbf16> to vector<8x4x256xbf16>
    %2 = vector.extract_strided_slice %1 {offsets = [0, 0, 0], sizes = [8, 4, 128], strides = [1, 1, 1]} : vector<8x4x256xbf16> to vector<8x4x128xbf16>
    %3 = vector.extract_strided_slice %1 {offsets = [0, 0, 128], sizes = [8, 4, 128], strides = [1, 1, 1]} : vector<8x4x256xbf16> to vector<8x4x128xbf16>
    %4 = arith.maximumf %2, %3 : vector<8x4x128xbf16>
    %5 = vector.shape_cast %4 : vector<8x4x128xbf16> to vector<4x2x4x128xbf16>
    %cst = arith.constant dense<0xFF80> : vector<4x4x128xbf16>
    %6 = vector.multi_reduction <maximumf>, %5, %cst [1] : vector<4x2x4x128xbf16> to vector<4x4x128xbf16>
    %c0_3 = arith.constant 0 : index
    %c0_4 = arith.constant 0 : index
    %c0_5 = arith.constant 0 : index
    %c0_6 = arith.constant 0 : index
    %7 = vector.load %arg3[%c0_3, %c0_4, %c0_5, %c0_6] : memref<1x4x4x128xbf16, #tpu.memory_space<vmem>>, vector<1x4x4x128xbf16>
    %8 = vector.shape_cast %7 : vector<1x4x4x128xbf16> to vector<4x4x128xbf16>
    %9 = vector.shape_cast %6 : vector<4x4x128xbf16> to vector<1x4x4x128xbf16>
    tpu.vector_store %arg3[%c0_3, %c0_4, %c0_5, %c0_6], %9 {strides = array<i32>} : memref<1x4x4x128xbf16, #tpu.memory_space<vmem>>, vector<1x4x4x128xbf16>,
    return
  }
  func.func @transform_0(%arg0: i32, %arg1: i32) -> (i32, i32, i32, i32) {
    %c0_i32 = arith.constant 0 : i32
    %c0_i32_0 = arith.constant 0 : i32
    %c0_i32_1 = arith.constant 0 : i32
    return %arg0, %arg1, %c0_i32, %c0_i32_0 : i32, i32, i32, i32
  }
  func.func @transform_1(%arg0: i32, %arg1: i32) -> (i32, i32, i32, i32) {
    %c0_i32 = arith.constant 0 : i32
    %c0_i32_0 = arith.constant 0 : i32
    %c0_i32_1 = arith.constant 0 : i32
    return %arg0, %arg1, %c0_i32, %c0_i32_0 : i32, i32, i32, i32
  }
}

module attributes {stable_mosaic.version = 11 : i64} {
  func.func @_conv3x3_kernel(%arg0: i32, %arg1: i32, %arg2: memref<1x1x6x384xbf16, #tpu.memory_space<vmem>>, %arg3: memref<3x384x256xbf16, #tpu.memory_space<vmem>>, %arg4: memref<1x256xf32, #tpu.memory_space<vmem>>, %arg5: memref<1x1x4x256xbf16, #tpu.memory_space<vmem>>) attributes {dimension_semantics = [#tpu.dimension_semantics<parallel>, #tpu.dimension_semantics<parallel>], iteration_bounds = array<i64: 2, 4>, scalar_prefetch = 0 : i64, scratch_operands = 0 : i64, tpu.core_type = #tpu.core_type<tc>, window_params = [{transform_indices = @transform_0, window_bounds = array<i64: 1, 1, 6, 384>}, {pipeline_mode = #tpu.pipeline_mode<synchronous>, transform_indices = @transform_1, window_bounds = array<i64: 3, 384, 256>}, {pipeline_mode = #tpu.pipeline_mode<synchronous>, transform_indices = @transform_2, window_bounds = array<i64: 1, 256>}, {transform_indices = @transform_3, window_bounds = array<i64: 1, 1, 4, 256>}]} {
    %c0 = arith.constant 0 : index
    %c0_0 = arith.constant 0 : index
    %c0_1 = arith.constant 0 : index
    %c0_2 = arith.constant 0 : index
    %0 = vector.load %arg2[%c0, %c0_0, %c0_1, %c0_2] : memref<1x1x6x384xbf16, #tpu.memory_space<vmem>>, vector<1x1x6x384xbf16>
    %1 = vector.shape_cast %0 : vector<1x1x6x384xbf16> to vector<1x6x384xbf16>
    %2 = vector.extract_strided_slice %1 {offsets = [0, 0, 0], sizes = [1, 4, 384], strides = [1, 1, 1]} : vector<1x6x384xbf16> to vector<1x4x384xbf16>
    %3 = vector.shape_cast %2 : vector<1x4x384xbf16> to vector<4x384xbf16>
    %c0_3 = arith.constant 0 : index
    %c0_4 = arith.constant 0 : index
    %c0_5 = arith.constant 0 : index
    %4 = vector.load %arg3[%c0_3, %c0_4, %c0_5] : memref<3x384x256xbf16, #tpu.memory_space<vmem>>, vector<1x384x256xbf16>
    %5 = vector.shape_cast %4 : vector<1x384x256xbf16> to vector<384x256xbf16>
    %cst = arith.constant dense<0.000000e+00> : vector<4x256xf32>
    %6 = tpu.matmul %3, %5, %cst {dimension_numbers = #tpu.dot_dimension_numbers<[1], [0], [0], [1], [0, 0, 1, 1], [], []>} : vector<4x384xbf16>, vector<384x256xbf16>, vector<4x256xf32> -> vector<4x256xf32>
    %7 = vector.extract_strided_slice %1 {offsets = [0, 1, 0], sizes = [1, 4, 384], strides = [1, 1, 1]} : vector<1x6x384xbf16> to vector<1x4x384xbf16>
    %8 = vector.shape_cast %7 : vector<1x4x384xbf16> to vector<4x384xbf16>
    %c1 = arith.constant 1 : index
    %c0_6 = arith.constant 0 : index
    %c0_7 = arith.constant 0 : index
    %9 = vector.load %arg3[%c1, %c0_6, %c0_7] : memref<3x384x256xbf16, #tpu.memory_space<vmem>>, vector<1x384x256xbf16>
    %10 = vector.shape_cast %9 : vector<1x384x256xbf16> to vector<384x256xbf16>
    %cst_8 = arith.constant dense<0.000000e+00> : vector<4x256xf32>
    %11 = tpu.matmul %8, %10, %cst_8 {dimension_numbers = #tpu.dot_dimension_numbers<[1], [0], [0], [1], [0, 0, 1, 1], [], []>} : vector<4x384xbf16>, vector<384x256xbf16>, vector<4x256xf32> -> vector<4x256xf32>
    %12 = arith.addf %6, %11 : vector<4x256xf32>
    %13 = vector.extract_strided_slice %1 {offsets = [0, 2, 0], sizes = [1, 4, 384], strides = [1, 1, 1]} : vector<1x6x384xbf16> to vector<1x4x384xbf16>
    %14 = vector.shape_cast %13 : vector<1x4x384xbf16> to vector<4x384xbf16>
    %c2 = arith.constant 2 : index
    %c0_9 = arith.constant 0 : index
    %c0_10 = arith.constant 0 : index
    %15 = vector.load %arg3[%c2, %c0_9, %c0_10] : memref<3x384x256xbf16, #tpu.memory_space<vmem>>, vector<1x384x256xbf16>
    %16 = vector.shape_cast %15 : vector<1x384x256xbf16> to vector<384x256xbf16>
    %cst_11 = arith.constant dense<0.000000e+00> : vector<4x256xf32>
    %17 = tpu.matmul %14, %16, %cst_11 {dimension_numbers = #tpu.dot_dimension_numbers<[1], [0], [0], [1], [0, 0, 1, 1], [], []>} : vector<4x384xbf16>, vector<384x256xbf16>, vector<4x256xf32> -> vector<4x256xf32>
    %18 = arith.addf %12, %17 : vector<4x256xf32>
    %c0_12 = arith.constant 0 : index
    %c0_13 = arith.constant 0 : index
    %19 = vector.load %arg4[%c0_12, %c0_13] : memref<1x256xf32, #tpu.memory_space<vmem>>, vector<1x256xf32>
    %20 = vector.broadcast %19 : vector<1x256xf32> to vector<4x256xf32>
    %21 = arith.addf %18, %20 : vector<4x256xf32>
    %cst_14 = arith.constant 0.000000e+00 : f32
    %22 = vector.broadcast %cst_14 : f32 to vector<4x256xf32>
    %23 = arith.maximumf %21, %22 : vector<4x256xf32>
    %24 = vector.shape_cast %23 : vector<4x256xf32> to vector<1x4x256xf32>
    %25 = arith.truncf %24 : vector<1x4x256xf32> to vector<1x4x256xbf16>
    %c0_15 = arith.constant 0 : index
    %c0_16 = arith.constant 0 : index
    %c0_17 = arith.constant 0 : index
    %c0_18 = arith.constant 0 : index
    %26 = vector.load %arg5[%c0_15, %c0_16, %c0_17, %c0_18] : memref<1x1x4x256xbf16, #tpu.memory_space<vmem>>, vector<1x1x4x256xbf16>
    %27 = vector.shape_cast %26 : vector<1x1x4x256xbf16> to vector<1x4x256xbf16>
    %28 = vector.shape_cast %25 : vector<1x4x256xbf16> to vector<1x1x4x256xbf16>
    tpu.vector_store %arg5[%c0_15, %c0_16, %c0_17, %c0_18], %28 {strides = array<i32>} : memref<1x1x4x256xbf16, #tpu.memory_space<vmem>>, vector<1x1x4x256xbf16>,
    return
  }
  func.func @transform_0(%arg0: i32, %arg1: i32) -> (i32, i32, i32, i32) {
    %c0_i32 = arith.constant 0 : i32
    %c0_i32_0 = arith.constant 0 : i32
    %c0_i32_1 = arith.constant 0 : i32
    return %arg0, %arg1, %c0_i32, %c0_i32_0 : i32, i32, i32, i32
  }
  func.func @transform_1(%arg0: i32, %arg1: i32) -> (i32, i32, i32) {
    %c0_i32 = arith.constant 0 : i32
    %c0_i32_0 = arith.constant 0 : i32
    %c0_i32_1 = arith.constant 0 : i32
    %c0_i32_2 = arith.constant 0 : i32
    return %c0_i32, %c0_i32_0, %c0_i32_1 : i32, i32, i32
  }
  func.func @transform_2(%arg0: i32, %arg1: i32) -> (i32, i32) {
    %c0_i32 = arith.constant 0 : i32
    %c0_i32_0 = arith.constant 0 : i32
    %c0_i32_1 = arith.constant 0 : i32
    return %c0_i32, %c0_i32_0 : i32, i32
  }
  func.func @transform_3(%arg0: i32, %arg1: i32) -> (i32, i32, i32, i32) {
    %c0_i32 = arith.constant 0 : i32
    %c0_i32_0 = arith.constant 0 : i32
    %c0_i32_1 = arith.constant 0 : i32
    return %arg0, %arg1, %c0_i32, %c0_i32_0 : i32, i32, i32, i32
  }
}

</mosaic_0001>

<bundles_post_ra>
// kernel: _lambda_.7
= control target key start
LH: loop header
LB: loop body
LE: loop exit
PB: predicated region body
PF: predicated region fallthrough
CT: control target
= control target key end

     0   :  { %s2486_s12 = smov 0   ;;  %s2488_s13 = smov 0   ;;  %s3159_s0 = inlined_call_operand.vmem [shape: bf16[2,16,18,9], index: 0, kind: input, shape index: {}]   ;;  %s3160_s1 = inlined_call_operand.vmem [shape: bf16[3,9,64], index: 1, kind: input, shape index: {}]   ;;  %s3161_s2 = inlined_call_operand.vmem [shape: f32[1,64], index: 2, kind: input, shape index: {}]   ;;  %s3162_s3 = inlined_call_operand.vmem [shape: bf16[2,16,16,64], index: 3, kind: output, shape index: {}]  }
   0x1   :  { %s2490_s14 = smov 0  }
   0x2 LB: > { %s25_s15 = sadd.s32 1, %s2459_s13  ;;  %p1986_p0 = scmp.ge.s32.totalorder %s2463_s14, 1  ;;  %s2463_s14 = sphi %s2490_s14, %s13_s14   ;;  %s2459_s13 = sphi %s2488_s13, %s3168_s13   ;;  %s2455_s12 = sphi %s2486_s12, %s3167_s12  }
   0x3   : > { %p27_p1 = scmp.ge.s32.totalorder %s25_s15, 2  ;;  %p159_p2 = scmp.lt.s32.totalorder %s2463_s14, 3 }
   0x5   : > { %s3170_s15 = smov (%p27_p1, %s25_s15), 0  ;;  %p160_p3 = pnand %p1986_p0, %p159_p2 }
   0x6   : > { %vm758_vm0 = vcmask (!%p160_p3), 1043456   ;;  %vm759_vm1 = vcmask (!%p160_p3), 1044480   ;;  %v2422_v0 = vld [vmem:[%s3160_s1] sm:$0x1f] (!%p160_p3)   ;;  %p194_p4 = scmp.lt.s32.totalorder (!%p160_p3), %s2455_s12, 1  ;;  %v2465_v1 = vmov (!%p160_p3), 65535  }
   0x7   : > { %163 = sbr.rel (%p160_p3) target bundleno = 365 (0x16d), region = 32  ;;  %v760_v2 = vsel (!%p160_p3), %vm758_vm0, 4294967295, %v2465_v1  ;;  %v2425_v4 = vld [vmem:[%s3160_s1 + $0x8] sm:$0x1f] (!%p160_p3)   ;;  %v2428_v7 = vld [vmem:[%s3160_s1 + $0x10] sm:$0x1f] (!%p160_p3)  }
   0x8   : > { %v761_v3 = vsel (!%p160_p3), %vm759_vm1, %v760_v2, 0  ;;  %vm709_vm2 = vcmask (!%p160_p3), 72704   ;;  %vm266_vm3 = vsmask.f32 (!%p160_p3), 3328  ;;  %vm267_vm4 = vsmask.f32 (!%p160_p3), 7440 }
   0x9   : > { %v2512_v5 = vand.u32 (!%p160_p3), %v2422_v0, %v761_v3  ;;  %v763_v6 = vand.u32 (!%p160_p3), %v2425_v4, %v761_v3  ;;  %v1459_v8 = vand.u32 (!%p160_p3), %v2428_v7, %v761_v3  ;;  %vm2594_vm5 = vmor (!%p160_p3), %vm266_vm3, %vm267_vm4  ;;  %vm1239_vm6 = vcmask (!%p160_p3), 1042432  }
   0xa   : > { %vm1240_vm7 = vcmask (!%p160_p3), 1046532   ;;  %vm1853_vm9 = vcmask (!%p160_p3), 519168  }
   0xb   : > { %2262 = vmatprep.subr.bf16.mxu0 (!%p160_p3), %v2512_v5  ;;  %2228 = vmatprep.subr.bf16.mxu1 (!%p160_p3), %v763_v6  ;;  %vm2691_vm8 = vmor (!%p160_p3), %vm1239_vm6, %vm1240_vm7 }
   0xc   : > { %2263 = vmatpush3.bf16.msra.mxu0 (!%p160_p3), %v2512_v5  ;;  %2229 = vmatpush3.bf16.msra.mxu1 (!%p160_p3), %v763_v6 }
   0xd   : > { %2330 = vmatprep.subr.bf16.mxu1 (!%p160_p3), %v2512_v5  ;;  %2296 = vmatprep.subr.bf16.mxu0 (!%p160_p3), %v1459_v8 }
   0xe   : > { %s3172_s12 = smov (!%p194_p4, %s2455_s12), 1 }
   0xf   : > { %s2396_s20 = smul.u32 192, %s3172_s12  ;;  %s2144_s28 = sshll.u32 %s3172_s12, 7 }
  0x10   : > { %s3055_s4 = scalar_lea.vmem %s3162_s3, %s2144_s28 }
  0x11   : > { %s2523_s25 = scalar_lea.vmem %s3159_s0, %s2396_s20 }
  0x12   : > { %v2526_v9 = vld [vmem:[%s2523_s25] sm:$0xf]  ;;  %v2529_v10 = vld [vmem:[%s2523_s25 + $0x4] sm:$0xf]  ;;  %v2532_v11 = vld [vmem:[%s2523_s25 + $0xc] sm:$0xf] }
  0x13   : > { %v270_v12 = vshrl.u32 %v2526_v9, 16  ;;  %v273_v13 = vshll.u32 %v2526_v9, 16  ;;  %v283_v14 = vshrl.u32 %v2529_v10, 16  ;;  %v2025_v15 = vcombine.low %v2526_v9, %v2529_v10  ;;  %v2540_v16 = vld [vmem:[%s2523_s25 + $0x10] sm:$0xf] }
  0x14   : > { %v2058_v17 = vrot.slane %v2526_v9, 9  ;;  %v1244_v18 = vrot.slane %v2529_v10, 5  ;;  %v294_v19 = vshrl.u32 %v2532_v11, 16  ;;  %v297_v20 = vshll.u32 %v2532_v11, 16  ;;  %v2548_v21 = vld [vmem:[%s2523_s25 + $0x18] sm:$0xf] }
  0x15   : > { %2264 = vmatprep.mubr.msk.bf16.mxu0 %vm709_vm2, %v2025_v15  ;;  %v307_v22 = vshrl.u32 %v2540_v16, 16  ;;  %v2026_v23 = vcombine.low %v2532_v11, %v2540_v16  ;;  %v2059_v24 = vrot.slane %v2532_v11, 9  ;;  %v1251_v25 = vrot.slane %v2540_v16, 5  ;;  %v2557_v26 = vld [vmem:[%s2523_s25 + $0x1c] sm:$0xf] }
  0x16   : > { %v2561_v27 = vrot.slane %v1244_v18, 4  ;;  %v318_v28 = vshrl.u32 %v2548_v21, 16  ;;  %v321_v29 = vshll.u32 %v2548_v21, 16  ;;  %v331_v30 = vshrl.u32 %v2557_v26, 16  ;;  %v2567_v31 = vld [vmem:[%s2523_s25 + $0x8] sm:$0x1] }
  0x17   : > { %2265 = vmatmul.mubr.msk.bf16.vlgmr.msra.gmra.mrb[0].mxu0 %vm709_vm2, %v2026_v23  ;;  %v2572_v32 = vrot.slane %v1251_v25, 4  ;;  %v2027_v33 = vcombine.low %v2548_v21, %v2557_v26  ;;  %v272_v34 = vrot.slane %v270_v12, 4  ;;  %v275_v35 = vrot.slane %v273_v13, 5  ;;  %v2577_v36 = vld [vmem:[%s2523_s25 + $0x24] sm:$0xf] }
  0x18   : > { %v279_v37 = vshll.u32 %v2529_v10, 16  ;;  %v285_v38 = vrot.slane %v283_v14, 4  ;;  %v289_v39 = vshll.u32 %v2567_v31, 16  ;;  %v1247_v40 = vrot.slane %v2567_v31, 5  ;;  %v2583_v41 = vld [vmem:[%s2523_s25 + $0x28] sm:$0xf]  ;;  %2297 = vmatpush3.bf16.msra.mxu0 %v1459_v8 }
  0x19   : > { %2268 = vmatprep.mubr.msk.bf16.mxu0 %vm709_vm2, %v2027_v33  ;;  %v276_v42 = vor.u32 %v275_v35, %v272_v34  ;;  %v342_v43 = vshrl.u32 %v2577_v36, 16  ;;  %v345_v44 = vshll.u32 %v2577_v36, 16  ;;  %v355_v45 = vshrl.u32 %v2583_v41, 16  ;;  %v2590_v46 = vld [vmem:[%s2523_s25 + $0x14] sm:$0x1] }
  0x1a   : > { %v281_v48 = vrot.slane %v279_v37, 5  ;;  %v291_v49 = vrot.slane %v289_v39, 5  ;;  %v2028_v50 = vcombine.low %v2577_v36, %v2583_v41  ;;  %v296_v51 = vrot.slane %v294_v19, 4  ;;  %v2601_v52 = vld [vmem:[%s2523_s25 + $0x30] sm:$0xf] }
  0x1b   : > { %v277_v53 = vrot.slane %v276_v42, 4  ;;  %v299_v54 = vrot.slane %v297_v20, 5  ;;  %v303_v55 = vshll.u32 %v2540_v16, 16  ;;  %v309_v56 = vrot.slane %v307_v22, 4  ;;  %v2605_v57 = vld [vmem:[%s2523_s25 + $0x34] sm:$0xf] }
  0x1c   : > { %v286_v58 = vor.u32 %v285_v38, %v281_v48  ;;  %v313_v59 = vshll.u32 %v2590_v46, 16  ;;  %v1254_v60 = vrot.slane %v2590_v46, 5  ;;  %v366_v61 = vshrl.u32 %v2601_v52, 16  ;;  %v2614_v2 = vld [vmem:[%s2523_s25 + $0x20] sm:$0x1] }
  0x1d   : > { %v282_v62 = vsel %vm2594_vm5, %v277_v53, %v281_v48  ;;  %v300_v63 = vor.u32 %v299_v54, %v296_v51  ;;  %v305_v0 = vrot.slane %v303_v55, 5  ;;  %v369_v1 = vshll.u32 %v2601_v52, 16  ;;  %v2621_v15 = vld [vmem:[%s2523_s25 + $0x3c] sm:$0xf]  ;;  %v2629_v33 = vld [vmem:[%s2523_s25 + $0x40] sm:$0xf] }
  0x1e   : > { %v287_v3 = vrot.slane %v286_v58, 4  ;;  %v315_v4 = vrot.slane %v313_v59, 5  ;;  %v379_v6 = vshrl.u32 %v2605_v57, 16  ;;  %v2029_v7 = vcombine.low %v2601_v52, %v2605_v57  ;;  %v2636_v42 = vld [vmem:[%s2523_s25 + $0x2c] sm:$0x1] }
  0x1f   : > { %2269 = vmatmul.mubr.msk.bf16.gmra.mrb[4].mxu0 %vm709_vm2, %v2028_v50  ;;  %v301_v8 = vrot.slane %v300_v63, 4  ;;  %v310_v12 = vor.u32 %v309_v56, %v305_v0  ;;  %v320_v13 = vrot.slane %v318_v28, 4  ;;  %v323_v14 = vrot.slane %v321_v29, 5  ;;  %v2645_v53 = vld [vmem:[%s2523_s25 + $0x48] sm:$0xf] }
  0x20   : > { %v292_v19 = vsel %vm2594_vm5, %v287_v3, %v291_v49  ;;  %2272 = vmatprep.mubr.msk.bf16.mxu0 %vm709_vm2, %v2029_v7  ;;  %v327_v20 = vshll.u32 %v2557_v26, 16  ;;  %v333_v22 = vrot.slane %v331_v30, 4  ;;  %v337_v23 = vshll.u32 %v2614_v2, 16  ;;  %v2648_v59 = vld [vmem:[%s2523_s25 + $0x4c] sm:$0xf] }
  0x21   : > { %v1992_v34 = vcombine.low %v282_v62, %v292_v19  ;;  %v306_v28 = vsel %vm2594_vm5, %v301_v8, %v305_v0  ;;  %v311_v29 = vrot.slane %v310_v12, 4  ;;  %v324_v35 = vor.u32 %v323_v14, %v320_v13  ;;  %v2666_v19 = vld [vmem:[%s2523_s25 + $0x54] sm:$0xf] }
  0x22   : > { %v329_v37 = vrot.slane %v327_v20, 5  ;;  %v339_v38 = vrot.slane %v337_v23, 5  ;;  %v390_v39 = vshrl.u32 %v2621_v15, 16  ;;  %v393_v30 = vshll.u32 %v2621_v15, 16 }
  0x23   : > { %2230 = vmatprep.mubr.msk.bf16.mxu1 %vm709_vm2, %v1992_v34  ;;  %v316_v48 = vsel %vm2594_vm5, %v311_v29, %v315_v4  ;;  %v325_v49 = vrot.slane %v324_v35, 4  ;;  %v403_v50 = vshrl.u32 %v2629_v33, 16  ;;  %v2030_v51 = vcombine.low %v2621_v15, %v2629_v33 }
  0x24   : > { %v1993_v54 = vcombine.low %v306_v28, %v316_v48  ;;  %v334_v55 = vor.u32 %v333_v22, %v329_v37  ;;  %v344_v56 = vrot.slane %v342_v43, 4  ;;  %v347_v58 = vrot.slane %v345_v44, 5  ;;  %v2658_v44 = vld [vmem:[%s2523_s25 + $0x38] sm:$0x1] }
  0x25   : > { %v330_v62 = vsel %vm2594_vm5, %v325_v49, %v329_v37  ;;  %v351_v63 = vshll.u32 %v2583_v41, 16  ;;  %v357_v0 = vrot.slane %v355_v45, 4  ;;  %v361_v3 = vshll.u32 %v2636_v42, 16 }
  0x26   : > { %2231 = vmatmul.mubr.msk.bf16.vlgmr.msra.gmra.mrb[0].mxu1 %vm709_vm2, %v1993_v54  ;;  %v335_v4 = vrot.slane %v334_v55, 4  ;;  %v348_v7 = vor.u32 %v347_v58, %v344_v56  ;;  %v414_v8 = vshrl.u32 %v2645_v53, 16  ;;  %v417_v43 = vshll.u32 %v2645_v53, 16  ;;  %v2685_v56 = vld [vmem:[%s2523_s25 + $0x44] sm:$0x1] }
  0x27   : > { %2331 = vmatpush3.bf16.msra.mxu1 %v2512_v5  ;;  %2273 = vmatmul.mubr.msk.bf16.gmra.mrb[8].mxu0 %vm709_vm2, %v2030_v51  ;;  %v353_v12 = vrot.slane %v351_v63, 5  ;;  %v363_v13 = vrot.slane %v361_v3, 5  ;;  %v427_v45 = vshrl.u32 %v2648_v59, 16  ;;  %v2031_v14 = vcombine.low %v2645_v53, %v2648_v59  ;;  %v2673_v5 = vld [vmem:[%s2523_s25 + $0x58] sm:$0xf] }
  0x28   : > { %v340_v20 = vsel %vm2594_vm5, %v335_v4, %v339_v38  ;;  %v349_v22 = vrot.slane %v348_v7, 4  ;;  %v368_v23 = vrot.slane %v366_v61, 4  ;;  %v371_v34 = vrot.slane %v369_v1, 5 }
  0x29   : > { %v1994_v28 = vcombine.low %v330_v62, %v340_v20  ;;  %v358_v29 = vor.u32 %v357_v0, %v353_v12  ;;  %2276 = vmatprep.mubr.msk.bf16.mxu0 %vm709_vm2, %v2031_v14  ;;  %v375_v35 = vshll.u32 %v2605_v57, 16  ;;  %v381_v37 = vrot.slane %v379_v6, 4 }
  0x2a   : > { %v354_v48 = vsel %vm2594_vm5, %v349_v22, %v353_v12  ;;  %v372_v49 = vor.u32 %v371_v34, %v368_v23  ;;  %v385_v38 = vshll.u32 %v2658_v44, 16  ;;  %v438_v51 = vshrl.u32 %v2666_v19, 16 }
  0x2b   : > { %2234 = vmatprep.mubr.msk.bf16.mxu1 %vm709_vm2, %v1994_v28  ;;  %v359_v61 = vrot.slane %v358_v29, 4  ;;  %v377_v1 = vrot.slane %v375_v35, 5  ;;  %v441_v54 = vshll.u32 %v2666_v19, 16  ;;  %v451_v55 = vshrl.u32 %v2673_v5, 16  ;;  %v2715_v29 = vld [vmem:[%s2523_s25 + $0x50] sm:$0x1] }
  0x2c   : > { %v373_v58 = vrot.slane %v372_v49, 4  ;;  %v387_v6 = vrot.slane %v385_v38, 5  ;;  %v2032_v62 = vcombine.low %v2666_v19, %v2673_v5  ;;  %v392_v63 = vrot.slane %v390_v39, 4 }
  0x2d   : > { %v364_v3 = vsel %vm2594_vm5, %v359_v61, %v363_v13  ;;  %v382_v4 = vor.u32 %v381_v37, %v377_v1  ;;  %v395_v7 = vrot.slane %v393_v30, 5  ;;  %v399_v12 = vshll.u32 %v2629_v33, 16 }
  0x2e   : > { %v1995_v14 = vcombine.low %v354_v48, %v364_v3  ;;  %v378_v20 = vsel %vm2594_vm5, %v373_v58, %v377_v1  ;;  %v405_v22 = vrot.slane %v403_v50, 4  ;;  %v409_v39 = vshll.u32 %v2685_v56, 16  ;;  %v2737_v58 = vld [vmem:[%s2523_s25 + $0x5c] sm:$0x1] }
  0x2f   : > { %v383_v23 = vrot.slane %v382_v4, 4  ;;  %2277 = vmatmul.mubr.msk.bf16.gmra.mrb[12].mxu0 %vm709_vm2, %v2032_v62  ;;  %v396_v34 = vor.u32 %v395_v7, %v392_v63  ;;  %v401_v28 = vrot.slane %v399_v12, 5  ;;  %v1245_v30 = vsel %vm2691_vm8, %v2058_v17, %v1244_v18  ;;  %v2745_v4 = vld [vmem:[%s2523_s25 + $0x60] sm:$0xf] }
  0x30   : > { %2235 = vmatmul.mubr.msk.bf16.gmra.mrb[4].mxu1 %vm709_vm2, %v1995_v14  ;;  %v411_v13 = vrot.slane %v409_v39, 5  ;;  %v1248_v50 = vsel %vm2691_vm8, %v2561_v27, %v1247_v40  ;;  %v416_v35 = vrot.slane %v414_v8, 4  ;;  %v419_v37 = vrot.slane %v417_v43, 5 }
  0x31   : > { %v388_v10 = vsel %vm2594_vm5, %v383_v23, %v387_v6  ;;  %v397_v9 = vrot.slane %v396_v34, 4  ;;  %v406_v48 = vor.u32 %v405_v22, %v401_v28  ;;  %v2076_v17 = vcombine.low %v1245_v30, %v1248_v50  ;;  %v2754_v23 = vld [vmem:[%s2523_s25 + $0x64] sm:$0xf] }
  0x32   : > { %v1996_v18 = vcombine.low %v378_v20, %v388_v10  ;;  %v420_v49 = vor.u32 %v419_v37, %v416_v35  ;;  %v423_v38 = vshll.u32 %v2648_v59, 16  ;;  %v429_v31 = vrot.slane %v427_v45, 4 }
  0x33   : > { %v402_v61 = vsel %vm2594_vm5, %v397_v9, %v401_v28  ;;  %v407_v27 = vrot.slane %v406_v48, 4  ;;  %2298 = vmatprep.mubr.msk.bf16.mxu0 %vm709_vm2, %v2076_v17  ;;  %v433_v40 = vshll.u32 %v2715_v29, 16  ;;  %v1252_v8 = vsel %vm2691_vm8, %v2059_v24, %v1251_v25 }
  0x34   : > { %2238 = vmatprep.mubr.msk.bf16.mxu1 %vm709_vm2, %v1996_v18  ;;  %v421_v43 = vrot.slane %v420_v49, 4  ;;  %v425_v45 = vrot.slane %v423_v38, 5  ;;  %v1255_v1 = vsel %vm2691_vm8, %v2572_v32, %v1254_v60  ;;  %v440_v6 = vrot.slane %v438_v51, 4 }
  0x35   : > { %v412_v11 = vsel %vm2594_vm5, %v407_v27, %v411_v13  ;;  %v435_v16 = vrot.slane %v433_v40, 5  ;;  %v2077_v62 = vcombine.low %v1252_v8, %v1255_v1  ;;  %v443_v63 = vrot.slane %v441_v54, 5 }
  0x36   : > { %v1997_v24 = vcombine.low %v402_v61, %v412_v11  ;;  %v426_v25 = vsel %vm2594_vm5, %v421_v43, %v425_v45  ;;  %v430_v3 = vor.u32 %v429_v31, %v425_v45  ;;  %v447_v46 = vshll.u32 %v2673_v5, 16  ;;  %v2775_v61 = vld [vmem:[%s2523_s25 + $0x6c] sm:$0xf]  ;;  %v2781_v45 = vld [vmem:[%s2523_s25 + $0x70] sm:$0xf] }
  0x37   : > { %2299 = vmatmul.mubr.msk.bf16.vlgmr.msra.gmra.mrb[0].mxu0 %vm709_vm2, %v2077_v62  ;;  %v444_v32 = vor.u32 %v443_v63, %v440_v6  ;;  %v453_v60 = vrot.slane %v451_v55, 4  ;;  %v457_v51 = vshll.u32 %v2737_v58, 16  ;;  %v2060_v7 = vrot.slane %v2548_v21, 9  ;;  %v2786_v62 = vld [vmem:[%s2523_s25 + $0x74] sm:$0x1] }
  0x38   : > { %2239 = vmatmul.mubr.msk.bf16.gmra.mrb[8].mxu1 %vm709_vm2, %v1997_v24  ;;  %v431_v54 = vrot.slane %v430_v3, 4  ;;  %v449_v12 = vrot.slane %v447_v46, 5  ;;  %v1258_v14 = vrot.slane %v2557_v26, 5  ;;  %v1261_v20 = vrot.slane %v2614_v2, 5  ;;  %v2763_v26 = vld [vmem:[%s2523_s25 + $0x68] sm:$0x1] }
  0x39   : > { %v445_v22 = vrot.slane %v444_v32, 4  ;;  %v459_v39 = vrot.slane %v457_v51, 5  ;;  %v462_v34 = vshrl.u32 %v2745_v4, 16  ;;  %v465_v55 = vshll.u32 %v2745_v4, 16 }
  0x3a   : > { %v436_v28 = vsel %vm2594_vm5, %v431_v54, %v435_v16  ;;  %v454_v21 = vor.u32 %v453_v60, %v449_v12  ;;  %v1259_v30 = vsel %vm2691_vm8, %v2060_v7, %v1258_v14  ;;  %v1260_v13 = vrot.slane %v1258_v14, 4 }
  0x3b   : > { %v1998_v2 = vcombine.low %v426_v25, %v436_v28  ;;  %v450_v50 = vsel %vm2594_vm5, %v445_v22, %v449_v12  ;;  %v464_v35 = vrot.slane %v462_v34, 4  ;;  %v467_v37 = vrot.slane %v465_v55, 5  ;;  %v2801_v22 = vld [vmem:[%s2523_s25 + $0x78] sm:$0xf] }
  0x3c   : > { %v455_v10 = vrot.slane %v454_v21, 4  ;;  %v1262_v9 = vsel %vm2691_vm8, %v1260_v13, %v1261_v20  ;;  %v471_v48 = vshll.u32 %v2754_v23, 16  ;;  %v475_v17 = vshrl.u32 %v2754_v23, 16  ;;  %v2808_v21 = vld [vmem:[%s2523_s25 + $0x7c] sm:$0xf] }
  0x3d   : > { %2242 = vmatprep.mubr.msk.bf16.mxu1 %vm709_vm2, %v1998_v2  ;;  %v2078_v18 = vcombine.low %v1259_v30, %v1262_v9  ;;  %v468_v49 = vor.u32 %v467_v37, %v464_v35  ;;  %v481_v38 = vshll.u32 %v2763_v26, 16  ;;  %v2061_v31 = vrot.slane %v2577_v36, 9  ;;  %v2813_v35 = vld [vmem:[%s2523_s25 + $0x80] sm:$0x1] }
  0x3e   : > { %v460_v27 = vsel %vm2594_vm5, %v455_v10, %v459_v39  ;;  %v473_v40 = vrot.slane %v471_v48, 5  ;;  %v477_v8 = vrot.slane %v475_v17, 4  ;;  %v1265_v43 = vrot.slane %v2583_v41, 5 }
  0x3f   : > { %v1999_v1 = vcombine.low %v450_v50, %v460_v27  ;;  %2302 = vmatprep.mubr.msk.bf16.mxu0 %vm709_vm2, %v2078_v18  ;;  %v469_v6 = vrot.slane %v468_v49, 4  ;;  %v483_v11 = vrot.slane %v481_v38, 5  ;;  %v1268_v16 = vrot.slane %v2636_v42, 5  ;;  %v2826_v27 = vld [vmem:[%s2523_s25 + $0x84] sm:$0xf] }
  0x40   : > { %v478_v36 = vor.u32 %v477_v8, %v473_v40  ;;  %v1266_v63 = vsel %vm2691_vm8, %v2061_v31, %v1265_v43  ;;  %v1267_v24 = vrot.slane %v1265_v43, 4  ;;  %v486_v25 = vshrl.u32 %v2775_v61, 16 }
  0x41   : > { %2243 = vmatmul.mubr.msk.bf16.gmra.mrb[12].mxu1 %vm709_vm2, %v1999_v1  ;;  %v474_v41 = vsel %vm2594_vm5, %v469_v6, %v473_v40  ;;  %v489_v3 = vshll.u32 %v2775_v61, 16  ;;  %v495_v42 = vshll.u32 %v2781_v45, 16  ;;  %v499_v46 = vshrl.u32 %v2781_v45, 16  ;;  %v2833_v6 = vld [vmem:[%s2523_s25 + $0x88] sm:$0xf] }
  0x42   : > { %v479_v32 = vrot.slane %v478_v36, 4  ;;  %v1269_v60 = vsel %vm2691_vm8, %v1267_v24, %v1268_v16  ;;  %v488_v51 = vrot.slane %v486_v25, 4  ;;  %v505_v7 = vshll.u32 %v2786_v62, 16 }
  0x43   : > { %v2079_v54 = vcombine.low %v1266_v63, %v1269_v60  ;;  %v491_v12 = vrot.slane %v489_v3, 5  ;;  %v497_v14 = vrot.slane %v495_v42, 5  ;;  %v501_v20 = vrot.slane %v499_v46, 4 }
  0x44   : > { %v484_v39 = vsel %vm2594_vm5, %v479_v32, %v483_v11  ;;  %v507_v34 = vrot.slane %v505_v7, 5  ;;  %v2062_v55 = vrot.slane %v2601_v52, 9  ;;  %v1272_v28 = vrot.slane %v2605_v57, 5  ;;  %v2842_v32 = vld [vmem:[%s2523_s25 + $0x8c] sm:$0x1] }
  0x45   : > { %v2000_v30 = vcombine.low %v474_v41, %v484_v39  ;;  %2303 = vmatmul.mubr.msk.bf16.gmra.mrb[4].mxu0 %vm709_vm2, %v2079_v54  ;;  %v492_v13 = vor.u32 %v491_v12, %v488_v51  ;;  %v502_v2 = vor.u32 %v501_v20, %v497_v14  ;;  %v1275_v50 = vrot.slane %v2658_v44, 5 }
  0x46   : > { %v1273_v37 = vsel %vm2691_vm8, %v2062_v55, %v1272_v28  ;;  %v1274_v10 = vrot.slane %v1272_v28, 4  ;;  %v510_v52 = vshrl.u32 %v2801_v22, 16  ;;  %v513_v57 = vshll.u32 %v2801_v22, 16 }
  0x47   : > { %2246 = vmatprep.mubr.msk.bf16.mxu1 %vm709_vm2, %v2000_v30  ;;  %v493_v9 = vrot.slane %v492_v13, 4  ;;  %v503_v48 = vrot.slane %v502_v2, 4  ;;  %v519_v17 = vshll.u32 %v2808_v21, 16  ;;  %v523_v18 = vshrl.u32 %v2808_v21, 16  ;;  %v2856_v30 = vld [vmem:[%s2523_s25 + $0x90] sm:$0xf] }
  0x48   : > { %v1276_v44 = vsel %vm2691_vm8, %v1274_v10, %v1275_v50  ;;  %v512_v49 = vrot.slane %v510_v52, 4  ;;  %v515_v38 = vrot.slane %v513_v57, 5  ;;  %v529_v31 = vshll.u32 %v2813_v35, 16  ;;  %v2862_v10 = vld [vmem:[%s2523_s25 + $0x94] sm:$0xf] }
  0x49   : > { %v498_v40 = vsel %vm2594_vm5, %v493_v9, %v497_v14  ;;  %v508_v8 = vsel %vm2594_vm5, %v503_v48, %v507_v34  ;;  %v2080_v43 = vcombine.low %v1273_v37, %v1276_v44  ;;  %v521_v1 = vrot.slane %v519_v17, 5  ;;  %v2866_v17 = vld [vmem:[%s2523_s25 + $0x98] sm:$0x1] }
  0x4a   : > { %v2001_v11 = vcombine.low %v498_v40, %v508_v8  ;;  %v516_v16 = vor.u32 %v515_v38, %v512_v49  ;;  %v525_v36 = vrot.slane %v523_v18, 4  ;;  %v531_v63 = vrot.slane %v529_v31, 5 }
  0x4b   : > { %2306 = vmatprep.mubr.msk.bf16.mxu0 %vm709_vm2, %v2080_v43  ;;  %v2063_v24 = vrot.slane %v2621_v15, 9  ;;  %v1279_v25 = vrot.slane %v2629_v33, 5  ;;  %v1282_v41 = vrot.slane %v2685_v56, 5  ;;  %v534_v3 = vshrl.u32 %v2826_v27, 16 }
  0x4c   : > { %2247 = vmatmul.mubr.msk.bf16.gmra.mrb[16].mxu1 %vm709_vm2, %v2001_v11  ;;  %v517_v42 = vrot.slane %v516_v16, 4  ;;  %v526_v46 = vor.u32 %v525_v36, %v521_v1  ;;  %v537_v60 = vshll.u32 %v2826_v27, 16  ;;  %v543_v51 = vshll.u32 %v2833_v6, 16  ;;  %v2882_v11 = vld [vmem:[%s2523_s25 + $0x9c] sm:$0xf] }
  0x4d   : > { %v1280_v15 = vsel %vm2691_vm8, %v2063_v24, %v1279_v25  ;;  %v1281_v7 = vrot.slane %v1279_v25, 4  ;;  %v536_v33 = vrot.slane %v534_v3, 4  ;;  %v547_v56 = vshrl.u32 %v2833_v6, 16  ;;  %v2887_v25 = vld [vmem:[%s2523_s25 + $0xa0] sm:$0xf] }
  0x4e   : > { %v522_v54 = vsel %vm2594_vm5, %v517_v42, %v521_v1  ;;  %v527_v12 = vrot.slane %v526_v46, 4  ;;  %v539_v14 = vrot.slane %v537_v60, 5  ;;  %v545_v20 = vrot.slane %v543_v51, 5 }
  0x4f   : > { %v1283_v39 = vsel %vm2691_vm8, %v1281_v7, %v1282_v41  ;;  %v549_v34 = vrot.slane %v547_v56, 4  ;;  %v553_v55 = vshll.u32 %v2842_v32, 16  ;;  %v2064_v28 = vrot.slane %v2645_v53, 9  ;;  %v2894_v7 = vld [vmem:[%s2523_s25 + $0xa4] sm:$0x1] }
  0x50   : > { %v532_v13 = vsel %vm2594_vm5, %v527_v12, %v531_v63  ;;  %v2081_v2 = vcombine.low %v1280_v15, %v1283_v39  ;;  %v540_v50 = vor.u32 %v539_v14, %v536_v33  ;;  %v1286_v37 = vrot.slane %v2648_v59, 5  ;;  %v2902_v14 = vld [vmem:[%s2523_s25 + $0xa8] sm:$0xf] }
  0x51   : > { %v2002_v52 = vcombine.low %v522_v54, %v532_v13  ;;  %v550_v57 = vor.u32 %v549_v34, %v545_v20  ;;  %v555_v9 = vrot.slane %v553_v55, 5  ;;  %v1289_v48 = vrot.slane %v2715_v29, 5 }
  0x52   : > { %2307 = vmatmul.mubr.msk.bf16.gmra.mrb[8].mxu0 %vm709_vm2, %v2081_v2  ;;  %v541_v53 = vrot.slane %v540_v50, 4  ;;  %v1287_v18 = vsel %vm2691_vm8, %v2064_v28, %v1286_v37  ;;  %v1288_v44 = vrot.slane %v1286_v37, 4  ;;  %v558_v59 = vshrl.u32 %v2856_v30, 16 }
  0x53   : > { %2250 = vmatprep.mubr.msk.bf16.mxu1 %vm709_vm2, %v2002_v52  ;;  %v551_v49 = vrot.slane %v550_v57, 4  ;;  %v561_v38 = vshll.u32 %v2856_v30, 16  ;;  %v567_v29 = vshll.u32 %v2862_v10, 16  ;;  %v571_v31 = vshrl.u32 %v2862_v10, 16  ;;  %v2912_v52 = vld [vmem:[%s2523_s25 + $0xac] sm:$0xf] }
  0x54   : > { %v546_v40 = vsel %vm2594_vm5, %v541_v53, %v545_v20  ;;  %v1290_v8 = vsel %vm2691_vm8, %v1288_v44, %v1289_v48  ;;  %v560_v43 = vrot.slane %v558_v59, 4  ;;  %v577_v1 = vshll.u32 %v2866_v17, 16  ;;  %v2918_v44 = vld [vmem:[%s2523_s25 + $0xb0] sm:$0x1]  ;;  %v2921_v59 = vld [vmem:[%s2523_s25 + $0xb4] sm:$0xf] }
  0x55   : > { %v556_v16 = vsel %vm2594_vm5, %v551_v49, %v555_v9  ;;  %v2082_v36 = vcombine.low %v1287_v18, %v1290_v8  ;;  %v563_v63 = vrot.slane %v561_v38, 5  ;;  %v569_v24 = vrot.slane %v567_v29, 5 }
  0x56   : > { %v2003_v41 = vcombine.low %v546_v40, %v556_v16  ;;  %v573_v3 = vrot.slane %v571_v31, 4  ;;  %v579_v42 = vrot.slane %v577_v1, 5  ;;  %v2065_v46 = vrot.slane %v2666_v19, 9 }
  0x57   : > { %2310 = vmatprep.mubr.msk.bf16.mxu0 %vm709_vm2, %v2082_v36  ;;  %v564_v60 = vor.u32 %v563_v63, %v560_v43  ;;  %v1293_v51 = vrot.slane %v2673_v5, 5  ;;  %v1296_v15 = vrot.slane %v2737_v58, 5  ;;  %v582_v33 = vshrl.u32 %v2882_v11, 16  ;;  %v2930_v63 = vld [vmem:[%s2523_s25 + $0xb8] sm:$0xf] }
  0x58   : > { %2251 = vmatmul.mubr.msk.bf16.gmra.mrb[20].mxu1 %vm709_vm2, %v2003_v41  ;;  %v574_v56 = vor.u32 %v573_v3, %v569_v24  ;;  %v585_v54 = vshll.u32 %v2882_v11, 16  ;;  %v591_v12 = vshll.u32 %v2887_v25, 16  ;;  %v595_v19 = vshrl.u32 %v2887_v25, 16 }
  0x59   : > { %v565_v20 = vrot.slane %v564_v60, 4  ;;  %v1294_v5 = vsel %vm2691_vm8, %v2065_v46, %v1293_v51  ;;  %v1295_v58 = vrot.slane %v1293_v51, 4  ;;  %v584_v39 = vrot.slane %v582_v33, 4  ;;  %v2939_v51 = vld [vmem:[%s2523_s25 + $0xbc] sm:$0x1] }
  0x5a   : > { %v575_v34 = vrot.slane %v574_v56, 4  ;;  %v587_v55 = vrot.slane %v585_v54, 5  ;;  %v593_v28 = vrot.slane %v591_v12, 5  ;;  %v597_v13 = vrot.slane %v595_v19, 4 }
  0x5b   : > { %v570_v2 = vsel %vm2594_vm5, %v565_v20, %v569_v24  ;;  %v1297_v50 = vsel %vm2691_vm8, %v1295_v58, %v1296_v15  ;;  %v601_v37 = vshll.u32 %v2894_v7, 16  ;;  %v606_v57 = vshrl.u32 %v2902_v14, 16 }
  0x5c   : > { %v580_v9 = vsel %vm2594_vm5, %v575_v34, %v579_v42  ;;  %v2083_v48 = vcombine.low %v1294_v5, %v1297_v50  ;;  %v588_v53 = vor.u32 %v587_v55, %v584_v39  ;;  %v598_v18 = vor.u32 %v597_v13, %v593_v28 }
  0x5d   : > { %v2004_v49 = vcombine.low %v570_v2, %v580_v9  ;;  %v603_v38 = vrot.slane %v601_v37, 5  ;;  %v608_v29 = vrot.slane %v606_v57, 4  ;;  %v609_v31 = vshll.u32 %v2902_v14, 16 }
  0x5e   : > { %2311 = vmatmul.mubr.msk.bf16.gmra.mrb[12].mxu0 %vm709_vm2, %v2083_v48  ;;  %v589_v40 = vrot.slane %v588_v53, 4  ;;  %v599_v8 = vrot.slane %v598_v18, 4  ;;  %v615_v43 = vshll.u32 %v2912_v52, 16  ;;  %v619_v1 = vshrl.u32 %v2912_v52, 16 }
  0x5f   : > { %2254 = vmatprep.mubr.msk.bf16.mxu1 %vm709_vm2, %v2004_v49  ;;  %v611_v16 = vrot.slane %v609_v31, 5  ;;  %v625_v36 = vshll.u32 %v2918_v44, 16  ;;  %v630_v24 = vshrl.u32 %v2921_v59, 16  ;;  %v633_v41 = vshll.u32 %v2921_v59, 16 }
  0x60   : > { %v594_v3 = vsel %vm2594_vm5, %v589_v40, %v593_v28  ;;  %v604_v42 = vsel %vm2594_vm5, %v599_v8, %v603_v38  ;;  %v617_v46 = vrot.slane %v615_v43, 5  ;;  %v621_v60 = vrot.slane %v619_v1, 4 }
  0x61   : > { %v2005_v15 = vcombine.low %v594_v3, %v604_v42  ;;  %v612_v33 = vor.u32 %v611_v16, %v608_v29  ;;  %v627_v56 = vrot.slane %v625_v36, 5  ;;  %v632_v54 = vrot.slane %v630_v24, 4 }
  0x62   : > { %v622_v12 = vor.u32 %v621_v60, %v617_v46  ;;  %v635_v19 = vrot.slane %v633_v41, 5  ;;  %v639_v20 = vshll.u32 %v2930_v63, 16  ;;  %v643_v5 = vshrl.u32 %v2930_v63, 16 }
  0x63   : > { %2255 = vmatmul.mubr.msk.bf16.gmra.mrb[24].mxu1 %vm709_vm2, %v2005_v15  ;;  %v613_v58 = vrot.slane %v612_v33, 4  ;;  %v649_v39 = vshll.u32 %v2939_v51, 16  ;;  %v2066_v34 = vrot.slane %v2745_v4, 9  ;;  %v1300_v55 = vrot.slane %v2754_v23, 5 }
  0x64   : > { %v623_v28 = vrot.slane %v622_v12, 4  ;;  %v636_v13 = vor.u32 %v635_v19, %v632_v54  ;;  %v641_v2 = vrot.slane %v639_v20, 5  ;;  %v645_v50 = vrot.slane %v643_v5, 4 }
  0x65   : > { %v618_v37 = vsel %vm2594_vm5, %v613_v58, %v617_v46  ;;  %v651_v57 = vrot.slane %v649_v39, 5  ;;  %v1301_v9 = vsel %vm2691_vm8, %v2066_v34, %v1300_v55  ;;  %v1302_v48 = vrot.slane %v1300_v55, 4 }
  0x66   : > { %v628_v53 = vsel %vm2594_vm5, %v623_v28, %v627_v56  ;;  %v637_v18 = vrot.slane %v636_v13, 4  ;;  %v646_v49 = vor.u32 %v645_v50, %v641_v2  ;;  %v1303_v38 = vrot.slane %v2763_v26, 5 }
  0x67   : > { %v2006_v29 = vcombine.low %v618_v37, %v628_v53  ;;  %v2067_v31 = vrot.slane %v2775_v61, 9  ;;  %v1307_v40 = vrot.slane %v2781_v45, 5  ;;  %v1310_v8 = vrot.slane %v2786_v62, 5 }
  0x68   : > { %v642_v43 = vsel %vm2594_vm5, %v637_v18, %v641_v2  ;;  %v647_v1 = vrot.slane %v646_v49, 4  ;;  %v1304_v16 = vsel %vm2691_vm8, %v1302_v48, %v1303_v38  ;;  %v2033_v41 = vcombine.low %v2745_v4, %v2754_v23 }
  0x69   : > { %2258 = vmatprep.mubr.msk.bf16.mxu1 %vm709_vm2, %v2006_v29  ;;  %v2084_v36 = vcombine.low %v1301_v9, %v1304_v16  ;;  %v1308_v26 = vsel %vm2691_vm8, %v2067_v31, %v1307_v40  ;;  %v1309_v24 = vrot.slane %v1307_v40, 4  ;;  %v2068_v3 = vrot.slane %v2801_v22, 9 }
  0x6a   : > { %v652_v62 = vsel %vm2594_vm5, %v647_v1, %v651_v57  ;;  %v1314_v42 = vrot.slane %v2808_v21, 5  ;;  %v1317_v46 = vrot.slane %v2813_v35, 5  ;;  %v2069_v33 = vrot.slane %v2826_v27, 9 }
  0x6b   : > { %v2007_v60 = vcombine.low %v642_v43, %v652_v62  ;;  %2314 = vmatprep.mubr.msk.bf16.mxu0 %vm709_vm2, %v2084_v36  ;;  %v1311_v15 = vsel %vm2691_vm8, %v1309_v24, %v1310_v8  ;;  %v1321_v56 = vrot.slane %v2833_v6, 5  ;;  %v1324_v54 = vrot.slane %v2842_v32, 5  ;;  %v3046_v62 = vld [vmem:[%s3161_s2] ss:$0 sm:$0xff] }
  0x6c   : > { %v2085_v4 = vcombine.low %v1308_v26, %v1311_v15  ;;  %v1315_v47 = vsel %vm2691_vm8, %v2068_v3, %v1314_v42  ;;  %v1316_v23 = vrot.slane %v1314_v42, 4  ;;  %v2070_v19 = vrot.slane %v2856_v30, 9 }
  0x6d   : > { %2259 = vmatmul.mubr.msk.bf16.gmra.mrb[28].mxu1 %vm709_vm2, %v2007_v60  ;;  %v1323_v35 = vrot.slane %v1321_v56, 4  ;;  %v1328_v20 = vrot.slane %v2862_v10, 5  ;;  %v1331_v5 = vrot.slane %v2866_v17, 5  ;;  %v1322_v32 = vsel %vm2691_vm8, %v2069_v33, %v1321_v56 }
  0x6e   : > { %2315 = vmatmul.mubr.msk.bf16.gmra.mrb[16].mxu0 %vm709_vm2, %v2085_v4  ;;  %2280 = vmatprep.mubr.msk.bf16.mxu1 %vm709_vm2, %v2033_v41  ;;  %v1318_v12 = vsel %vm2691_vm8, %v1316_v23, %v1317_v46  ;;  %v1335_v34 = vrot.slane %v2887_v25, 5  ;;  %v2034_v13 = vcombine.low %v2775_v61, %v2781_v45  ;;  %v2035_v17 = vcombine.low %v2801_v22, %v2808_v21 }
  0x6f   : > { %v2086_v58 = vcombine.low %v1315_v47, %v1318_v12  ;;  %v1325_v39 = vsel %vm2691_vm8, %v1323_v35, %v1324_v54  ;;  %v1329_v55 = vsel %vm2691_vm8, %v2070_v19, %v1328_v20  ;;  %v1330_v28 = vrot.slane %v1328_v20, 4 }
  0x70   : > { %v2087_v2 = vcombine.low %v1322_v32, %v1325_v39  ;;  %v1342_v37 = vrot.slane %v2912_v52, 5  ;;  %v2071_v9 = vrot.slane %v2882_v11, 9  ;;  %v1337_v48 = vrot.slane %v1335_v34, 4 }
  0x71   : > { %2318 = vmatprep.mubr.msk.bf16.mxu0 %vm709_vm2, %v2086_v58  ;;  %v1332_v50 = vsel %vm2691_vm8, %v1330_v28, %v1331_v5  ;;  %v1338_v53 = vrot.slane %v2894_v7, 5  ;;  %v2072_v18 = vrot.slane %v2902_v14, 9  ;;  %v1345_v45 = vrot.slane %v2918_v44, 5 }
  0x72   : > { %v2088_v57 = vcombine.low %v1329_v55, %v1332_v50  ;;  %v1344_v61 = vrot.slane %v1342_v37, 4  ;;  %v1336_v22 = vsel %vm2691_vm8, %v2071_v9, %v1335_v34  ;;  %v1349_v7 = vrot.slane %v2930_v63, 5 }
  0x73   : > { %v1339_v21 = vsel %vm2691_vm8, %v1337_v48, %v1338_v53  ;;  %v1343_v49 = vsel %vm2691_vm8, %v2072_v18, %v1342_v37  ;;  %v2036_v38 = vcombine.low %v2826_v27, %v2833_v6  ;;  %v2037_v31 = vcombine.low %v2856_v30, %v2862_v10 }
  0x74   : > { %v1346_v44 = vsel %vm2691_vm8, %v1344_v61, %v1345_v45  ;;  %v2089_v29 = vcombine.low %v1336_v22, %v1339_v21  ;;  %v2073_v8 = vrot.slane %v2921_v59, 9  ;;  %v1351_v43 = vrot.slane %v1349_v7, 4 }
  0x75   : > { %2281 = vmatmul.mubr.msk.bf16.vlgmr.msra.gmra.mrb[16].mxu1 %vm709_vm2, %v2034_v13  ;;  %v2090_v40 = vcombine.low %v1343_v49, %v1346_v44  ;;  %v1352_v1 = vrot.slane %v2939_v51, 5  ;;  %v2038_v30 = vcombine.low %v2882_v11, %v2887_v25  ;;  %v2039_v51 = vcombine.low %v2902_v14, %v2912_v52 }
  0x76   : > { %2319 = vmatmul.mubr.msk.bf16.gmra.mrb[20].mxu0 %vm709_vm2, %v2087_v2  ;;  %2284 = vmatprep.mubr.msk.bf16.mxu1 %vm709_vm2, %v2035_v17  ;;  %v1350_v27 = vsel %vm2691_vm8, %v2073_v8, %v1349_v7  ;;  %v2040_v16 = vcombine.low %v2921_v59, %v2930_v63 }
  0x77   : > { %2322 = vmatprep.mubr.msk.bf16.mxu0 %vm709_vm2, %v2088_v57  ;;  %v1353_v6 = vsel %vm2691_vm8, %v1351_v43, %v1352_v1 }
  0x78   : > { %v2091_v10 = vcombine.low %v1350_v27, %v1353_v6 }
  0x7d   : > { %2285 = vmatmul.mubr.msk.bf16.gmra.mrb[20].mxu1 %vm709_vm2, %v2036_v38 }
  0x7e   : > { %2323 = vmatmul.mubr.msk.bf16.gmra.mrb[24].mxu0 %vm709_vm2, %v2089_v29  ;;  %2288 = vmatprep.mubr.msk.bf16.mxu1 %vm709_vm2, %v2037_v31 }
  0x7f   : > { %2326 = vmatprep.mubr.msk.bf16.mxu0 %vm709_vm2, %v2090_v40 }
  0x85   : > { %2289 = vmatmul.mubr.msk.bf16.gmra.mrb[24].mxu1 %vm709_vm2, %v2038_v30 }
  0x86   : > { %2327 = vmatmul.mubr.msk.bf16.gmra.mrb[28].mxu0 %vm709_vm2, %v2091_v10  ;;  %2292 = vmatprep.mubr.msk.bf16.mxu1 %vm709_vm2, %v2039_v51 }
  0x8d   : > { %2293 = vmatmul.mubr.msk.bf16.gmra.mrb[28].mxu1 %vm709_vm2, %v2040_v16 }
  0xf9   : > { %v2232_v0 = vpop.f32.mrb[0].mxu1 }
  0xfa   : > { %v799_v36 = vpop.f32.mrb[1].mxu1 }
  0xfb   : > { %v2233_v26 = vpop.f32.mrb[2].mxu1 }
  0xfc   : > { %v802_v11 = vpop.f32.mrb[3].mxu1 }
 0x103   : > { %v2236_v25 = vpop.f32.mrb[4].mxu1 }
 0x104   : > { %v815_v24 = vpop.f32.mrb[5].mxu1 }
 0x105   : > { %v2237_v41 = vpop.f32.mrb[6].mxu1 }
 0x106   : > { %v818_v14 = vpop.f32.mrb[7].mxu1 }
 0x10a   : > { %v2300_v52 = vpop.f32.mrb[0].mxu0 }
 0x10b   : > { %v2240_v3 = vpop.f32.mrb[8].mxu1  ;;  %v2332_v42 = vadd.f32 %v2300_v52, %v2232_v0  ;;  %v1495_v59 = vpop.f32.mrb[1].mxu0 }
 0x10c   : > { %v831_v63 = vpop.f32.mrb[9].mxu1  ;;  %v2333_v46 = vadd.f32 %v1495_v59, %v799_v36  ;;  %v2301_v60 = vpop.f32.mrb[2].mxu0 }
 0x10d   : > { %v2241_v15 = vpop.f32.mrb[10].mxu1  ;;  %v1663_v33 = vadd.f32 %v2332_v42, %v3046_v62  ;;  %v2334_v56 = vadd.f32 %v2301_v60, %v2233_v26  ;;  %v1498_v4 = vpop.f32.mrb[3].mxu0 }
 0x10e   : > { %v834_v47 = vpop.f32.mrb[11].mxu1  ;;  %v1661_v23 = vadd.f32 %v2333_v46, %v3046_v62  ;;  %v2335_v54 = vadd.f32 %v1498_v4, %v802_v11 }
 0x10f   : > { %v1695_v35 = vmax.f32 %v1663_v33, 0.0  ;;  %v1664_v12 = vadd.f32 %v2334_v56, %v3046_v62 }
 0x110   : > { %v1693_v19 = vmax.f32 %v1661_v23, 0.0  ;;  %v1662_v20 = vadd.f32 %v2335_v54, %v3046_v62 }
 0x111   : > { %v2147_v5 = vpack.c.bf16 %v1695_v35, %v1695_v35  ;;  %v1696_v58 = vmax.f32 %v1664_v12, 0.0 }
 0x112   : > { %v2145_v32 = vpack.c.bf16 %v1693_v19, %v1693_v19  ;;  %v1694_v39 = vmax.f32 %v1662_v20, 0.0 }
 0x113   : > { %1856 = vst.msk [vmem:[%s3055_s4 + $0x8] sm:$0xf] %vm1853_vm9, %v2147_v5  ;;  %v2148_v34 = vpack.c.bf16 %v1696_v58, %v1696_v58 }
 0x114   : > { %v2244_v55 = vpop.f32.mrb[12].mxu1  ;;  %1854 = vst.msk [vmem:[%s3055_s4] sm:$0xf] %vm1853_vm9, %v2145_v32  ;;  %v2146_v28 = vpack.c.bf16 %v1694_v39, %v1694_v39 }
 0x115   : > { %v847_v13 = vpop.f32.mrb[13].mxu1  ;;  %1857 = vst.msk [vmem:[%s3055_s4 + $0xc] sm:$0xf] %vm1853_vm9, %v2148_v34 }
 0x116   : > { %v2245_v2 = vpop.f32.mrb[14].mxu1  ;;  %1855 = vst.msk [vmem:[%s3055_s4 + $0x4] sm:$0xf] %vm1853_vm9, %v2146_v28 }
 0x117   : > { %v850_v17 = vpop.f32.mrb[15].mxu1 }
 0x118   : > { %v2304_v50 = vpop.f32.mrb[4].mxu0 }
 0x119   : > { %v2336_v37 = vadd.f32 %v2304_v50, %v2236_v25  ;;  %v1511_v57 = vpop.f32.mrb[5].mxu0 }
 0x11a   : > { %v2337_v9 = vadd.f32 %v1511_v57, %v815_v24  ;;  %v2305_v48 = vpop.f32.mrb[6].mxu0 }
 0x11b   : > { %v1667_v53 = vadd.f32 %v2336_v37, %v3046_v62  ;;  %v2338_v18 = vadd.f32 %v2305_v48, %v2237_v41  ;;  %v1514_v61 = vpop.f32.mrb[7].mxu0 }
 0x11c   : > { %v1665_v45 = vadd.f32 %v2337_v9, %v3046_v62  ;;  %v2339_v22 = vadd.f32 %v1514_v61, %v818_v14 }
 0x11d   : > { %v1699_v21 = vmax.f32 %v1667_v53, 0.0  ;;  %v1668_v7 = vadd.f32 %v2338_v18, %v3046_v62 }
 0x11e   : > { %v1697_v49 = vmax.f32 %v1665_v45, 0.0  ;;  %v1666_v44 = vadd.f32 %v2339_v22, %v3046_v62 }
 0x11f   : > { %v2151_v38 = vpack.c.bf16 %v1699_v21, %v1699_v21  ;;  %v1700_v29 = vmax.f32 %v1668_v7, 0.0 }
 0x120   : > { %v2149_v31 = vpack.c.bf16 %v1697_v49, %v1697_v49  ;;  %v1698_v40 = vmax.f32 %v1666_v44, 0.0 }
 0x121   : > { %1860 = vst.msk [vmem:[%s3055_s4 + $0x18] sm:$0xf] %vm1853_vm9, %v2151_v38  ;;  %v2152_v8 = vpack.c.bf16 %v1700_v29, %v1700_v29 }
 0x122   : > { %1858 = vst.msk [vmem:[%s3055_s4 + $0x10] sm:$0xf] %vm1853_vm9, %v2149_v31  ;;  %v2150_v43 = vpack.c.bf16 %v1698_v40, %v1698_v40 }
 0x123   : > { %1861 = vst.msk [vmem:[%s3055_s4 + $0x1c] sm:$0xf] %vm1853_vm9, %v2152_v8 }
 0x124   : > { %1859 = vst.msk [vmem:[%s3055_s4 + $0x14] sm:$0xf] %vm1853_vm9, %v2150_v43 }
 0x125   : > { %v2308_v1 = vpop.f32.mrb[8].mxu0 }
 0x126   : > { %v2340_v27 = vadd.f32 %v2308_v1, %v2240_v3  ;;  %v1527_v6 = vpop.f32.mrb[9].mxu0 }
 0x127   : > { %v2341_v30 = vadd.f32 %v1527_v6, %v831_v63  ;;  %v2309_v10 = vpop.f32.mrb[10].mxu0 }
 0x128   : > { %v1671_v51 = vadd.f32 %v2340_v27, %v3046_v62  ;;  %v2342_v16 = vadd.f32 %v2309_v10, %v2241_v15  ;;  %v1530_v0 = vpop.f32.mrb[11].mxu0 }
 0x129   : > { %v1669_v36 = vadd.f32 %v2341_v30, %v3046_v62  ;;  %v2343_v26 = vadd.f32 %v1530_v0, %v834_v47 }
 0x12a   : > { %v1703_v11 = vmax.f32 %v1671_v51, 0.0  ;;  %v1672_v25 = vadd.f32 %v2342_v16, %v3046_v62 }
 0x12b   : > { %v1701_v24 = vmax.f32 %v1669_v36, 0.0  ;;  %v1670_v41 = vadd.f32 %v2343_v26, %v3046_v62 }
 0x12c   : > { %v2155_v14 = vpack.c.bf16 %v1703_v11, %v1703_v11  ;;  %v1704_v52 = vmax.f32 %v1672_v25, 0.0 }
 0x12d   : > { %v2153_v3 = vpack.c.bf16 %v1701_v24, %v1701_v24  ;;  %v1702_v42 = vmax.f32 %v1670_v41, 0.0 }
 0x12e   : > { %1864 = vst.msk [vmem:[%s3055_s4 + $0x28] sm:$0xf] %vm1853_vm9, %v2155_v14  ;;  %v2156_v59 = vpack.c.bf16 %v1704_v52, %v1704_v52 }
 0x12f   : > { %1862 = vst.msk [vmem:[%s3055_s4 + $0x20] sm:$0xf] %vm1853_vm9, %v2153_v3  ;;  %v2154_v63 = vpack.c.bf16 %v1702_v42, %v1702_v42 }
 0x130   : > { %1865 = vst.msk [vmem:[%s3055_s4 + $0x2c] sm:$0xf] %vm1853_vm9, %v2156_v59 }
 0x131   : > { %1863 = vst.msk [vmem:[%s3055_s4 + $0x24] sm:$0xf] %vm1853_vm9, %v2154_v63  ;;  %v2312_v46 = vpop.f32.mrb[12].mxu0 }
 0x132   : > { %v2344_v60 = vadd.f32 %v2312_v46, %v2244_v55  ;;  %v1543_v15 = vpop.f32.mrb[13].mxu0 }
 0x133   : > { %v2345_v33 = vadd.f32 %v1543_v15, %v847_v13  ;;  %v2313_v56 = vpop.f32.mrb[14].mxu0 }
 0x134   : > { %v1675_v4 = vadd.f32 %v2344_v60, %v3046_v62  ;;  %v2346_v47 = vadd.f32 %v2313_v56, %v2245_v2  ;;  %v1546_v23 = vpop.f32.mrb[15].mxu0 }
 0x135   : > { %v1673_v54 = vadd.f32 %v2345_v33, %v3046_v62  ;;  %v2347_v35 = vadd.f32 %v1546_v23, %v850_v17 }
 0x136   : > { %v1707_v12 = vmax.f32 %v1675_v4, 0.0  ;;  %v1676_v19 = vadd.f32 %v2346_v47, %v3046_v62 }
 0x137   : > { %v1705_v20 = vmax.f32 %v1673_v54, 0.0  ;;  %v1674_v5 = vadd.f32 %v2347_v35, %v3046_v62 }
 0x138   : > { %v2159_v58 = vpack.c.bf16 %v1707_v12, %v1707_v12  ;;  %v1708_v32 = vmax.f32 %v1676_v19, 0.0 }
 0x139   : > { %v2157_v39 = vpack.c.bf16 %v1705_v20, %v1705_v20  ;;  %v1706_v34 = vmax.f32 %v1674_v5, 0.0 }
 0x13a   : > { %1868 = vst.msk [vmem:[%s3055_s4 + $0x38] sm:$0xf] %vm1853_vm9, %v2159_v58  ;;  %v2160_v55 = vpack.c.bf16 %v1708_v32, %v1708_v32 }
 0x13b   : > { %1866 = vst.msk [vmem:[%s3055_s4 + $0x30] sm:$0xf] %vm1853_vm9, %v2157_v39  ;;  %v2158_v28 = vpack.c.bf16 %v1706_v34, %v1706_v34 }
 0x13c   : > { %1869 = vst.msk [vmem:[%s3055_s4 + $0x3c] sm:$0xf] %vm1853_vm9, %v2160_v55 }
 0x13d   : > { %1867 = vst.msk [vmem:[%s3055_s4 + $0x34] sm:$0xf] %vm1853_vm9, %v2158_v28 }
 0x141   : > { %v2316_v13 = vpop.f32.mrb[16].mxu0 }
 0x142   : > { %v1559_v2 = vpop.f32.mrb[17].mxu0 }
 0x143   : > { %v2317_v17 = vpop.f32.mrb[18].mxu0 }
 0x144   : > { %v1562_v50 = vpop.f32.mrb[19].mxu0 }
 0x148   : > { %v2282_v37 = vpop.f32.mrb[16].mxu1 }
 0x149   : > { %v2348_v57 = vadd.f32 %v2316_v13, %v2282_v37  ;;  %v1160_v9 = vpop.f32.mrb[17].mxu1  ;;  %v2320_v48 = vpop.f32.mrb[20].mxu0 }
 0x14a   : > { %v2349_v53 = vadd.f32 %v1559_v2, %v1160_v9  ;;  %v2283_v18 = vpop.f32.mrb[18].mxu1  ;;  %v1575_v61 = vpop.f32.mrb[21].mxu0 }
 0x14b   : > { %v1679_v45 = vadd.f32 %v2348_v57, %v3046_v62  ;;  %v2350_v22 = vadd.f32 %v2317_v17, %v2283_v18  ;;  %v1163_v21 = vpop.f32.mrb[19].mxu1  ;;  %v2321_v7 = vpop.f32.mrb[22].mxu0 }
 0x14c   : > { %v1677_v49 = vadd.f32 %v2349_v53, %v3046_v62  ;;  %v2351_v44 = vadd.f32 %v1562_v50, %v1163_v21  ;;  %v1578_v38 = vpop.f32.mrb[23].mxu0 }
 0x14d   : > { %v1711_v29 = vmax.f32 %v1679_v45, 0.0  ;;  %v1680_v31 = vadd.f32 %v2350_v22, %v3046_v62 }
 0x14e   : > { %v1709_v40 = vmax.f32 %v1677_v49, 0.0  ;;  %v1678_v8 = vadd.f32 %v2351_v44, %v3046_v62 }
 0x14f   : > { %v2163_v43 = vpack.c.bf16 %v1711_v29, %v1711_v29  ;;  %v1712_v1 = vmax.f32 %v1680_v31, 0.0 }
 0x150   : > { %v2161_v27 = vpack.c.bf16 %v1709_v40, %v1709_v40  ;;  %v1710_v6 = vmax.f32 %v1678_v8, 0.0  ;;  %v2286_v30 = vpop.f32.mrb[20].mxu1 }
 0x151   : > { %1872 = vst.msk [vmem:[%s3055_s4 + $0x48] sm:$0xf] %vm1853_vm9, %v2163_v43  ;;  %v2164_v10 = vpack.c.bf16 %v1712_v1, %v1712_v1  ;;  %v2352_v51 = vadd.f32 %v2320_v48, %v2286_v30  ;;  %v1176_v16 = vpop.f32.mrb[21].mxu1  ;;  %v2324_v0 = vpop.f32.mrb[24].mxu0 }
 0x152   : > { %1870 = vst.msk [vmem:[%s3055_s4 + $0x40] sm:$0xf] %vm1853_vm9, %v2161_v27  ;;  %v2162_v36 = vpack.c.bf16 %v1710_v6, %v1710_v6  ;;  %v2353_v26 = vadd.f32 %v1575_v61, %v1176_v16  ;;  %v2287_v11 = vpop.f32.mrb[22].mxu1  ;;  %v1591_v25 = vpop.f32.mrb[25].mxu0 }
 0x153   : > { %1873 = vst.msk [vmem:[%s3055_s4 + $0x4c] sm:$0xf] %vm1853_vm9, %v2164_v10  ;;  %v1683_v24 = vadd.f32 %v2352_v51, %v3046_v62  ;;  %v2354_v41 = vadd.f32 %v2321_v7, %v2287_v11  ;;  %v1179_v14 = vpop.f32.mrb[23].mxu1  ;;  %v2325_v52 = vpop.f32.mrb[26].mxu0 }
 0x154   : > { %1871 = vst.msk [vmem:[%s3055_s4 + $0x44] sm:$0xf] %vm1853_vm9, %v2162_v36  ;;  %v1681_v3 = vadd.f32 %v2353_v26, %v3046_v62  ;;  %v2355_v42 = vadd.f32 %v1578_v38, %v1179_v14  ;;  %v1594_v59 = vpop.f32.mrb[27].mxu0 }
 0x155   : > { %v1715_v63 = vmax.f32 %v1683_v24, 0.0  ;;  %v1684_v46 = vadd.f32 %v2354_v41, %v3046_v62 }
 0x156   : > { %v1713_v60 = vmax.f32 %v1681_v3, 0.0  ;;  %v1682_v15 = vadd.f32 %v2355_v42, %v3046_v62 }
 0x157   : > { %v2167_v33 = vpack.c.bf16 %v1715_v63, %v1715_v63  ;;  %v1716_v56 = vmax.f32 %v1684_v46, 0.0 }
 0x158   : > { %v2165_v4 = vpack.c.bf16 %v1713_v60, %v1713_v60  ;;  %v1714_v47 = vmax.f32 %v1682_v15, 0.0  ;;  %v2290_v23 = vpop.f32.mrb[24].mxu1 }
 0x159   : > { %1876 = vst.msk [vmem:[%s3055_s4 + $0x58] sm:$0xf] %vm1853_vm9, %v2167_v33  ;;  %v2168_v54 = vpack.c.bf16 %v1716_v56, %v1716_v56  ;;  %v2356_v35 = vadd.f32 %v2324_v0, %v2290_v23  ;;  %v1192_v12 = vpop.f32.mrb[25].mxu1  ;;  %v2328_v19 = vpop.f32.mrb[28].mxu0 }
 0x15a   : > { %1874 = vst.msk [vmem:[%s3055_s4 + $0x50] sm:$0xf] %vm1853_vm9, %v2165_v4  ;;  %v2166_v20 = vpack.c.bf16 %v1714_v47, %v1714_v47  ;;  %v2357_v5 = vadd.f32 %v1591_v25, %v1192_v12  ;;  %v2291_v58 = vpop.f32.mrb[26].mxu1  ;;  %v1607_v32 = vpop.f32.mrb[29].mxu0 }
 0x15b   : > { %1877 = vst.msk [vmem:[%s3055_s4 + $0x5c] sm:$0xf] %vm1853_vm9, %v2168_v54  ;;  %v1687_v39 = vadd.f32 %v2356_v35, %v3046_v62  ;;  %v2358_v34 = vadd.f32 %v2325_v52, %v2291_v58  ;;  %v1195_v55 = vpop.f32.mrb[27].mxu1  ;;  %v2329_v28 = vpop.f32.mrb[30].mxu0 }
 0x15c   : > { %1875 = vst.msk [vmem:[%s3055_s4 + $0x54] sm:$0xf] %vm1853_vm9, %v2166_v20  ;;  %v1685_v13 = vadd.f32 %v2357_v5, %v3046_v62  ;;  %v2359_v2 = vadd.f32 %v1594_v59, %v1195_v55  ;;  %v1610_v17 = vpop.f32.mrb[31].mxu0 }
 0x15d   : > { %v1719_v50 = vmax.f32 %v1687_v39, 0.0  ;;  %v1688_v37 = vadd.f32 %v2358_v34, %v3046_v62 }
 0x15e   : > { %v1717_v57 = vmax.f32 %v1685_v13, 0.0  ;;  %v1686_v9 = vadd.f32 %v2359_v2, %v3046_v62 }
 0x15f   : > { %v2171_v48 = vpack.c.bf16 %v1719_v50, %v1719_v50  ;;  %v1720_v53 = vmax.f32 %v1688_v37, 0.0 }
 0x160   : > { %v2169_v18 = vpack.c.bf16 %v1717_v57, %v1717_v57  ;;  %v1718_v61 = vmax.f32 %v1686_v9, 0.0  ;;  %v2294_v45 = vpop.f32.mrb[28].mxu1 }
 0x161   : > { %1880 = vst.msk [vmem:[%s3055_s4 + $0x68] sm:$0xf] %vm1853_vm9, %v2171_v48  ;;  %v2172_v22 = vpack.c.bf16 %v1720_v53, %v1720_v53  ;;  %v2360_v21 = vadd.f32 %v2328_v19, %v2294_v45  ;;  %v1208_v7 = vpop.f32.mrb[29].mxu1 }
 0x162   : > { %1878 = vst.msk [vmem:[%s3055_s4 + $0x60] sm:$0xf] %vm1853_vm9, %v2169_v18  ;;  %v2170_v49 = vpack.c.bf16 %v1718_v61, %v1718_v61  ;;  %v2361_v44 = vadd.f32 %v1607_v32, %v1208_v7  ;;  %v2295_v38 = vpop.f32.mrb[30].mxu1 }
 0x163   : > { %1881 = vst.msk [vmem:[%s3055_s4 + $0x6c] sm:$0xf] %vm1853_vm9, %v2172_v22  ;;  %v1691_v29 = vadd.f32 %v2360_v21, %v3046_v62  ;;  %v2362_v31 = vadd.f32 %v2329_v28, %v2295_v38  ;;  %v1211_v40 = vpop.f32.mrb[31].mxu1 }
 0x164   : > { %1879 = vst.msk [vmem:[%s3055_s4 + $0x64] sm:$0xf] %vm1853_vm9, %v2170_v49  ;;  %v1689_v8 = vadd.f32 %v2361_v44, %v3046_v62  ;;  %v2363_v43 = vadd.f32 %v1610_v17, %v1211_v40 }
 0x165   : > { %v1723_v1 = vmax.f32 %v1691_v29, 0.0  ;;  %v1692_v27 = vadd.f32 %v2362_v31, %v3046_v62 }
 0x166   : > { %v1721_v6 = vmax.f32 %v1689_v8, 0.0  ;;  %v1690_v30 = vadd.f32 %v2363_v43, %v3046_v62 }
 0x167   : > { %v2175_v10 = vpack.c.bf16 %v1723_v1, %v1723_v1  ;;  %v1724_v51 = vmax.f32 %v1692_v27, 0.0 }
 0x168   : > { %v2173_v16 = vpack.c.bf16 %v1721_v6, %v1721_v6  ;;  %v1722_v0 = vmax.f32 %v1690_v30, 0.0 }
 0x169   : > { %1884 = vst.msk [vmem:[%s3055_s4 + $0x78] sm:$0xf] %vm1853_vm9, %v2175_v10  ;;  %v2176_v36 = vpack.c.bf16 %v1724_v51, %v1724_v51 }
 0x16a   : > { %1882 = vst.msk [vmem:[%s3055_s4 + $0x70] sm:$0xf] %vm1853_vm9, %v2173_v16  ;;  %v2174_v26 = vpack.c.bf16 %v1722_v0, %v1722_v0 }
 0x16b   : > { %1885 = vst.msk [vmem:[%s3055_s4 + $0x7c] sm:$0xf] %vm1853_vm9, %v2176_v36 }
 0x16c   : > { %1883 = vst.msk [vmem:[%s3055_s4 + $0x74] sm:$0xf] %vm1853_vm9, %v2174_v26 }
 0x16d PF: > { %s13_s14 = sadd.s32 1, %s2463_s14   ;;  %s3167_s12 = smov %s2459_s13 }
 0x16e   : > { %p10_p5 = scmp.ge.s32.totalorder %s13_s14, 4   ;;  %s3168_s13 = smov %s3170_s15 }
 0x170   :  { %12 = sbr.rel (!%p10_p5) target bundleno = 2 (0x2), region = 64 }

// kernel: _lambda_.9
= control target key start
LH: loop header
LB: loop body
LE: loop exit
PB: predicated region body
PF: predicated region fallthrough
CT: control target
= control target key end

     0   :  { %s479_s6 = smov 0   ;;  %s481_s7 = smov 0   ;;  %s584_s0 = inlined_call_operand.vmem [shape: bf16[2,16,8,128], index: 0, kind: input, shape index: {}]   ;;  %s585_s1 = inlined_call_operand.vmem [shape: bf16[2,8,8,64], index: 1, kind: output, shape index: {}]  }
   0x1   :  { %s483_s8 = smov 0  }
   0x2 LB: > { %s23_s9 = sadd.s32 1, %s462_s7  ;;  %p410_p0 = scmp.ge.s32.totalorder %s466_s8, 1  ;;  %s466_s8 = sphi %s483_s8, %s11_s8   ;;  %s462_s7 = sphi %s481_s7, %s587_s7   ;;  %s458_s6 = sphi %s479_s6, %s586_s6  }
   0x3   : > { %p25_p1 = scmp.ge.s32.totalorder %s23_s9, 2  ;;  %p108_p2 = scmp.lt.s32.totalorder %s466_s8, 3 }
   0x5   : > { %s589_s9 = smov (%p25_p1, %s23_s9), 0  ;;  %p109_p3 = pnand %p410_p0, %p108_p2 }
   0x6   : > { %p137_p4 = scmp.lt.s32.totalorder (!%p109_p3), %s458_s6, 1  ;;  %s468_s14 = smov (!%p109_p3), 64   ;;  %vm253_vm0 = vcmask (!%p109_p3), 519168  }
   0x7   : > { %112 = sbr.rel (%p109_p3) target bundleno = 167 (0xa7), region = 24 }
   0xe   : > { %s591_s6 = smov (!%p137_p4, %s458_s6), 1 }
   0xf   : > { %s417_s10 = sshll.u32 %s591_s6, 6  ;;  %s418_s15 = sshll.u32 %s591_s6, 5 }
  0x10   : > { %s503_s13 = scalar_lea.vmem %s584_s0, %s417_s10  ;;  %s539_s18 = scalar_lea.vmem %s585_s1, %s418_s15 }
  0x11   : > { %v159_v0 = vld [vmem:[%s503_s13 + $0x8] sm:$0xf]  ;;  %v157_v1 = vld [vmem:[%s503_s13] sm:$0xf]  ;;  %v160_v2 = vld [vmem:[%s503_s13 + $0xc] sm:$0xf] }
  0x12   : > { %193 = vrot.lane.b32.xlu1 %v159_v0, %s468_s14  ;;  %189 = vrot.lane.b32.xlu0 %v157_v1, %s468_s14  ;;  %v158_v3 = vld [vmem:[%s503_s13 + $0x4] sm:$0xf]  ;;  %v162_v4 = vld [vmem:[%s503_s13 + $0x14] sm:$0xf] }
  0x13   : > { %v161_v5 = vld [vmem:[%s503_s13 + $0x10] sm:$0xf]  ;;  %v164_v6 = vld [vmem:[%s503_s13 + $0x1c] sm:$0xf]  ;;  %v163_v7 = vld [vmem:[%s503_s13 + $0x18] sm:$0xf] }
  0x14   : > { %v166_v8 = vld [vmem:[%s503_s13 + $0x24] sm:$0xf]  ;;  %v165_v9 = vld [vmem:[%s503_s13 + $0x20] sm:$0xf]  ;;  %v168_v10 = vld [vmem:[%s503_s13 + $0x2c] sm:$0xf] }
  0x15   : > { %v167_v11 = vld [vmem:[%s503_s13 + $0x28] sm:$0xf]  ;;  %v518_v12 = vld [vmem:[%s503_s13 + $0x34] sm:$0xf]  ;;  %v521_v13 = vld [vmem:[%s503_s13 + $0x30] sm:$0xf] }
  0x16   : > { %195 = vrot.lane.b32.xlu1 %v160_v2, %s468_s14  ;;  %191 = vrot.lane.b32.xlu0 %v158_v3, %s468_s14  ;;  %v526_v14 = vld [vmem:[%s503_s13 + $0x3c] sm:$0xf]  ;;  %v529_v15 = vld [vmem:[%s503_s13 + $0x38] sm:$0xf] }
  0x1a   : > { %199 = vrot.lane.b32.xlu1 %v162_v4, %s468_s14  ;;  %197 = vrot.lane.b32.xlu0 %v161_v5, %s468_s14 }
  0x1e   : > { %203 = vrot.lane.b32.xlu1 %v164_v6, %s468_s14  ;;  %201 = vrot.lane.b32.xlu0 %v163_v7, %s468_s14 }
  0x22   : > { %207 = vrot.lane.b32.xlu1 %v166_v8, %s468_s14  ;;  %205 = vrot.lane.b32.xlu0 %v165_v9, %s468_s14 }
  0x26   : > { %211 = vrot.lane.b32.xlu1 %v168_v10, %s468_s14  ;;  %209 = vrot.lane.b32.xlu0 %v167_v11, %s468_s14 }
  0x2a   : > { %215 = vrot.lane.b32.xlu1 %v518_v12, %s468_s14  ;;  %213 = vrot.lane.b32.xlu0 %v521_v13, %s468_s14 }
  0x2e   : > { %219 = vrot.lane.b32.xlu1 %v526_v14, %s468_s14  ;;  %217 = vrot.lane.b32.xlu0 %v529_v15, %s468_s14 }
  0x84   : > { %v194_v16 = vpop.permute.xlu1 %193  ;;  %v190_v17 = vpop.permute.xlu0 %189 }
  0x85   : > { %v239_v18 = vmax.bf16 %v194_v16, %v159_v0  ;;  %v237_v19 = vmax.bf16 %v190_v17, %v157_v1 }
  0x87   : > { %v263_v24 = vsel %vm253_vm0, %v239_v18, 4286644096  ;;  %v256_v25 = vsel %vm253_vm0, %v237_v19, 4286644096 }
  0x88   : > { %v196_v20 = vpop.permute.xlu1 %195  ;;  %v192_v21 = vpop.permute.xlu0 %191 }
  0x89   : > { %v240_v22 = vmax.bf16 %v196_v20, %v160_v2  ;;  %v238_v23 = vmax.bf16 %v192_v21, %v158_v3 }
  0x8b   : > { %v266_v26 = vsel %vm253_vm0, %v240_v22, 4286644096  ;;  %v259_v27 = vsel %vm253_vm0, %v238_v23, 4286644096 }
  0x8c   : > { %v268_v28 = vmax.bf16 %v266_v26, %v263_v24  ;;  %v261_v29 = vmax.bf16 %v259_v27, %v256_v25  ;;  %v200_v30 = vpop.permute.xlu1 %199  ;;  %v198_v31 = vpop.permute.xlu0 %197 }
  0x8d   : > { %v242_v32 = vmax.bf16 %v200_v30, %v162_v4  ;;  %v241_v33 = vmax.bf16 %v198_v31, %v161_v5 }
  0x8e   : > { %312 = vst.msk [vmem:[%s539_s18 + $0x4] sm:$0xf] %vm253_vm0, %v268_v28  ;;  %311 = vst.msk [vmem:[%s539_s18] sm:$0xf] %vm253_vm0, %v261_v29 }
  0x8f   : > { %v273_v34 = vsel %vm253_vm0, %v242_v32, 4286644096  ;;  %v270_v35 = vsel %vm253_vm0, %v241_v33, 4286644096 }
  0x90   : > { %v275_v36 = vmax.bf16 %v273_v34, %v270_v35  ;;  %v204_v37 = vpop.permute.xlu1 %203  ;;  %v202_v38 = vpop.permute.xlu0 %201 }
  0x91   : > { %v244_v39 = vmax.bf16 %v204_v37, %v164_v6  ;;  %v243_v40 = vmax.bf16 %v202_v38, %v163_v7 }
  0x92   : > { %313 = vst.msk [vmem:[%s539_s18 + $0x8] sm:$0xf] %vm253_vm0, %v275_v36 }
  0x93   : > { %v280_v41 = vsel %vm253_vm0, %v244_v39, 4286644096  ;;  %v277_v42 = vsel %vm253_vm0, %v243_v40, 4286644096 }
  0x94   : > { %v282_v43 = vmax.bf16 %v280_v41, %v277_v42  ;;  %v208_v44 = vpop.permute.xlu1 %207  ;;  %v206_v45 = vpop.permute.xlu0 %205 }
  0x95   : > { %v246_v46 = vmax.bf16 %v208_v44, %v166_v8  ;;  %v245_v47 = vmax.bf16 %v206_v45, %v165_v9 }
  0x96   : > { %314 = vst.msk [vmem:[%s539_s18 + $0xc] sm:$0xf] %vm253_vm0, %v282_v43 }
  0x97   : > { %v287_v48 = vsel %vm253_vm0, %v246_v46, 4286644096  ;;  %v284_v49 = vsel %vm253_vm0, %v245_v47, 4286644096 }
  0x98   : > { %v289_v50 = vmax.bf16 %v287_v48, %v284_v49  ;;  %v212_v51 = vpop.permute.xlu1 %211  ;;  %v210_v52 = vpop.permute.xlu0 %209 }
  0x99   : > { %v248_v53 = vmax.bf16 %v212_v51, %v168_v10  ;;  %v247_v54 = vmax.bf16 %v210_v52, %v167_v11 }
  0x9a   : > { %315 = vst.msk [vmem:[%s539_s18 + $0x10] sm:$0xf] %vm253_vm0, %v289_v50 }
  0x9b   : > { %v294_v55 = vsel %vm253_vm0, %v248_v53, 4286644096  ;;  %v291_v56 = vsel %vm253_vm0, %v247_v54, 4286644096 }
  0x9c   : > { %v296_v57 = vmax.bf16 %v294_v55, %v291_v56  ;;  %v216_v58 = vpop.permute.xlu1 %215  ;;  %v214_v59 = vpop.permute.xlu0 %213 }
  0x9d   : > { %v250_v60 = vmax.bf16 %v216_v58, %v518_v12  ;;  %v249_v61 = vmax.bf16 %v214_v59, %v521_v13 }
  0x9e   : > { %316 = vst.msk [vmem:[%s539_s18 + $0x14] sm:$0xf] %vm253_vm0, %v296_v57 }
  0x9f   : > { %v301_v62 = vsel %vm253_vm0, %v250_v60, 4286644096  ;;  %v298_v63 = vsel %vm253_vm0, %v249_v61, 4286644096 }
  0xa0   : > { %v303_v0 = vmax.bf16 %v301_v62, %v298_v63  ;;  %v220_v1 = vpop.permute.xlu1 %219  ;;  %v218_v2 = vpop.permute.xlu0 %217 }
  0xa1   : > { %v252_v3 = vmax.bf16 %v220_v1, %v526_v14  ;;  %v251_v4 = vmax.bf16 %v218_v2, %v529_v15 }
  0xa2   : > { %317 = vst.msk [vmem:[%s539_s18 + $0x18] sm:$0xf] %vm253_vm0, %v303_v0 }
  0xa3   : > { %v308_v5 = vsel %vm253_vm0, %v252_v3, 4286644096  ;;  %v305_v6 = vsel %vm253_vm0, %v251_v4, 4286644096 }
  0xa4   : > { %v310_v7 = vmax.bf16 %v308_v5, %v305_v6 }
  0xa6   : > { %318 = vst.msk [vmem:[%s539_s18 + $0x1c] sm:$0xf] %vm253_vm0, %v310_v7 }
  0xa7 PF: > { %s11_s8 = sadd.s32 1, %s466_s8   ;;  %s586_s6 = smov %s462_s7 }
  0xa8   : > { %p8_p5 = scmp.ge.s32.totalorder %s11_s8, 4   ;;  %s587_s7 = smov %s589_s9 }
  0xaa   :  { %10 = sbr.rel (!%p8_p5) target bundleno = 2 (0x2), region = 54 }

// kernel: _lambda_.8
= control target key start
LH: loop header
LB: loop body
LE: loop exit
PB: predicated region body
PF: predicated region fallthrough
CT: control target
= control target key end

     0   :  { %s2927_s12 = smov 0   ;;  %s2929_s13 = smov 0   ;;  %s4225_s0 = inlined_call_operand.vmem [shape: bf16[2,16,18,192], index: 0, kind: input, shape index: {}]   ;;  %s4226_s1 = inlined_call_operand.vmem [shape: bf16[3,192,64], index: 1, kind: input, shape index: {}]   ;;  %s4227_s2 = inlined_call_operand.vmem [shape: f32[1,64], index: 2, kind: input, shape index: {}]   ;;  %s4228_s3 = inlined_call_operand.vmem [shape: bf16[2,16,16,64], index: 3, kind: output, shape index: {}]  }
   0x1   :  { %s2931_s14 = smov 0  }
   0x2 LB: > { %s25_s15 = sadd.s32 1, %s2900_s13  ;;  %p2432_p0 = scmp.ge.s32.totalorder %s2904_s14, 1  ;;  %s2904_s14 = sphi %s2931_s14, %s13_s14   ;;  %s2900_s13 = sphi %s2929_s13, %s4295_s13   ;;  %s2896_s12 = sphi %s2927_s12, %s4294_s12  }
   0x3   : > { %p27_p1 = scmp.ge.s32.totalorder %s25_s15, 2  ;;  %p159_p2 = scmp.lt.s32.totalorder %s2904_s14, 3 }
   0x5   : > { %s4297_s15 = smov (%p27_p1, %s25_s15), 0  ;;  %p160_p3 = pnand %p2432_p0, %p159_p2 }
   0x7   : > { %163 = sbr.rel (%p160_p3) target bundleno = 472 (0x1d8), region = 32 }
   0xe   : > { %v2798_v0 = vld [vmem:[%s4226_s1 + $0x60] sm:$0xff]   ;;  %v4231_v1 = vmov 0   ;;  %p194_p4 = scmp.lt.s32.totalorder %s2896_s12, 1  ;;  %v2799_v2 = vld [vmem:[%s4226_s1 + $0x68] sm:$0xff]   ;;  %v2800_v3 = vld [vmem:[%s4226_s1 + $0x70] sm:$0xff]   ;;  %vm884_vm3 = vcmask 523264  }
   0xf   : > { %933 = vmatprep.subr.bf16.mxu0 %v4231_v1  ;;  %2748 = vmatprep.subr.bf16.mxu1 %v4231_v1  ;;  %v2801_v4 = vld [vmem:[%s4226_s1 + $0x78] sm:$0xff]   ;;  %vm288_vm0 = vsmask.f32 3328  ;;  %vm289_vm1 = vsmask.f32 7440  ;;  %v2802_v12 = vld [vmem:[%s4226_s1 + $0x80] sm:$0xff]  }
  0x10   : > { %934 = vmatpush1.bf16.msra.mxu0 %v2798_v0  ;;  %2760 = vmatpush1.bf16.msra.mxu1 %v2798_v0  ;;  %s4299_s12 = smov (!%p194_p4, %s2896_s12), 1  ;;  %v2803_v28 = vld [vmem:[%s4226_s1 + $0x88] sm:$0xff]   ;;  %vm3000_vm2 = vmor %vm288_vm0, %vm289_vm1  ;;  %v2804_v39 = vld [vmem:[%s4226_s1 + $0x90] sm:$0xff]   ;;  %vm1535_vm4 = vcmask 1042432   ;;  %vm1536_vm5 = vcmask 1046532   ;;  %vm2299_vm7 = vcmask 519168  }
  0x11   : > { %935 = vmatprep.subr.bf16.mxu0 %v4231_v1  ;;  %2749 = vmatprep.subr.bf16.mxu1 %v4231_v1  ;;  %s2772_s20 = smul.u32 384, %s4299_s12  ;;  %v2805_v63 = vld [vmem:[%s4226_s1 + $0x98] sm:$0xff]   ;;  %vm3521_vm6 = vmor %vm1535_vm4, %vm1536_vm5  ;;  %s2715_s27 = sshll.u32 %s4299_s12, 7 }
  0x12   : > { %s4090_s30 = scalar_lea.vmem %s4228_s3, %s2715_s27 }
  0x13   : > { %s2966_s25 = scalar_lea.vmem %s4225_s0, %s2772_s20 }
  0x14   : > { %936 = vmatpush1.bf16.msra.mxu0 %v2799_v2  ;;  %2761 = vmatpush1.bf16.msra.mxu1 %v2799_v2  ;;  %v2974_v5 = vld [vmem:[%s2966_s25] sm:$0xff]  ;;  %v2977_v6 = vld [vmem:[%s2966_s25 + $0x8] sm:$0xff]  ;;  %v2980_v7 = vld [vmem:[%s2966_s25 + $0x10] sm:$0x11] }
  0x15   : > { %937 = vmatprep.subr.bf16.mxu0 %v4231_v1  ;;  %2750 = vmatprep.subr.bf16.mxu1 %v4231_v1  ;;  %v292_v8 = vshrl.u32 %v2974_v5, 16  ;;  %v295_v9 = vshll.u32 %v2974_v5, 16  ;;  %v301_v10 = vshll.u32 %v2977_v6, 16  ;;  %v240_v11 = vld [vmem:[%s2966_s25 + $0xc0] sm:$0xff]  ;;  %v305_v13 = vshrl.u32 %v2977_v6, 16  ;;  %v241_v15 = vld [vmem:[%s2966_s25 + $0xc8] sm:$0xff] }
  0x16   : > { %v311_v14 = vshll.u32 %v2980_v7, 16  ;;  %v242_v16 = vld [vmem:[%s2966_s25 + $0xd0] sm:$0x11]  ;;  %v484_v20 = vshrl.u32 %v240_v11, 16  ;;  %v487_v22 = vshll.u32 %v240_v11, 16  ;;  %v493_v23 = vshll.u32 %v241_v15, 16 }
  0x17   : > { %v294_v17 = vrot.slane %v292_v8, 4  ;;  %v297_v18 = vrot.slane %v295_v9, 5  ;;  %v303_v19 = vrot.slane %v301_v10, 5  ;;  %v307_v21 = vrot.slane %v305_v13, 4  ;;  %v3007_v37 = vld [vmem:[%s2966_s25 + $0x18] sm:$0xff]  ;;  %v3010_v38 = vld [vmem:[%s2966_s25 + $0x20] sm:$0xff] }
  0x18   : > { %938 = vmatpush1.bf16.msra.mxu0 %v2800_v3  ;;  %2762 = vmatpush1.bf16.msra.mxu1 %v2800_v3  ;;  %v486_v25 = vrot.slane %v484_v20, 4  ;;  %v497_v26 = vshrl.u32 %v241_v15, 16  ;;  %v503_v27 = vshll.u32 %v242_v16, 16  ;;  %v313_v31 = vrot.slane %v311_v14, 5  ;;  %v243_v44 = vld [vmem:[%s2966_s25 + $0xd8] sm:$0xff]  ;;  %v244_v54 = vld [vmem:[%s2966_s25 + $0xe0] sm:$0xff] }
  0x19   : > { %939 = vmatprep.subr.bf16.mxu0 %v4231_v1  ;;  %2751 = vmatprep.subr.bf16.mxu1 %v4231_v1  ;;  %v298_v24 = vor.u32 %v297_v18, %v294_v17  ;;  %v308_v30 = vor.u32 %v307_v21, %v303_v19  ;;  %v489_v32 = vrot.slane %v487_v22, 5  ;;  %v495_v33 = vrot.slane %v493_v23, 5  ;;  %v3023_v47 = vld [vmem:[%s2966_s25 + $0x28] sm:$0x11]  ;;  %v3053_v10 = vld [vmem:[%s2966_s25 + $0x30] sm:$0xff]  ;;  %v3058_v15 = vld [vmem:[%s2966_s25 + $0x38] sm:$0xff] }
  0x1a   : > { %v499_v35 = vrot.slane %v497_v26, 4  ;;  %v505_v36 = vrot.slane %v503_v27, 5  ;;  %v316_v42 = vshrl.u32 %v3007_v37, 16  ;;  %v319_v43 = vshll.u32 %v3007_v37, 16  ;;  %v245_v62 = vld [vmem:[%s2966_s25 + $0xe8] sm:$0x11] }
  0x1b   : > { %v299_v34 = vrot.slane %v298_v24, 4  ;;  %v309_v40 = vrot.slane %v308_v30, 4  ;;  %v490_v41 = vor.u32 %v489_v32, %v486_v25  ;;  %v325_v48 = vshll.u32 %v3010_v38, 16  ;;  %v2806_v16 = vld [vmem:[%s4226_s1 + $0xa0] sm:$0xff]   ;;  %v246_v26 = vld [vmem:[%s2966_s25 + $0xf0] sm:$0xff] }
  0x1c   : > { %940 = vmatpush1.bf16.msra.mxu0 %v2801_v4  ;;  %2763 = vmatpush1.bf16.msra.mxu1 %v2801_v4  ;;  %v500_v46 = vor.u32 %v499_v35, %v495_v33  ;;  %v329_v49 = vshrl.u32 %v3010_v38, 16  ;;  %v318_v52 = vrot.slane %v316_v42, 4  ;;  %v321_v53 = vrot.slane %v319_v43, 5  ;;  %v3065_v22 = vld [vmem:[%s2966_s25 + $0x40] sm:$0x11] }
  0x1d   : > { %941 = vmatprep.subr.bf16.mxu0 %v4231_v1  ;;  %2752 = vmatprep.subr.bf16.mxu1 %v4231_v1  ;;  %v3020_v45 = vsel %vm3000_vm2, %v299_v34, %v303_v19  ;;  %v3029_v50 = vsel %vm3000_vm2, %v309_v40, %v313_v31  ;;  %v491_v51 = vrot.slane %v490_v41, 4  ;;  %v327_v57 = vrot.slane %v325_v48, 5  ;;  %v247_v31 = vld [vmem:[%s2966_s25 + $0xf8] sm:$0xff] }
  0x1e   : > { %v2461_v55 = vcombine.high %v3020_v45, %v3029_v50  ;;  %v501_v56 = vrot.slane %v500_v46, 4  ;;  %v322_v59 = vor.u32 %v321_v53, %v318_v52  ;;  %v331_v60 = vrot.slane %v329_v49, 4  ;;  %v2807_v49 = vld [vmem:[%s4226_s1 + $0xa8] sm:$0xff]  }
  0x1f   : > { %v3038_v58 = vsel %vm3000_vm2, %v491_v51, %v495_v33  ;;  %v335_v61 = vshll.u32 %v3023_v47, 16  ;;  %v508_v2 = vshrl.u32 %v243_v44, 16  ;;  %v511_v3 = vshll.u32 %v243_v44, 16 }
  0x20   : > { %942 = vmatpush1.bf16.msra.mxu0 %v2802_v12  ;;  %2764 = vmatpush1.bf16.msra.mxu1 %v2802_v12  ;;  %v3048_v0 = vsel %vm3000_vm2, %v501_v56, %v505_v36  ;;  %v517_v4 = vshll.u32 %v244_v54, 16  ;;  %v332_v9 = vor.u32 %v331_v60, %v327_v57  ;;  %v323_v11 = vrot.slane %v322_v59, 4 }
  0x21   : > { %943 = vmatprep.subr.bf16.mxu0 %v4231_v1  ;;  %2753 = vmatprep.subr.bf16.mxu1 %v4231_v1  ;;  %v2477_v8 = vcombine.high %v3038_v58, %v3048_v0  ;;  %v337_v12 = vrot.slane %v335_v61, 5  ;;  %v510_v13 = vrot.slane %v508_v2, 4  ;;  %v513_v14 = vrot.slane %v511_v3, 5  ;;  %v3099_v61 = vld [vmem:[%s2966_s25 + $0x48] sm:$0xff] }
  0x22   : > { %2504 = vmatprep.mubr.msk.bf16.mxu0 %vm884_vm3, %v2461_v55  ;;  %v333_v17 = vrot.slane %v332_v9, 4  ;;  %v519_v18 = vrot.slane %v517_v4, 5  ;;  %v521_v19 = vshrl.u32 %v244_v54, 16  ;;  %v527_v20 = vshll.u32 %v245_v62, 16  ;;  %v248_v54 = vld [vmem:[%s2966_s25 + $0x100] sm:$0x11] }
  0x23   : > { %2512 = vmatprep.mubr.msk.bf16.mxu1 %vm884_vm3, %v2477_v8  ;;  %v514_v21 = vor.u32 %v513_v14, %v510_v13  ;;  %v340_v23 = vshrl.u32 %v3053_v10, 16  ;;  %v343_v24 = vshll.u32 %v3053_v10, 16  ;;  %v349_v25 = vshll.u32 %v3058_v15, 16  ;;  %v2808_v62 = vld [vmem:[%s4226_s1 + $0xb0] sm:$0xff]  }
  0x24   : > { %944 = vmatpush1.bf16.msra.mxu0 %v2803_v28  ;;  %2765 = vmatpush1.bf16.msra.mxu1 %v2803_v28  ;;  %v523_v27 = vrot.slane %v521_v19, 4  ;;  %v529_v28 = vrot.slane %v527_v20, 5  ;;  %v353_v30 = vshrl.u32 %v3058_v15, 16  ;;  %v2460_v33 = vcombine.low %v3020_v45, %v3029_v50  ;;  %v3109_v8 = vld [vmem:[%s2966_s25 + $0x50] sm:$0xff] }
  0x25   : > { %945 = vmatprep.subr.bf16.mxu0 %v4231_v1  ;;  %2754 = vmatprep.subr.bf16.mxu1 %v4231_v1  ;;  %v3081_v34 = vsel %vm3000_vm2, %v323_v11, %v327_v57  ;;  %v515_v35 = vrot.slane %v514_v21, 4  ;;  %v342_v36 = vrot.slane %v340_v23, 4  ;;  %v345_v40 = vrot.slane %v343_v24, 5  ;;  %v249_v24 = vld [vmem:[%s2966_s25 + $0x108] sm:$0xff] }
  0x26   : > { %v351_v41 = vrot.slane %v349_v25, 5  ;;  %v355_v42 = vrot.slane %v353_v30, 4  ;;  %v3085_v43 = vsel %vm3000_vm2, %v333_v17, %v337_v12  ;;  %v359_v44 = vshll.u32 %v3065_v22, 16  ;;  %v250_v30 = vld [vmem:[%s2966_s25 + $0x110] sm:$0xff] }
  0x27   : > { %v532_v46 = vshrl.u32 %v246_v26, 16  ;;  %v535_v48 = vshll.u32 %v246_v26, 16  ;;  %v346_v52 = vor.u32 %v345_v40, %v342_v36  ;;  %v541_v55 = vshll.u32 %v247_v31, 16  ;;  %v2809_v40 = vld [vmem:[%s4226_s1 + $0xb8] sm:$0xff]  }
  0x28   : > { %946 = vmatpush1.bf16.msra.mxu0 %v2804_v39  ;;  %2766 = vmatpush1.bf16.msra.mxu1 %v2804_v39  ;;  %v524_v39 = vor.u32 %v523_v27, %v519_v18  ;;  %v356_v53 = vor.u32 %v355_v42, %v351_v41  ;;  %v3096_v56 = vsel %vm3000_vm2, %v515_v35, %v519_v18  ;;  %v545_v60 = vshrl.u32 %v247_v31, 16  ;;  %v3118_v18 = vld [vmem:[%s2966_s25 + $0x58] sm:$0x11] }
  0x29   : > { %947 = vmatprep.subr.bf16.mxu0 %v4231_v1  ;;  %2755 = vmatprep.subr.bf16.mxu1 %v4231_v1  ;;  %v534_v57 = vrot.slane %v532_v46, 4  ;;  %v537_v59 = vrot.slane %v535_v48, 5  ;;  %v347_v2 = vrot.slane %v346_v52, 4  ;;  %v361_v3 = vrot.slane %v359_v44, 5  ;;  %v251_v52 = vld [vmem:[%s2966_s25 + $0x118] sm:$0x11] }
  0x2a   : > { %v525_v51 = vrot.slane %v524_v39, 4  ;;  %v543_v4 = vrot.slane %v541_v55, 5  ;;  %v2476_v9 = vcombine.low %v3038_v58, %v3048_v0  ;;  %v357_v11 = vrot.slane %v356_v53, 4 }
  0x2b   : > { %v538_v12 = vor.u32 %v537_v59, %v534_v57  ;;  %v547_v13 = vrot.slane %v545_v60, 4  ;;  %v2463_v14 = vcombine.high %v3081_v34, %v3085_v43  ;;  %v551_v17 = vshll.u32 %v248_v54, 16  ;;  %v3150_v54 = vld [vmem:[%s2966_s25 + $0x60] sm:$0xff] }
  0x2c   : > { %948 = vmatpush1.bf16.msra.mxu0 %v2805_v63  ;;  %2767 = vmatpush1.bf16.msra.mxu1 %v2805_v63  ;;  %v3106_v63 = vsel %vm3000_vm2, %v525_v51, %v529_v28  ;;  %v364_v19 = vshrl.u32 %v3099_v61, 16  ;;  %v3127_v21 = vsel %vm3000_vm2, %v347_v2, %v351_v41  ;;  %v367_v27 = vshll.u32 %v3099_v61, 16  ;;  %v2810_v2 = vld [vmem:[%s4226_s1] sm:$0xff]  }
  0x2d   : > { %949 = vmatprep.subr.bf16.mxu0 %v4231_v1  ;;  %2756 = vmatprep.subr.bf16.mxu1 %v4231_v1  ;;  %v2479_v20 = vcombine.high %v3096_v56, %v3106_v63  ;;  %v548_v23 = vor.u32 %v547_v13, %v543_v4  ;;  %v539_v25 = vrot.slane %v538_v12, 4  ;;  %v373_v28 = vshll.u32 %v3109_v8, 16 }
  0x2e   : > { %v366_v26 = vrot.slane %v364_v19, 4  ;;  %v3135_v31 = vsel %vm3000_vm2, %v357_v11, %v361_v3  ;;  %v553_v36 = vrot.slane %v551_v17, 5  ;;  %v377_v39 = vshrl.u32 %v3109_v8, 16 }
  0x2f   : > { %v549_v35 = vrot.slane %v548_v23, 4  ;;  %v369_v41 = vrot.slane %v367_v27, 5  ;;  %v3141_v42 = vrot.slane %v373_v28, 5  ;;  %v556_v44 = vshrl.u32 %v249_v24, 16  ;;  %v3179_v28 = vld [vmem:[%s2966_s25 + $0x70] sm:$0x11] }
  0x30   : > { %950 = vmatpush1.bf16.msra.mxu0 %v2806_v16  ;;  %2768 = vmatpush1.bf16.msra.mxu1 %v2806_v16  ;;  %v2462_v16 = vcombine.low %v3081_v34, %v3085_v43  ;;  %v559_v46 = vshll.u32 %v249_v24, 16  ;;  %v2478_v48 = vcombine.low %v3096_v56, %v3106_v63  ;;  %v383_v51 = vshll.u32 %v3118_v18, 16 }
  0x31   : > { %951 = vmatprep.subr.bf16.mxu0 %v4231_v1  ;;  %2757 = vmatprep.subr.bf16.mxu1 %v4231_v1  ;;  %v565_v53 = vshll.u32 %v250_v30, 16  ;;  %v2465_v55 = vcombine.high %v3127_v21, %v3135_v31  ;;  %v3156_v57 = vsel %vm3000_vm2, %v539_v25, %v543_v4  ;;  %v370_v59 = vor.u32 %v369_v41, %v366_v26  ;;  %v2811_v4 = vld [vmem:[%s4226_s1 + $0xc0] sm:$0xff]  }
  0x32   : > { %v558_v60 = vrot.slane %v556_v44, 4  ;;  %v561_v11 = vrot.slane %v559_v46, 5  ;;  %v569_v13 = vshrl.u32 %v250_v30, 16  ;;  %v3170_v17 = vsel %vm3000_vm2, %v549_v35, %v553_v36  ;;  %v2812_v35 = vld [vmem:[%s4226_s1 + $0x8] sm:$0xff]   ;;  %v3186_v44 = vld [vmem:[%s2966_s25 + $0x120] sm:$0xff] }
  0x33   : > { %v567_v12 = vrot.slane %v565_v53, 5  ;;  %v575_v19 = vshll.u32 %v251_v52, 16  ;;  %v388_v23 = vshrl.u32 %v3150_v54, 16  ;;  %v391_v24 = vshll.u32 %v3150_v54, 16  ;;  %v2813_v46 = vld [vmem:[%s4226_s1 + $0xc8] sm:$0xff]  }
  0x34   : > { %952 = vmatpush1.bf16.msra.mxu0 %v2807_v49  ;;  %2769 = vmatpush1.bf16.msra.mxu1 %v2807_v49  ;;  %v379_v49 = vrot.slane %v377_v39, 4  ;;  %v2464_v25 = vcombine.low %v3127_v21, %v3135_v31  ;;  %v562_v26 = vor.u32 %v561_v11, %v558_v60  ;;  %v571_v27 = vrot.slane %v569_v13, 4  ;;  %v2814_v11 = vld [vmem:[%s4226_s1 + $0x10] sm:$0xff]   ;;  %v2820_v21 = vld [vmem:[%s4226_s1 + $0x28] sm:$0xff]  }
  0x35   : > { %953 = vmatprep.subr.bf16.mxu0 %v4231_v1  ;;  %2758 = vmatprep.subr.bf16.mxu1 %v4231_v1  ;;  %v371_v36 = vrot.slane %v370_v59, 4  ;;  %v385_v39 = vrot.slane %v383_v51, 5  ;;  %v393_v41 = vrot.slane %v391_v24, 5  ;;  %v577_v53 = vrot.slane %v575_v19, 5  ;;  %v3200_v59 = vld [vmem:[%s2966_s25 + $0x128] sm:$0xff] }
  0x36   : > { %v380_v3 = vor.u32 %v379_v49, %v3141_v42  ;;  %v2481_v49 = vcombine.high %v3156_v57, %v3170_v17  ;;  %v572_v52 = vor.u32 %v571_v27, %v567_v12  ;;  %v2480_v45 = vcombine.low %v3156_v57, %v3170_v17 }
  0x37   : > { %v563_v50 = vrot.slane %v562_v26, 4  ;;  %v3231_v13 = vsel %vm3000_vm2, %v371_v36, %v3141_v42  ;;  %v583_v19 = vshll.u32 %v3186_v44, 16 }
  0x38   : > { %954 = vmatpush1.bf16.msra.mxu0 %v2808_v62  ;;  %2770 = vmatpush1.bf16.msra.mxu1 %v2808_v62  ;;  %v3159_v62 = vld [vmem:[%s2966_s25 + $0x68] sm:$0xff]  ;;  %v381_v51 = vrot.slane %v380_v3, 4  ;;  %v580_v3 = vshrl.u32 %v3186_v44, 16 }
  0x39   : > { %955 = vmatprep.subr.bf16.mxu0 %v4231_v1  ;;  %2759 = vmatprep.subr.bf16.mxu1 %v4231_v1  ;;  %v397_v30 = vshll.u32 %v3159_v62, 16  ;;  %v401_v0 = vshrl.u32 %v3159_v62, 16  ;;  %v3248_v42 = vsel %vm3000_vm2, %v563_v50, %v567_v12  ;;  %v3259_v12 = vld [vmem:[%s2966_s25 + $0x88] sm:$0x11] }
  0x3a   : > { %v3240_v24 = vsel %vm3000_vm2, %v381_v51, %v385_v39  ;;  %v582_v27 = vrot.slane %v580_v3, 4  ;;  %v585_v39 = vrot.slane %v583_v19, 5 }
  0x3b   : > { %v3213_v60 = vrot.slane %v397_v30, 5  ;;  %v593_v30 = vshrl.u32 %v3200_v59, 16 }
  0x3c   : > { %956 = vmatpush1.bf16.msra.mxu0 %v2809_v40  ;;  %2771 = vmatpush1.bf16.msra.mxu1 %v2809_v40  ;;  %v390_v40 = vrot.slane %v388_v23, 4  ;;  %v3236_v23 = vld [vmem:[%s2966_s25 + $0x78] sm:$0xff] }
  0x3d   : > { %1358 = vmatprep.subr.bf16.mxu1 %v4231_v1  ;;  %1907 = vmatprep.subr.bf16.mxu0 %v4231_v1  ;;  %v412_v50 = vshrl.u32 %v3236_v23, 16 }
  0x3e   : > { %v394_v58 = vor.u32 %v393_v41, %v390_v40  ;;  %v3244_v40 = vld [vmem:[%s2966_s25 + $0x80] sm:$0xff] }
  0x3f   : > { %966 = vmatmul.mubr.bf16.vlgmr.msra.gmra.mrb[0].mxu0 %v2460_v33  ;;  %1030 = vmatmul.mubr.bf16.vlgmr.msra.gmra.mrb[0].mxu1 %v2476_v9  ;;  %v3206_v33 = vld [vmem:[%s2966_s25 + $0x130] sm:$0x11]  ;;  %v573_v9 = vrot.slane %v572_v52, 4  ;;  %v414_v43 = vrot.slane %v412_v50, 4 }
  0x40   : > { %1359 = vmatpush1.bf16.msra.mxu1 %v2810_v2  ;;  %1908 = vmatpush1.bf16.msra.mxu0 %v2811_v4  ;;  %v407_v2 = vshll.u32 %v3179_v28, 16  ;;  %v403_v4 = vrot.slane %v401_v0, 4  ;;  %v395_v26 = vrot.slane %v394_v58, 4  ;;  %v586_v58 = vor.u32 %v585_v39, %v582_v27  ;;  %v3278_v27 = vld [vmem:[%s2966_s25 + $0x138] sm:$0xff]  ;;  %v3300_v39 = vld [vmem:[%s2966_s25 + $0x140] sm:$0xff] }
  0x41   : > { %1360 = vmatprep.subr.bf16.mxu1 %v4231_v1  ;;  %2505 = vmatprep.mubr.msk.bf16.mxu0 %vm884_vm3, %v2463_v14  ;;  %v2815_v14 = vld [vmem:[%s4226_s1 + $0xd0] sm:$0xff]   ;;  %v3252_v36 = vsel %vm3000_vm2, %v573_v9, %v577_v53  ;;  %v415_v53 = vshll.u32 %v3236_v23, 16  ;;  %v421_v0 = vshll.u32 %v3244_v40, 16  ;;  %v2816_v9 = vld [vmem:[%s4226_s1 + $0x18] sm:$0xff]   ;;  %4245 = vst [vmem:[#allocation2_spill] sm:$0xff] %v3278_v27  ;;  %4246 = vst [vmem:[#allocation3_spill] sm:$0xff] %v3300_v39 }
  0x42   : > { %2513 = vmatprep.mubr.msk.bf16.mxu1 %vm884_vm3, %v2479_v20  ;;  %1909 = vmatprep.subr.bf16.mxu0 %v4231_v1  ;;  %v589_v20 = vshll.u32 %v3200_v59, 16  ;;  %v409_v41 = vrot.slane %v407_v2, 5  ;;  %v404_v51 = vor.u32 %v403_v4, %v3213_v60  ;;  %v2817_v2 = vld [vmem:[%s4226_s1 + $0xd8] sm:$0xff]   ;;  %v587_v34 = vrot.slane %v586_v58, 4 }
  0x43   : > { %v417_v56 = vrot.slane %v415_v53, 5  ;;  %v423_v63 = vrot.slane %v421_v0, 5  ;;  %v3312_v58 = vsel %vm3000_vm2, %v395_v26, %v3213_v60  ;;  %v3330_v26 = vld [vmem:[%s2966_s25 + $0x148] sm:$0x11] }
  0x44   : > { %1361 = vmatpush1.bf16.msra.mxu1 %v2812_v35  ;;  %1910 = vmatpush1.bf16.msra.mxu0 %v2813_v46  ;;  %v591_v52 = vrot.slane %v589_v20, 5  ;;  %v595_v35 = vrot.slane %v593_v30, 4  ;;  %v599_v46 = vshll.u32 %v3206_v33, 16  ;;  %v405_v3 = vrot.slane %v404_v51, 4  ;;  %4247 = vst [vmem:[#allocation4_spill] sm:$0xff] %v3330_v26 }
  0x45   : > { %1362 = vmatprep.subr.bf16.mxu1 %v4231_v1  ;;  %1911 = vmatprep.subr.bf16.mxu0 %v4231_v1  ;;  %v425_v20 = vshrl.u32 %v3244_v40, 16  ;;  %v604_v51 = vshrl.u32 %v3278_v27, 16  ;;  %v418_v53 = vor.u32 %v417_v56, %v414_v43  ;;  %v613_v43 = vshll.u32 %v3300_v39, 16 }
  0x46   : > { %v596_v4 = vor.u32 %v595_v35, %v591_v52  ;;  %v601_v19 = vrot.slane %v599_v46, 5  ;;  %v2818_v35 = vld [vmem:[%s4226_s1 + $0x20] sm:$0xff]   ;;  %v3316_v50 = vsel %vm3000_vm2, %v405_v3, %v409_v41  ;;  %v607_v3 = vshll.u32 %v3278_v27, 16 }
  0x47   : > { %974 = vmatmul.mubr.bf16.gmra.mrb[4].mxu0 %v2462_v16  ;;  %1038 = vmatmul.mubr.bf16.gmra.mrb[4].mxu1 %v2478_v48  ;;  %v2467_v16 = vcombine.high %v3231_v13, %v3240_v24  ;;  %v2819_v46 = vld [vmem:[%s4226_s1 + $0xe0] sm:$0xff]   ;;  %v606_v41 = vrot.slane %v604_v51, 4  ;;  %v3343_v51 = vld [vmem:[%s2966_s25 + $0x150] sm:$0xff] }
  0x48   : > { %1363 = vmatpush1.bf16.msra.mxu1 %v2814_v11  ;;  %1912 = vmatpush1.bf16.msra.mxu0 %v2815_v14  ;;  %v597_v48 = vrot.slane %v596_v4, 4  ;;  %v427_v11 = vrot.slane %v425_v20, 4  ;;  %v431_v14 = vshll.u32 %v3259_v12, 16  ;;  %v3319_v4 = vld [vmem:[%s2966_s25 + $0x90] sm:$0xff]  ;;  %v3323_v20 = vsel %vm3000_vm2, %v587_v34, %v591_v52  ;;  %4248 = vst [vmem:[#allocation5_spill] sm:$0xff] %v3343_v51 }
  0x49   : > { %2506 = vmatprep.mubr.msk.bf16.mxu0 %vm884_vm3, %v2465_v55  ;;  %2514 = vmatprep.mubr.msk.bf16.mxu1 %vm884_vm3, %v2481_v49  ;;  %v2483_v55 = vcombine.high %v3248_v42, %v3252_v36  ;;  %v617_v52 = vshrl.u32 %v3300_v39, 16  ;;  %v609_v56 = vrot.slane %v607_v3, 5 }
  0x4a   : > { %1364 = vmatprep.subr.bf16.mxu1 %v4231_v1  ;;  %1913 = vmatprep.subr.bf16.mxu0 %v4231_v1  ;;  %v428_v0 = vor.u32 %v427_v11, %v423_v63  ;;  %v3327_v60 = vsel %vm3000_vm2, %v597_v48, %v601_v19  ;;  %v3338_v11 = vld [vmem:[%s2966_s25 + $0x98] sm:$0xff]  ;;  %v436_v19 = vshrl.u32 %v3319_v4, 16  ;;  %v439_v48 = vshll.u32 %v3319_v4, 16 }
  0x4b   : > { %v619_v3 = vrot.slane %v617_v52, 4  ;;  %v2485_v31 = vcombine.high %v3323_v20, %v3327_v60  ;;  %v610_v17 = vor.u32 %v609_v56, %v606_v41  ;;  %v445_v32 = vshll.u32 %v3338_v11, 16  ;;  %v3382_v41 = vld [vmem:[%s2966_s25 + $0x158] sm:$0xff]  ;;  %v3414_v56 = vld [vmem:[%s2966_s25 + $0xb0] sm:$0xff] }
  0x4c   : > { %1365 = vmatpush1.bf16.msra.mxu1 %v2816_v9  ;;  %1914 = vmatpush1.bf16.msra.mxu0 %v2817_v2  ;;  %v419_v9 = vrot.slane %v418_v53, 4  ;;  %v433_v2 = vrot.slane %v431_v14, 5  ;;  %v429_v34 = vrot.slane %v428_v0, 4  ;;  %v2469_v14 = vcombine.high %v3312_v58, %v3316_v50  ;;  %4249 = vst [vmem:[#allocation6_spill] sm:$0xff] %v3382_v41 }
  0x4d   : > { %1366 = vmatprep.subr.bf16.mxu1 %v4231_v1  ;;  %1915 = vmatprep.subr.bf16.mxu0 %v4231_v1  ;;  %v615_v0 = vrot.slane %v613_v43, 5  ;;  %v438_v43 = vrot.slane %v436_v19, 4  ;;  %v441_v52 = vrot.slane %v439_v48, 5  ;;  %v447_v48 = vrot.slane %v445_v32, 5 }
  0x4e   : > { %v3364_v57 = vsel %vm3000_vm2, %v419_v9, %v423_v63  ;;  %v3378_v63 = vsel %vm3000_vm2, %v429_v34, %v433_v2  ;;  %v628_v9 = vshrl.u32 %v3343_v51, 16  ;;  %v3389_v2 = vld [vmem:[%s2966_s25 + $0x160] sm:$0x11]  ;;  %v641_v32 = vshrl.u32 %v3382_v41, 16 }
  0x4f   : > { %982 = vmatmul.mubr.bf16.gmra.mrb[8].mxu0 %v2464_v25  ;;  %1046 = vmatmul.mubr.bf16.gmra.mrb[8].mxu1 %v2480_v45  ;;  %v623_v25 = vshll.u32 %v3330_v26, 16  ;;  %v3368_v45 = vld [vmem:[%s2966_s25 + $0xa0] sm:$0x11]  ;;  %v442_v19 = vor.u32 %v441_v52, %v438_v43  ;;  %4250 = vst [vmem:[#allocation7_spill] sm:$0xff] %v3389_v2  ;;  %v2823_v43 = vld [vmem:[%s4226_s1 + $0xf0] sm:$0xff]   ;;  %v637_v52 = vshll.u32 %v3382_v41, 16 }
  0x50   : > { %2507 = vmatprep.mubr.msk.bf16.mxu0 %vm884_vm3, %v2467_v16  ;;  %2515 = vmatprep.mubr.msk.bf16.mxu1 %vm884_vm3, %v2483_v55  ;;  %v2821_v16 = vld [vmem:[%s4226_s1 + $0xe8] sm:$0xff]   ;;  %v620_v55 = vor.u32 %v619_v3, %v615_v0  ;;  %v631_v3 = vshll.u32 %v3343_v51, 16  ;;  %v630_v34 = vrot.slane %v628_v9, 4  ;;  %v4252_v51 = vcombine.low %v3248_v42, %v3252_v36 }
  0x51   : > { %1367 = vmatpush1.bf16.msra.mxu1 %v2818_v35  ;;  %1916 = vmatpush1.bf16.msra.mxu0 %v2819_v46  ;;  %v611_v35 = vrot.slane %v610_v17, 4  ;;  %v449_v46 = vshrl.u32 %v3338_v11, 16  ;;  %v625_v49 = vrot.slane %v623_v25, 5  ;;  %v2822_v17 = vld [vmem:[%s4226_s1 + $0x30] sm:$0xff]   ;;  %v455_v25 = vshll.u32 %v3368_v45, 16 }
  0x52   : > { %1368 = vmatprep.subr.bf16.mxu1 %v4231_v1  ;;  %1917 = vmatprep.subr.bf16.mxu0 %v4231_v1  ;;  %v621_v53 = vrot.slane %v620_v55, 4  ;;  %v633_v55 = vrot.slane %v631_v3, 5  ;;  %v4251_v3 = vcombine.low %v3231_v13, %v3240_v24  ;;  %v2824_v13 = vld [vmem:[%s4226_s1 + $0x38] sm:$0xff]   ;;  %v643_v42 = vrot.slane %v641_v32, 4 }
  0x53   : > { %v451_v30 = vrot.slane %v449_v46, 4  ;;  %v3402_v46 = vld [vmem:[%s2966_s25 + $0xa8] sm:$0xff]  ;;  %v2825_v24 = vld [vmem:[%s4226_s1 + $0xf8] sm:$0xff]  }
  0x54   : > { %v634_v26 = vor.u32 %v633_v55, %v630_v34  ;;  %v460_v36 = vshrl.u32 %v3402_v46, 16  ;;  %v4253_v34 = vmov 0  }
  0x55   : > { %1369 = vmatpush1.bf16.msra.mxu1 %v2820_v21  ;;  %1918 = vmatpush1.bf16.msra.mxu0 %v2821_v16  ;;  %v3408_v21 = vsel %vm3000_vm2, %v611_v35, %v615_v0  ;;  %v452_v9 = vor.u32 %v451_v30, %v447_v48  ;;  %v639_v0 = vrot.slane %v637_v52, 5  ;;  %v647_v35 = vshll.u32 %v3389_v2, 16  ;;  %v3445_v16 = vld [vmem:[%s2966_s25 + $0x168] sm:$0xff] }
  0x56   : > { %1370 = vmatprep.subr.bf16.mxu1 %v4231_v1  ;;  %1919 = vmatprep.subr.bf16.mxu0 %v4231_v1  ;;  %v443_v1 = vrot.slane %v442_v19, 4  ;;  %v3427_v30 = vsel %vm3000_vm2, %v621_v53, %v625_v49  ;;  %v3438_v53 = vld [vmem:[%s2966_s25 + $0xb8] sm:$0x11]  ;;  %v473_v19 = vshrl.u32 %v3414_v56, 16  ;;  %v635_v32 = vrot.slane %v634_v26, 4  ;;  %4254 = vst [vmem:[#allocation8_spill] sm:$0xff] %v3445_v16 }
  0x57   : > { %990 = vmatmul.mubr.bf16.gmra.mrb[12].mxu0 %v4251_v3  ;;  %1054 = vmatmul.mubr.bf16.gmra.mrb[12].mxu1 %v4252_v51  ;;  %v463_v51 = vshll.u32 %v3402_v46, 16  ;;  %v453_v49 = vrot.slane %v452_v9, 4  ;;  %v644_v55 = vor.u32 %v643_v42, %v639_v0  ;;  %v462_v52 = vrot.slane %v460_v36, 4  ;;  %v2826_v42 = vld [vmem:[%s4226_s1 + $0x40] sm:$0xff]  }
  0x58   : > { %2508 = vmatprep.mubr.msk.bf16.mxu0 %vm884_vm3, %v2469_v14  ;;  %2516 = vmatprep.mubr.msk.bf16.mxu1 %vm884_vm3, %v2485_v31  ;;  %v457_v14 = vrot.slane %v455_v25, 5  ;;  %v469_v31 = vshll.u32 %v3414_v56, 16  ;;  %v3454_v25 = vsel %vm3000_vm2, %v443_v1, %v447_v48  ;;  %v649_v9 = vrot.slane %v647_v35, 5  ;;  %v2827_v36 = vld [vmem:[%s4226_s1 + $0x100] sm:$0xff]  }
  0x59   : > { %1371 = vmatpush1.bf16.msra.mxu1 %v2822_v17  ;;  %1920 = vmatpush1.bf16.msra.mxu0 %v2823_v43  ;;  %v465_v3 = vrot.slane %v463_v51, 5  ;;  %v3448_v17 = vld [vmem:[%s2966_s25 + $0x170] sm:$0xff]  ;;  %v2487_v43 = vcombine.high %v3408_v21, %v3427_v30  ;;  %v645_v41 = vrot.slane %v644_v55, 4  ;;  %v475_v39 = vrot.slane %v473_v19, 4  ;;  %v3479_v55 = vld [vmem:[%s2966_s25 + $0x178] sm:$0x11] }
  0x5a   : > { %1372 = vmatprep.subr.bf16.mxu1 %v4253_v34  ;;  %1921 = vmatprep.subr.bf16.mxu0 %v4253_v34  ;;  %v471_v2 = vrot.slane %v469_v31, 5  ;;  %v479_v26 = vshll.u32 %v3438_v53, 16  ;;  %v652_v1 = vshrl.u32 %v3445_v16, 16  ;;  %v655_v48 = vshll.u32 %v3445_v16, 16 }
  0x5b   : > { %v466_v27 = vor.u32 %v465_v3, %v462_v52  ;;  %v661_v35 = vshll.u32 %v3448_v17, 16  ;;  %v665_v51 = vshrl.u32 %v3448_v17, 16  ;;  %v1543_v31 = vrot.slane %v2980_v7, 5 }
  0x5c   : > { %v476_v19 = vor.u32 %v475_v39, %v471_v2  ;;  %v4255_v52 = vcombine.low %v3312_v58, %v3316_v50  ;;  %v4256_v7 = vcombine.low %v3323_v20, %v3327_v60  ;;  %v3489_v3 = vsel %vm3000_vm2, %v645_v41, %v649_v9  ;;  %v2829_v60 = vld [vmem:[%s4226_s1 + $0x108] sm:$0xff]  }
  0x5d   : > { %1373 = vmatpush1.bf16.msra.mxu1 %v2824_v13  ;;  %1922 = vmatpush1.bf16.msra.mxu0 %v2825_v24  ;;  %v3472_v13 = vsel %vm3000_vm2, %v453_v49, %v457_v14  ;;  %v3476_v24 = vsel %vm3000_vm2, %v635_v32, %v639_v0  ;;  %v467_v49 = vrot.slane %v466_v27, 4  ;;  %v654_v14 = vrot.slane %v652_v1, 4  ;;  %v2828_v27 = vld [vmem:[%s4226_s1 + $0x48] sm:$0xff]  }
  0x5e   : > { %1374 = vmatprep.subr.bf16.mxu1 %v4253_v34  ;;  %1923 = vmatprep.subr.bf16.mxu0 %v4253_v34  ;;  %v657_v16 = vrot.slane %v655_v48, 5  ;;  %v4257_v39 = vcombine.high %v3364_v57, %v3378_v63  ;;  %v477_v58 = vrot.slane %v476_v19, 4  ;;  %v481_v50 = vrot.slane %v479_v26, 5 }
  0x5f   : > { %998 = vmatmul.mubr.bf16.gmra.mrb[16].mxu0 %v4255_v52  ;;  %1062 = vmatmul.mubr.bf16.gmra.mrb[16].mxu1 %v4256_v7  ;;  %v663_v0 = vrot.slane %v661_v35, 5  ;;  %v667_v32 = vrot.slane %v665_v51, 4  ;;  %v2486_v20 = vcombine.low %v3408_v21, %v3427_v30  ;;  %v1540_v9 = vrot.slane %v2977_v6, 5 }
  0x60   : > { %2509 = vmatprep.mubr.msk.bf16.mxu0 %vm884_vm3, %v4257_v39  ;;  %2517 = vmatprep.mubr.msk.bf16.mxu1 %vm884_vm3, %v2487_v43  ;;  %v658_v41 = vor.u32 %v657_v16, %v654_v14  ;;  %v671_v43 = vshll.u32 %v3479_v55, 16  ;;  %v2473_v26 = vcombine.high %v3454_v25, %v3472_v13  ;;  %v2472_v21 = vcombine.low %v3454_v25, %v3472_v13  ;;  %v2830_v14 = vld [vmem:[%s4226_s1 + $0x50] sm:$0xff]  }
  0x61   : > { %1375 = vmatpush1.bf16.msra.mxu1 %v2826_v42  ;;  %1924 = vmatpush1.bf16.msra.mxu0 %v2827_v36  ;;  %v668_v30 = vor.u32 %v667_v32, %v663_v0  ;;  %v2580_v42 = vrot.slane %v2974_v5, 9  ;;  %v2489_v16 = vcombine.high %v3476_v24, %v3489_v3  ;;  %v3517_v36 = vsel %vm3000_vm2, %v467_v49, %v471_v2  ;;  %v2831_v39 = vld [vmem:[%s4226_s1 + $0x110] sm:$0xff]  }
  0x62   : > { %1376 = vmatprep.subr.bf16.mxu1 %v4253_v34  ;;  %1925 = vmatprep.subr.bf16.mxu0 %v4253_v34  ;;  %v659_v1 = vrot.slane %v658_v41, 4  ;;  %v673_v48 = vrot.slane %v671_v43, 5  ;;  %v3527_v51 = vsel %vm3000_vm2, %v477_v58, %v481_v50  ;;  %v1542_v52 = vrot.slane %v1540_v9, 4 }
  0x63   : > { %v669_v19 = vrot.slane %v668_v30, 4  ;;  %v1547_v7 = vrot.slane %v3010_v38, 5  ;;  %v2488_v2 = vcombine.low %v3476_v24, %v3489_v3  ;;  %v2525_v58 = vcombine.high %v3053_v10, %v3058_v15  ;;  %v2870_v38 = vld [vmem:[%s2966_s25 + $0x8] sm:$0xff] }
  0x64   : > { %v3534_v49 = vsel %vm3000_vm2, %v659_v1, %v663_v0  ;;  %v3552_v3 = vsel %vm3521_vm6, %v2580_v42, %v1540_v9  ;;  %v3556_v50 = vsel %vm3521_vm6, %v1542_v52, %v1543_v31  ;;  %v2581_v0 = vrot.slane %v3007_v37, 9  ;;  %v2832_v9 = vld [vmem:[%s4226_s1 + $0x58] sm:$0xff]  }
  0x65   : > { %1377 = vmatpush1.bf16.msra.mxu1 %v2828_v27  ;;  %1926 = vmatpush1.bf16.msra.mxu0 %v2829_v60  ;;  %v3547_v24 = vsel %vm3000_vm2, %v669_v19, %v673_v48  ;;  %v4260_v32 = vcombine.low %v3364_v57, %v3378_v63  ;;  %v2475_v29 = vcombine.high %v3517_v36, %v3527_v51  ;;  %v1550_v60 = vrot.slane %v3023_v47, 5  ;;  %v4268_v47 = vld [vmem:[#allocation8_spill] sm:$0xff] }
  0x66   : > { %1378 = vmatprep.subr.bf16.mxu1 %v4253_v34  ;;  %1927 = vmatprep.subr.bf16.mxu0 %v4253_v34  ;;  %v2474_v27 = vcombine.low %v3517_v36, %v3527_v51  ;;  %v2582_v41 = vrot.slane %v3053_v10, 9  ;;  %v2491_v31 = vcombine.high %v3534_v49, %v3547_v24  ;;  %v3574_v57 = vrot.slane %v1547_v7, 4 }
  0x67   : > { %1006 = vmatmul.mubr.bf16.gmra.mrb[20].mxu0 %v4260_v32  ;;  %1070 = vmatmul.mubr.bf16.gmra.mrb[20].mxu1 %v2486_v20  ;;  %v1554_v63 = vrot.slane %v3058_v15, 5  ;;  %v1557_v20 = vrot.slane %v3065_v22, 5  ;;  %v2490_v43 = vcombine.low %v3534_v49, %v3547_v24  ;;  %v2621_v30 = vcombine.high %v3552_v3, %v3556_v50 }
  0x68   : > { %2510 = vmatprep.mubr.msk.bf16.mxu0 %vm884_vm3, %v2473_v26  ;;  %2518 = vmatprep.mubr.msk.bf16.mxu1 %vm884_vm3, %v2489_v16  ;;  %v2833_v26 = vld [vmem:[%s4226_s1 + $0x118] sm:$0xff]   ;;  %v2524_v42 = vcombine.low %v3053_v10, %v3058_v15  ;;  %v2583_v22 = vrot.slane %v3099_v61, 9  ;;  %v1561_v19 = vrot.slane %v3109_v8, 5  ;;  %v1564_v52 = vrot.slane %v3118_v18, 5 }
  0x69   : > { %1379 = vmatpush1.bf16.msra.mxu1 %v2830_v14  ;;  %1928 = vmatpush1.bf16.msra.mxu0 %v2831_v39  ;;  %v3595_v16 = vsel %vm3521_vm6, %v2582_v41, %v1554_v63  ;;  %v1556_v1 = vrot.slane %v1554_v63, 4  ;;  %v1568_v48 = vrot.slane %v3159_v62, 5  ;;  %v1571_v14 = vrot.slane %v3179_v28, 5  ;;  %v3694_v28 = vld [vmem:[%s2966_s25 + $0xc0] sm:$0xff] }
  0x6a   : > { %1380 = vmatprep.subr.bf16.mxu1 %v4253_v34  ;;  %1929 = vmatprep.subr.bf16.mxu0 %v4253_v34  ;;  %v2584_v34 = vrot.slane %v3150_v54, 9  ;;  %v3612_v41 = vsel %vm3521_vm6, %v2583_v22, %v1561_v19  ;;  %v1563_v63 = vrot.slane %v1561_v19, 4  ;;  %v1578_v25 = vrot.slane %v3259_v12, 5  ;;  %v2866_v19 = vld [vmem:[%s2966_s25 + $0xd0] sm:$0x11] }
  0x6b   : > { %v3608_v32 = vsel %vm3521_vm6, %v1556_v1, %v1557_v20  ;;  %v1582_v12 = vrot.slane %v3338_v11, 5  ;;  %v1592_v20 = vrot.slane %v3438_v53, 5  ;;  %v4261_v36 = vcombine.high %v2974_v5, %v2977_v6 }
  0x6c   : > { %v2625_v18 = vcombine.high %v3595_v16, %v3608_v32  ;;  %v2624_v39 = vcombine.low %v3595_v16, %v3608_v32  ;;  %v3624_v22 = vsel %vm3521_vm6, %v1563_v63, %v1564_v52  ;;  %v3628_v1 = vsel %vm3521_vm6, %v2584_v34, %v1568_v48 }
  0x6d   : > { %1381 = vmatpush1.bf16.msra.mxu1 %v2832_v9  ;;  %1930 = vmatpush1.bf16.msra.mxu0 %v2833_v26  ;;  %v1570_v9 = vrot.slane %v1568_v48, 4  ;;  %v2585_v52 = vrot.slane %v3236_v23, 9  ;;  %v1575_v34 = vrot.slane %v3244_v40, 5  ;;  %v2586_v63 = vrot.slane %v3319_v4, 9 }
  0x6e   : > { %v1589_v26 = vrot.slane %v3414_v56, 5  ;;  %v1548_v6 = vsel %vm3521_vm6, %v2581_v0, %v1547_v7  ;;  %v2871_v7 = vld [vmem:[%s2966_s25 + $0x18] sm:$0xff]  ;;  %v2872_v0 = vld [vmem:[%s2966_s25 + $0x20] sm:$0xff]  ;;  %v4272_v10 = vcombine.low %v3612_v41, %v3624_v22  ;;  %v4273_v15 = vcombine.high %v3150_v54, %v3159_v62 }
  0x6f   : > { %1014 = vmatmul.mubr.bf16.gmra.mrb[24].mxu0 %v2472_v21  ;;  %1078 = vmatmul.mubr.bf16.gmra.mrb[24].mxu1 %v2488_v2  ;;  %v3645_v48 = vsel %vm3521_vm6, %v1570_v9, %v1571_v14  ;;  %v1577_v14 = vrot.slane %v1575_v34, 4  ;;  %v1585_v9 = vrot.slane %v3368_v45, 5  ;;  %v3679_v21 = vsel %vm3521_vm6, %v2586_v63, %v1582_v12 }
  0x70   : > { %2511 = vmatprep.mubr.msk.bf16.mxu0 %vm884_vm3, %v2475_v29  ;;  %2519 = vmatprep.mubr.msk.bf16.mxu1 %vm884_vm3, %v2491_v31  ;;  %v3658_v31 = vsel %vm3521_vm6, %v2585_v52, %v1575_v34  ;;  %v2587_v34 = vrot.slane %v3402_v46, 9  ;;  %v1591_v52 = vrot.slane %v1589_v26, 4  ;;  %v2534_v2 = vcombine.low %v3402_v46, %v3414_v56 }
  0x71   : > { %v3667_v13 = vsel %vm3521_vm6, %v1577_v14, %v1578_v25  ;;  %v1584_v25 = vrot.slane %v1582_v12, 4  ;;  %v1599_v29 = vrot.slane %v2866_v19, 5  ;;  %v2588_v63 = vrot.slane %v3694_v28, 9  ;;  %v3698_v12 = vld [vmem:[%s2966_s25 + $0xc8] sm:$0xff] }
  0x72   : > { %v3683_v14 = vsel %vm3521_vm6, %v2587_v34, %v1589_v26  ;;  %v1596_v34 = vrot.slane %v3698_v12, 5  ;;  %v3713_v19 = vsel %vm3521_vm6, %v1591_v52, %v1592_v20  ;;  %v2869_v20 = vld [vmem:[%s2966_s25] sm:$0xff]  ;;  %v2523_v52 = vcombine.high %v2871_v7, %v2872_v0 }
  0x73   : > { %v3691_v45 = vsel %vm3521_vm6, %v1584_v25, %v1585_v9  ;;  %v2635_v51 = vcombine.high %v3683_v14, %v3713_v19  ;;  %v2634_v49 = vcombine.low %v3683_v14, %v3713_v19  ;;  %v2520_v9 = vcombine.low %v2869_v20, %v2870_v38  ;;  %v4263_v20 = vld [vmem:[#allocation2_spill] sm:$0xff]  ;;  %v4267_v25 = vld [vmem:[#allocation7_spill] sm:$0xff]  ;;  %v2877_v19 = vld [vmem:[%s2966_s25 + $0xf0] sm:$0xff] }
  0x74   : > { %v2633_v53 = vcombine.high %v3679_v21, %v3691_v45  ;;  %v2632_v26 = vcombine.low %v3679_v21, %v3691_v45  ;;  %v3729_v24 = vsel %vm3521_vm6, %v2588_v63, %v1596_v34  ;;  %v1598_v5 = vrot.slane %v1596_v34, 4 }
  0x75   : > { %v2522_v63 = vcombine.low %v2871_v7, %v2872_v0  ;;  %v4266_v7 = vld [vmem:[#allocation5_spill] sm:$0xff]  ;;  %v4275_v16 = vcombine.low %v3150_v54, %v3159_v62  ;;  %v4279_v54 = vcombine.low %v3236_v23, %v3244_v40  ;;  %v4280_v62 = vcombine.low %v3658_v31, %v3667_v13 }
  0x76   : > { %v4281_v32 = vcombine.high %v3319_v4, %v3338_v11 }
  0x77   : > { %1022 = vmatmul.mubr.bf16.gmra.mrb[28].mxu0 %v2474_v27  ;;  %1086 = vmatmul.mubr.bf16.gmra.mrb[28].mxu1 %v2490_v43  ;;  %v1551_v27 = vsel %vm3521_vm6, %v3574_v57, %v1550_v60  ;;  %v3744_v43 = vsel %vm3521_vm6, %v1598_v5, %v1599_v29  ;;  %v1627_v29 = vrot.slane %v3206_v33, 5 }
  0x78   : > { %2564 = vmatprep.mubr.msk.bf16.mxu1 %vm884_vm3, %v4261_v36  ;;  %2664 = vmatprep.mubr.msk.bf16.mxu0 %vm884_vm3, %v2621_v30  ;;  %v2620_v30 = vcombine.low %v3552_v3, %v3556_v50  ;;  %v2623_v60 = vcombine.high %v1548_v6, %v1551_v27  ;;  %v2592_v3 = vrot.slane %v3186_v44, 9  ;;  %v1624_v50 = vrot.slane %v3200_v59, 5 }
  0x79   : > { %v2622_v34 = vcombine.low %v1548_v6, %v1551_v27  ;;  %v4265_v27 = vld [vmem:[#allocation6_spill] sm:$0xff]  ;;  %v1641_v6 = vrot.slane %v4267_v25, 5 }
  0x7a   : > { %v3767_v36 = vsel %vm3521_vm6, %v2592_v3, %v1624_v50  ;;  %v1626_v5 = vrot.slane %v1624_v50, 4  ;;  %v2594_v3 = vrot.slane %v4266_v7, 9  ;;  %v2548_v0 = vcombine.low %v4266_v7, %v4265_v27 }
  0x7b   : > { %v1648_v50 = vrot.slane %v3479_v55, 5 }
  0x7c   : > { %v3776_v33 = vsel %vm3521_vm6, %v1626_v5, %v1627_v29  ;;  %v1638_v5 = vrot.slane %v4265_v27, 5 }
  0x7d   : > { %v4287_v35 = vcombine.high %v3767_v36, %v3776_v33 }
  0x7e   : > { %v1640_v55 = vrot.slane %v1638_v5, 4 }
  0x7f   : > { %1391 = vmatmul.mubr.bf16.vlgmr.msra.gmra.mrb[32].mxu1 %v2520_v9  ;;  %1940 = vmatmul.mubr.bf16.vlgmr.msra.gmra.mrb[32].mxu0 %v2620_v30  ;;  %v4262_v30 = vld [vmem:[#allocation3_spill] sm:$0xff]  ;;  %v2593_v9 = vrot.slane %v4263_v20, 9 }
  0x80   : > { %2565 = vmatprep.mubr.msk.bf16.mxu1 %vm884_vm3, %v2523_v52  ;;  %2665 = vmatprep.mubr.msk.bf16.mxu0 %vm884_vm3, %v2623_v60  ;;  %v1631_v52 = vrot.slane %v4262_v30, 5  ;;  %v4264_v60 = vld [vmem:[#allocation4_spill] sm:$0xff] }
  0x81   : > { %v1634_v57 = vrot.slane %v4264_v60, 5 }
  0x82   : > { %v3789_v60 = vsel %vm3521_vm6, %v2593_v9, %v1631_v52  ;;  %v1633_v29 = vrot.slane %v1631_v52, 4  ;;  %v2595_v9 = vrot.slane %v4268_v47, 9  ;;  %v1645_v52 = vrot.slane %v3448_v17, 5 }
  0x84   : > { %v3799_v38 = vsel %vm3521_vm6, %v1633_v29, %v1634_v57  ;;  %v2550_v29 = vcombine.low %v4268_v47, %v3448_v17 }
  0x85   : > { %v2647_v57 = vcombine.high %v3789_v60, %v3799_v38  ;;  %v2646_v25 = vcombine.low %v3789_v60, %v3799_v38 }
  0x87   : > { %1399 = vmatmul.mubr.bf16.gmra.mrb[36].mxu1 %v2522_v63  ;;  %1948 = vmatmul.mubr.bf16.gmra.mrb[36].mxu0 %v2622_v34  ;;  %v3818_v63 = vsel %vm3521_vm6, %v2594_v3, %v1638_v5  ;;  %v3822_v34 = vsel %vm3521_vm6, %v2595_v9, %v1645_v52 }
  0x88   : > { %2566 = vmatprep.mubr.msk.bf16.mxu1 %vm884_vm3, %v2525_v58  ;;  %2666 = vmatprep.mubr.msk.bf16.mxu0 %vm884_vm3, %v2625_v18  ;;  %v1647_v58 = vrot.slane %v1645_v52, 4  ;;  %v3828_v18 = vsel %vm3521_vm6, %v1640_v55, %v1641_v6  ;;  %v4269_v6 = vcombine.high %v3099_v61, %v3109_v8  ;;  %v4271_v55 = vcombine.low %v3099_v61, %v3109_v8 }
  0x89   : > { %v2649_v37 = vcombine.high %v3818_v63, %v3828_v18  ;;  %v2648_v3 = vcombine.low %v3818_v63, %v3828_v18  ;;  %v4276_v61 = vcombine.low %v3628_v1, %v3645_v48  ;;  %v4277_v8 = vcombine.high %v3236_v23, %v3244_v40  ;;  %v2873_v40 = vld [vmem:[%s2966_s25 + $0xe0] sm:$0xff] }
  0x8a   : > { %v3836_v5 = vsel %vm3521_vm6, %v1647_v58, %v1648_v50  ;;  %v4270_v50 = vcombine.high %v3612_v41, %v3624_v22  ;;  %v4282_v41 = vcombine.low %v3319_v4, %v3338_v11  ;;  %v4283_v23 = vcombine.high %v3402_v46, %v3414_v56  ;;  %v2874_v11 = vld [vmem:[%s2966_s25 + $0xd8] sm:$0xff]  ;;  %v2878_v58 = vld [vmem:[%s2966_s25 + $0x100] sm:$0x11] }
  0x8b   : > { %v2651_v9 = vcombine.high %v3822_v34, %v3836_v5  ;;  %v2650_v52 = vcombine.low %v3822_v34, %v3836_v5  ;;  %v1603_v22 = vrot.slane %v2873_v40, 5  ;;  %v2537_v4 = vcombine.high %v3694_v28, %v3698_v12 }
  0x8c   : > { %v2536_v46 = vcombine.low %v3694_v28, %v3698_v12 }
  0x8f   : > { %1407 = vmatmul.mubr.bf16.gmra.mrb[40].mxu1 %v2524_v42  ;;  %1956 = vmatmul.mubr.bf16.gmra.mrb[40].mxu0 %v2624_v39  ;;  %v4274_v42 = vcombine.high %v3628_v1, %v3645_v48  ;;  %v4278_v39 = vcombine.high %v3658_v31, %v3667_v13  ;;  %v2589_v1 = vrot.slane %v2874_v11, 9  ;;  %v1605_v48 = vrot.slane %v1603_v22, 4  ;;  %v2875_v13 = vld [vmem:[%s2966_s25 + $0xe8] sm:$0x11] }
  0x90   : > { %2567 = vmatprep.mubr.msk.bf16.mxu1 %vm884_vm3, %v4269_v6  ;;  %2667 = vmatprep.mubr.msk.bf16.mxu0 %vm884_vm3, %v4270_v50  ;;  %v1606_v21 = vrot.slane %v2875_v13, 5  ;;  %v4284_v31 = vcombine.high %v3729_v24, %v3744_v43  ;;  %v1613_v6 = vrot.slane %v2878_v58, 5  ;;  %v4285_v50 = vcombine.low %v3729_v24, %v3744_v43  ;;  %v2881_v43 = vld [vmem:[%s2966_s25 + $0x118] sm:$0x11] }
  0x91   : > { %v1604_v45 = vsel %vm3521_vm6, %v2589_v1, %v1603_v22  ;;  %v4286_v1 = vcombine.high %v3186_v44, %v3200_v59  ;;  %v4289_v13 = vcombine.low %v3767_v36, %v3776_v33 }
  0x97   : > { %1415 = vmatmul.mubr.bf16.gmra.mrb[44].mxu1 %v4271_v55  ;;  %1964 = vmatmul.mubr.bf16.gmra.mrb[44].mxu0 %v4272_v10  ;;  %v2879_v55 = vld [vmem:[%s2966_s25 + $0x110] sm:$0xff] }
  0x98   : > { %2568 = vmatprep.mubr.msk.bf16.mxu1 %vm884_vm3, %v4273_v15  ;;  %2668 = vmatprep.mubr.msk.bf16.mxu0 %vm884_vm3, %v4274_v42  ;;  %v1617_v10 = vrot.slane %v2879_v55, 5  ;;  %v2538_v15 = vcombine.low %v2874_v11, %v2873_v40 }
  0x9a   : > { %v1619_v24 = vrot.slane %v1617_v10, 4 }
  0x9f   : > { %1423 = vmatmul.mubr.bf16.gmra.mrb[48].mxu1 %v4275_v16  ;;  %1972 = vmatmul.mubr.bf16.gmra.mrb[48].mxu0 %v4276_v61 }
  0xa0   : > { %2569 = vmatprep.mubr.msk.bf16.mxu1 %vm884_vm3, %v4277_v8  ;;  %2669 = vmatprep.mubr.msk.bf16.mxu0 %vm884_vm3, %v4278_v39  ;;  %v2880_v8 = vld [vmem:[%s2966_s25 + $0x108] sm:$0xff] }
  0xa1   : > { %v2591_v39 = vrot.slane %v2880_v8, 9 }
  0xa7   : > { %1431 = vmatmul.mubr.bf16.gmra.mrb[52].mxu1 %v4279_v54  ;;  %1980 = vmatmul.mubr.bf16.gmra.mrb[52].mxu0 %v4280_v62  ;;  %v1620_v54 = vrot.slane %v2881_v43, 5  ;;  %v1618_v62 = vsel %vm3521_vm6, %v2591_v39, %v1617_v10 }
  0xa8   : > { %2570 = vmatprep.mubr.msk.bf16.mxu1 %vm884_vm3, %v4281_v32  ;;  %2670 = vmatprep.mubr.msk.bf16.mxu0 %vm884_vm3, %v2633_v53  ;;  %v1607_v53 = vsel %vm3521_vm6, %v1605_v48, %v1606_v21  ;;  %v4288_v48 = vcombine.low %v3186_v44, %v3200_v59  ;;  %v4290_v21 = vcombine.high %v4263_v20, %v4262_v30 }
  0xa9   : > { %v2639_v14 = vcombine.high %v1604_v45, %v1607_v53  ;;  %v2638_v42 = vcombine.low %v1604_v45, %v1607_v53  ;;  %v1621_v32 = vsel %vm3521_vm6, %v1619_v24, %v1620_v54  ;;  %v4292_v44 = vcombine.high %v4266_v7, %v4265_v27 }
  0xaa   : > { %v2643_v22 = vcombine.high %v1618_v62, %v1621_v32  ;;  %v4293_v59 = vcombine.high %v4268_v47, %v3448_v17 }
  0xaf   : > { %1439 = vmatmul.mubr.bf16.gmra.mrb[56].mxu1 %v4282_v41  ;;  %1988 = vmatmul.mubr.bf16.gmra.mrb[56].mxu0 %v2632_v26  ;;  %v2876_v26 = vld [vmem:[%s2966_s25 + $0xf8] sm:$0xff] }
  0xb0   : > { %2571 = vmatprep.mubr.msk.bf16.mxu1 %vm884_vm3, %v4283_v23  ;;  %2671 = vmatprep.mubr.msk.bf16.mxu0 %vm884_vm3, %v2635_v51  ;;  %v1610_v56 = vrot.slane %v2876_v26, 5  ;;  %v2590_v51 = vrot.slane %v2877_v19, 9  ;;  %v2541_v16 = vcombine.high %v2877_v19, %v2876_v26  ;;  %v2540_v41 = vcombine.low %v2877_v19, %v2876_v26 }
  0xb2   : > { %v1611_v28 = vsel %vm3521_vm6, %v2590_v51, %v1610_v56 }
  0xb7   : > { %1447 = vmatmul.mubr.bf16.gmra.mrb[60].mxu1 %v2534_v2  ;;  %1996 = vmatmul.mubr.bf16.gmra.mrb[60].mxu0 %v2634_v49  ;;  %v2539_v2 = vcombine.high %v2874_v11, %v2873_v40  ;;  %v1612_v49 = vrot.slane %v1610_v56, 4  ;;  %v2543_v40 = vcombine.high %v2880_v8, %v2879_v55  ;;  %v2642_v11 = vcombine.low %v1618_v62, %v1621_v32 }
  0xb8   : > { %2572 = vmatprep.mubr.msk.bf16.mxu1 %vm884_vm3, %v2537_v4  ;;  %2672 = vmatprep.mubr.msk.bf16.mxu0 %vm884_vm3, %v4284_v31  ;;  %v2542_v4 = vcombine.low %v2880_v8, %v2879_v55  ;;  %v4291_v31 = vcombine.low %v4263_v20, %v4262_v30 }
  0xb9   : > { %v1614_v12 = vsel %vm3521_vm6, %v1612_v49, %v1613_v6 }
  0xba   : > { %v2641_v61 = vcombine.high %v1611_v28, %v1614_v12  ;;  %v2640_v23 = vcombine.low %v1611_v28, %v1614_v12 }
  0xbf   : > { %1455 = vmatmul.mubr.bf16.gmra.mrb[64].mxu1 %v2536_v46  ;;  %2004 = vmatmul.mubr.bf16.gmra.mrb[64].mxu0 %v4285_v50 }
  0xc0   : > { %2573 = vmatprep.mubr.msk.bf16.mxu1 %vm884_vm3, %v2539_v2  ;;  %2673 = vmatprep.mubr.msk.bf16.mxu0 %vm884_vm3, %v2639_v14 }
  0xc7   : > { %1463 = vmatmul.mubr.bf16.gmra.mrb[68].mxu1 %v2538_v15  ;;  %2012 = vmatmul.mubr.bf16.gmra.mrb[68].mxu0 %v2638_v42 }
  0xc8   : > { %2574 = vmatprep.mubr.msk.bf16.mxu1 %vm884_vm3, %v2541_v16  ;;  %2674 = vmatprep.mubr.msk.bf16.mxu0 %vm884_vm3, %v2641_v61 }
  0xcf   : > { %1471 = vmatmul.mubr.bf16.gmra.mrb[72].mxu1 %v2540_v41  ;;  %2020 = vmatmul.mubr.bf16.gmra.mrb[72].mxu0 %v2640_v23 }
  0xd0   : > { %2575 = vmatprep.mubr.msk.bf16.mxu1 %vm884_vm3, %v2543_v40  ;;  %2675 = vmatprep.mubr.msk.bf16.mxu0 %vm884_vm3, %v2643_v22 }
  0xd7   : > { %1479 = vmatmul.mubr.bf16.gmra.mrb[76].mxu1 %v2542_v4  ;;  %2028 = vmatmul.mubr.bf16.gmra.mrb[76].mxu0 %v2642_v11 }
  0xd8   : > { %2576 = vmatprep.mubr.msk.bf16.mxu1 %vm884_vm3, %v4286_v1  ;;  %2676 = vmatprep.mubr.msk.bf16.mxu0 %vm884_vm3, %v4287_v35 }
  0xdf   : > { %1487 = vmatmul.mubr.bf16.gmra.mrb[80].mxu1 %v4288_v48  ;;  %2036 = vmatmul.mubr.bf16.gmra.mrb[80].mxu0 %v4289_v13 }
  0xe0   : > { %2577 = vmatprep.mubr.msk.bf16.mxu1 %vm884_vm3, %v4290_v21  ;;  %2677 = vmatprep.mubr.msk.bf16.mxu0 %vm884_vm3, %v2647_v57 }
  0xe7   : > { %1495 = vmatmul.mubr.bf16.gmra.mrb[84].mxu1 %v4291_v31  ;;  %2044 = vmatmul.mubr.bf16.gmra.mrb[84].mxu0 %v2646_v25 }
  0xe8   : > { %2578 = vmatprep.mubr.msk.bf16.mxu1 %vm884_vm3, %v4292_v44  ;;  %2678 = vmatprep.mubr.msk.bf16.mxu0 %vm884_vm3, %v2649_v37 }
  0xef   : > { %1503 = vmatmul.mubr.bf16.gmra.mrb[88].mxu1 %v2548_v0  ;;  %2052 = vmatmul.mubr.bf16.gmra.mrb[88].mxu0 %v2648_v3 }
  0xf0   : > { %2579 = vmatprep.mubr.msk.bf16.mxu1 %vm884_vm3, %v4293_v59  ;;  %2679 = vmatprep.mubr.msk.bf16.mxu0 %vm884_vm3, %v2651_v9 }
  0xf7   : > { %1511 = vmatmul.mubr.bf16.gmra.mrb[92].mxu1 %v2550_v29  ;;  %2060 = vmatmul.mubr.bf16.gmra.mrb[92].mxu0 %v2650_v52 }
 0x112   : > { %v4013_v37 = vpop.f32.mrb[0].mxu0  ;;  %v4015_v36 = vpop.f32.mrb[0].mxu1 }
 0x113   : > { %v969_v30 = vpop.f32.mrb[1].mxu0  ;;  %v1033_v20 = vpop.f32.mrb[1].mxu1 }
 0x114   : > { %v4017_v38 = vpop.f32.mrb[2].mxu0  ;;  %v4019_v33 = vpop.f32.mrb[2].mxu1 }
 0x115   : > { %v972_v27 = vpop.f32.mrb[3].mxu0  ;;  %v1036_v7 = vpop.f32.mrb[3].mxu1 }
 0x11a   : > { %v4021_v0 = vpop.f32.mrb[4].mxu0  ;;  %v4023_v17 = vpop.f32.mrb[4].mxu1 }
 0x11b   : > { %v977_v47 = vpop.f32.mrb[5].mxu0  ;;  %v1041_v60 = vpop.f32.mrb[5].mxu1 }
 0x11c   : > { %v4025_v57 = vpop.f32.mrb[6].mxu0  ;;  %v4027_v25 = vpop.f32.mrb[6].mxu1  ;;  %v4081_v60 = vld [vmem:[%s4227_s2] ss:$0 sm:$0xff] }
 0x11d   : > { %v980_v63 = vpop.f32.mrb[7].mxu0  ;;  %v1044_v34 = vpop.f32.mrb[7].mxu1 }
 0x122   : > { %v4029_v29 = vpop.f32.mrb[8].mxu0  ;;  %v4031_v18 = vpop.f32.mrb[8].mxu1 }
 0x123   : > { %v985_v3 = vpop.f32.mrb[9].mxu0  ;;  %v1049_v5 = vpop.f32.mrb[9].mxu1 }
 0x124   : > { %v4033_v9 = vpop.f32.mrb[10].mxu0  ;;  %v4035_v52 = vpop.f32.mrb[10].mxu1 }
 0x125   : > { %v988_v45 = vpop.f32.mrb[11].mxu0  ;;  %v1052_v53 = vpop.f32.mrb[11].mxu1 }
 0x12a   : > { %v4037_v26 = vpop.f32.mrb[12].mxu0  ;;  %v4039_v56 = vpop.f32.mrb[12].mxu1 }
 0x12b   : > { %v993_v46 = vpop.f32.mrb[13].mxu0  ;;  %v1057_v2 = vpop.f32.mrb[13].mxu1 }
 0x12c   : > { %v4041_v14 = vpop.f32.mrb[14].mxu0  ;;  %v4043_v19 = vpop.f32.mrb[14].mxu1 }
 0x12d   : > { %v996_v51 = vpop.f32.mrb[15].mxu0  ;;  %v1060_v49 = vpop.f32.mrb[15].mxu1 }
 0x132   : > { %v4045_v58 = vpop.f32.mrb[16].mxu0  ;;  %v4047_v6 = vpop.f32.mrb[16].mxu1 }
 0x133   : > { %v1001_v50 = vpop.f32.mrb[17].mxu0  ;;  %v1065_v28 = vpop.f32.mrb[17].mxu1 }
 0x134   : > { %v4049_v12 = vpop.f32.mrb[18].mxu0  ;;  %v4051_v55 = vpop.f32.mrb[18].mxu1 }
 0x135   : > { %v1004_v10 = vpop.f32.mrb[19].mxu0  ;;  %v1068_v15 = vpop.f32.mrb[19].mxu1 }
 0x13a   : > { %v4053_v42 = vpop.f32.mrb[20].mxu0  ;;  %v4055_v16 = vpop.f32.mrb[20].mxu1 }
 0x13b   : > { %v1009_v61 = vpop.f32.mrb[21].mxu0  ;;  %v1073_v8 = vpop.f32.mrb[21].mxu1 }
 0x13c   : > { %v4057_v39 = vpop.f32.mrb[22].mxu0  ;;  %v4059_v24 = vpop.f32.mrb[22].mxu1 }
 0x13d   : > { %v1012_v43 = vpop.f32.mrb[23].mxu0  ;;  %v1076_v54 = vpop.f32.mrb[23].mxu1 }
 0x142   : > { %v4061_v62 = vpop.f32.mrb[24].mxu0  ;;  %v4063_v32 = vpop.f32.mrb[24].mxu1 }
 0x143   : > { %v1017_v41 = vpop.f32.mrb[25].mxu0  ;;  %v1081_v23 = vpop.f32.mrb[25].mxu1 }
 0x144   : > { %v4065_v40 = vpop.f32.mrb[26].mxu0  ;;  %v4067_v22 = vpop.f32.mrb[26].mxu1 }
 0x145   : > { %v1020_v4 = vpop.f32.mrb[27].mxu0  ;;  %v1084_v11 = vpop.f32.mrb[27].mxu1 }
 0x14a   : > { %v4069_v1 = vpop.f32.mrb[28].mxu0  ;;  %v4071_v35 = vpop.f32.mrb[28].mxu1 }
 0x14b   : > { %v1025_v48 = vpop.f32.mrb[29].mxu0  ;;  %v1089_v13 = vpop.f32.mrb[29].mxu1 }
 0x14c   : > { %v4073_v21 = vpop.f32.mrb[30].mxu0  ;;  %v4075_v31 = vpop.f32.mrb[30].mxu1 }
 0x14d   : > { %v1028_v44 = vpop.f32.mrb[31].mxu0  ;;  %v1092_v59 = vpop.f32.mrb[31].mxu1 }
 0x152   : > { %v1392_v30 = vpop.f32.mrb[32].mxu1  ;;  %v1941_v20 = vpop.f32.mrb[32].mxu0 }
 0x153   : > { %v1393_v27 = vadd.f32 %v1392_v30, %v4013_v37  ;;  %v1394_v7 = vpop.f32.mrb[33].mxu1  ;;  %v1943_v47 = vpop.f32.mrb[33].mxu0 }
 0x154   : > { %v1395_v63 = vpop.f32.mrb[34].mxu1  ;;  %v1944_v34 = vpop.f32.mrb[34].mxu0 }
 0x155   : > { %v2068_v3 = vadd.f32 %v1941_v20, %v1393_v27  ;;  %v1396_v5 = vadd.f32 %v1395_v63, %v4017_v38  ;;  %v1397_v45 = vpop.f32.mrb[35].mxu1  ;;  %v1946_v53 = vpop.f32.mrb[35].mxu0 }
 0x157   : > { %v2107_v46 = vadd.f32 %v4081_v60, %v2068_v3  ;;  %v2069_v2 = vadd.f32 %v1944_v34, %v1396_v5 }
 0x159   : > { %v2139_v51 = vmax.f32 %v2107_v46, 0.0  ;;  %v2108_v37 = vadd.f32 %v4081_v60, %v2069_v2 }
 0x15a   : > { %v1400_v49 = vpop.f32.mrb[36].mxu1  ;;  %v1949_v50 = vpop.f32.mrb[36].mxu0 }
 0x15b   : > { %v2716_v38 = vpack.c.bf16 %v2139_v51, %v2139_v51  ;;  %v2140_v28 = vmax.f32 %v2108_v37, 0.0  ;;  %v1401_v10 = vadd.f32 %v1400_v49, %v4021_v0  ;;  %v1402_v15 = vpop.f32.mrb[37].mxu1  ;;  %v1951_v61 = vpop.f32.mrb[37].mxu0 }
 0x15c   : > { %v1403_v8 = vpop.f32.mrb[38].mxu1  ;;  %v1952_v43 = vpop.f32.mrb[38].mxu0 }
 0x15d   : > { %2300 = vst.msk [vmem:[%s4090_s30] sm:$0xf] %vm2299_vm7, %v2716_v38  ;;  %v2717_v54 = vpack.c.bf16 %v2140_v28, %v2140_v28  ;;  %v2070_v41 = vadd.f32 %v1949_v50, %v1401_v10  ;;  %v1404_v23 = vadd.f32 %v1403_v8, %v4025_v57  ;;  %v1405_v4 = vpop.f32.mrb[39].mxu1  ;;  %v1954_v11 = vpop.f32.mrb[39].mxu0 }
 0x15f   : > { %2301 = vst.msk [vmem:[%s4090_s30 + $0x4] sm:$0xf] %vm2299_vm7, %v2717_v54  ;;  %v2109_v48 = vadd.f32 %v4081_v60, %v2070_v41  ;;  %v2071_v13 = vadd.f32 %v1952_v43, %v1404_v23 }
 0x161   : > { %v2141_v44 = vmax.f32 %v2109_v48, 0.0  ;;  %v2110_v0 = vadd.f32 %v4081_v60, %v2071_v13 }
 0x162   : > { %v1408_v59 = vpop.f32.mrb[40].mxu1  ;;  %v1957_v30 = vpop.f32.mrb[40].mxu0 }
 0x163   : > { %v2718_v20 = vpack.c.bf16 %v2141_v44, %v2141_v44  ;;  %v2142_v27 = vmax.f32 %v2110_v0, 0.0  ;;  %v1409_v7 = vadd.f32 %v1408_v59, %v4029_v29  ;;  %v1410_v47 = vpop.f32.mrb[41].mxu1  ;;  %v1959_v57 = vpop.f32.mrb[41].mxu0 }
 0x164   : > { %v1411_v63 = vpop.f32.mrb[42].mxu1  ;;  %v1960_v34 = vpop.f32.mrb[42].mxu0 }
 0x165   : > { %2302 = vst.msk [vmem:[%s4090_s30 + $0x8] sm:$0xf] %vm2299_vm7, %v2718_v20  ;;  %v2719_v3 = vpack.c.bf16 %v2142_v27, %v2142_v27  ;;  %v2072_v5 = vadd.f32 %v1957_v30, %v1409_v7  ;;  %v1412_v45 = vadd.f32 %v1411_v63, %v4033_v9  ;;  %v1413_v53 = vpop.f32.mrb[43].mxu1  ;;  %v1962_v46 = vpop.f32.mrb[43].mxu0 }
 0x167   : > { %2303 = vst.msk [vmem:[%s4090_s30 + $0xc] sm:$0xf] %vm2299_vm7, %v2719_v3  ;;  %v2111_v2 = vadd.f32 %v4081_v60, %v2072_v5  ;;  %v2073_v51 = vadd.f32 %v1960_v34, %v1412_v45 }
 0x169   : > { %v2143_v37 = vmax.f32 %v2111_v2, 0.0  ;;  %v2112_v29 = vadd.f32 %v4081_v60, %v2073_v51 }
 0x16a   : > { %v1416_v49 = vpop.f32.mrb[44].mxu1  ;;  %v1965_v50 = vpop.f32.mrb[44].mxu0 }
 0x16b   : > { %v2720_v38 = vpack.c.bf16 %v2143_v37, %v2143_v37  ;;  %v2144_v28 = vmax.f32 %v2112_v29, 0.0  ;;  %v1417_v10 = vadd.f32 %v1416_v49, %v4037_v26  ;;  %v1418_v15 = vpop.f32.mrb[45].mxu1  ;;  %v1967_v9 = vpop.f32.mrb[45].mxu0 }
 0x16c   : > { %v1419_v61 = vpop.f32.mrb[46].mxu1  ;;  %v1968_v8 = vpop.f32.mrb[46].mxu0 }
 0x16d   : > { %2304 = vst.msk [vmem:[%s4090_s30 + $0x10] sm:$0xf] %vm2299_vm7, %v2720_v38  ;;  %v2721_v43 = vpack.c.bf16 %v2144_v28, %v2144_v28  ;;  %v2074_v54 = vadd.f32 %v1965_v50, %v1417_v10  ;;  %v1420_v41 = vadd.f32 %v1419_v61, %v4041_v14  ;;  %v1421_v23 = vpop.f32.mrb[47].mxu1  ;;  %v1970_v4 = vpop.f32.mrb[47].mxu0 }
 0x16f   : > { %2305 = vst.msk [vmem:[%s4090_s30 + $0x14] sm:$0xf] %vm2299_vm7, %v2721_v43  ;;  %v2113_v11 = vadd.f32 %v4081_v60, %v2074_v54  ;;  %v2075_v48 = vadd.f32 %v1968_v8, %v1420_v41 }
 0x171   : > { %v2145_v13 = vmax.f32 %v2113_v11, 0.0  ;;  %v2114_v26 = vadd.f32 %v4081_v60, %v2075_v48 }
 0x172   : > { %v1424_v44 = vpop.f32.mrb[48].mxu1  ;;  %v1973_v0 = vpop.f32.mrb[48].mxu0 }
 0x173   : > { %v2722_v59 = vpack.c.bf16 %v2145_v13, %v2145_v13  ;;  %v2146_v30 = vmax.f32 %v2114_v26, 0.0  ;;  %v1425_v20 = vadd.f32 %v1424_v44, %v4045_v58  ;;  %v1426_v27 = vpop.f32.mrb[49].mxu1  ;;  %v1975_v14 = vpop.f32.mrb[49].mxu0 }
 0x174   : > { %v1427_v7 = vpop.f32.mrb[50].mxu1  ;;  %v1976_v47 = vpop.f32.mrb[50].mxu0 }
 0x175   : > { %2306 = vst.msk [vmem:[%s4090_s30 + $0x18] sm:$0xf] %vm2299_vm7, %v2722_v59  ;;  %v2723_v57 = vpack.c.bf16 %v2146_v30, %v2146_v30  ;;  %v2076_v63 = vadd.f32 %v1973_v0, %v1425_v20  ;;  %v1428_v34 = vadd.f32 %v1427_v7, %v4049_v12  ;;  %v1429_v3 = vpop.f32.mrb[51].mxu1  ;;  %v1978_v5 = vpop.f32.mrb[51].mxu0 }
 0x177   : > { %2307 = vst.msk [vmem:[%s4090_s30 + $0x1c] sm:$0xf] %vm2299_vm7, %v2723_v57  ;;  %v2115_v45 = vadd.f32 %v4081_v60, %v2076_v63  ;;  %v2077_v53 = vadd.f32 %v1976_v47, %v1428_v34 }
 0x179   : > { %v2147_v46 = vmax.f32 %v2115_v45, 0.0  ;;  %v2116_v58 = vadd.f32 %v4081_v60, %v2077_v53 }
 0x17a   : > { %v1432_v2 = vpop.f32.mrb[52].mxu1  ;;  %v1981_v51 = vpop.f32.mrb[52].mxu0 }
 0x17b   : > { %v2724_v37 = vpack.c.bf16 %v2147_v46, %v2147_v46  ;;  %v2148_v29 = vmax.f32 %v2116_v58, 0.0  ;;  %v1433_v49 = vadd.f32 %v1432_v2, %v4053_v42  ;;  %v1434_v50 = vpop.f32.mrb[53].mxu1  ;;  %v1983_v12 = vpop.f32.mrb[53].mxu0 }
 0x17c   : > { %v1435_v38 = vpop.f32.mrb[54].mxu1  ;;  %v1984_v28 = vpop.f32.mrb[54].mxu0 }
 0x17d   : > { %2308 = vst.msk [vmem:[%s4090_s30 + $0x20] sm:$0xf] %vm2299_vm7, %v2724_v37  ;;  %v2725_v10 = vpack.c.bf16 %v2148_v29, %v2148_v29  ;;  %v2078_v15 = vadd.f32 %v1981_v51, %v1433_v49  ;;  %v1436_v9 = vadd.f32 %v1435_v38, %v4057_v39  ;;  %v1437_v61 = vpop.f32.mrb[55].mxu1  ;;  %v1986_v8 = vpop.f32.mrb[55].mxu0 }
 0x17f   : > { %2309 = vst.msk [vmem:[%s4090_s30 + $0x24] sm:$0xf] %vm2299_vm7, %v2725_v10  ;;  %v2117_v43 = vadd.f32 %v4081_v60, %v2078_v15  ;;  %v2079_v54 = vadd.f32 %v1984_v28, %v1436_v9 }
 0x181   : > { %v2149_v41 = vmax.f32 %v2117_v43, 0.0  ;;  %v2118_v42 = vadd.f32 %v4081_v60, %v2079_v54 }
 0x182   : > { %v1440_v23 = vpop.f32.mrb[56].mxu1  ;;  %v1989_v4 = vpop.f32.mrb[56].mxu0 }
 0x183   : > { %v2726_v11 = vpack.c.bf16 %v2149_v41, %v2149_v41  ;;  %v2150_v48 = vmax.f32 %v2118_v42, 0.0  ;;  %v1441_v13 = vadd.f32 %v1440_v23, %v4061_v62  ;;  %v1442_v26 = vpop.f32.mrb[57].mxu1  ;;  %v1991_v39 = vpop.f32.mrb[57].mxu0 }
 0x184   : > { %v1443_v44 = vpop.f32.mrb[58].mxu1  ;;  %v1992_v0 = vpop.f32.mrb[58].mxu0 }
 0x185   : > { %2310 = vst.msk [vmem:[%s4090_s30 + $0x28] sm:$0xf] %vm2299_vm7, %v2726_v11  ;;  %v2727_v59 = vpack.c.bf16 %v2150_v48, %v2150_v48  ;;  %v2080_v30 = vadd.f32 %v1989_v4, %v1441_v13  ;;  %v1444_v20 = vadd.f32 %v1443_v44, %v4065_v40  ;;  %v1445_v27 = vpop.f32.mrb[59].mxu1  ;;  %v1994_v14 = vpop.f32.mrb[59].mxu0 }
 0x187   : > { %2311 = vst.msk [vmem:[%s4090_s30 + $0x2c] sm:$0xf] %vm2299_vm7, %v2727_v59  ;;  %v2119_v7 = vadd.f32 %v4081_v60, %v2080_v30  ;;  %v2081_v47 = vadd.f32 %v1992_v0, %v1444_v20 }
 0x189   : > { %v2151_v57 = vmax.f32 %v2119_v7, 0.0  ;;  %v2120_v62 = vadd.f32 %v4081_v60, %v2081_v47 }
 0x18a   : > { %v1448_v63 = vpop.f32.mrb[60].mxu1  ;;  %v1997_v34 = vpop.f32.mrb[60].mxu0 }
 0x18b   : > { %v2728_v3 = vpack.c.bf16 %v2151_v57, %v2151_v57  ;;  %v2152_v5 = vmax.f32 %v2120_v62, 0.0  ;;  %v1449_v45 = vadd.f32 %v1448_v63, %v4069_v1  ;;  %v1450_v53 = vpop.f32.mrb[61].mxu1  ;;  %v1999_v40 = vpop.f32.mrb[61].mxu0 }
 0x18c   : > { %v1451_v46 = vpop.f32.mrb[62].mxu1  ;;  %v2000_v58 = vpop.f32.mrb[62].mxu0 }
 0x18d   : > { %2312 = vst.msk [vmem:[%s4090_s30 + $0x30] sm:$0xf] %vm2299_vm7, %v2728_v3  ;;  %v2729_v2 = vpack.c.bf16 %v2152_v5, %v2152_v5  ;;  %v2082_v51 = vadd.f32 %v1997_v34, %v1449_v45  ;;  %v1452_v37 = vadd.f32 %v1451_v46, %v4073_v21  ;;  %v1453_v29 = vpop.f32.mrb[63].mxu1  ;;  %v2002_v49 = vpop.f32.mrb[63].mxu0 }
 0x18f   : > { %2313 = vst.msk [vmem:[%s4090_s30 + $0x34] sm:$0xf] %vm2299_vm7, %v2729_v2  ;;  %v2121_v50 = vadd.f32 %v4081_v60, %v2082_v51  ;;  %v2083_v12 = vadd.f32 %v2000_v58, %v1452_v37 }
 0x191   : > { %v2153_v38 = vmax.f32 %v2121_v50, 0.0  ;;  %v2122_v1 = vadd.f32 %v4081_v60, %v2083_v12 }
 0x192   : > { %v1456_v28 = vpop.f32.mrb[64].mxu1  ;;  %v2005_v10 = vpop.f32.mrb[64].mxu0 }
 0x193   : > { %v2730_v15 = vpack.c.bf16 %v2153_v38, %v2153_v38  ;;  %v2154_v9 = vmax.f32 %v2122_v1, 0.0  ;;  %v1457_v61 = vadd.f32 %v1456_v28, %v4015_v36  ;;  %v1458_v8 = vpop.f32.mrb[65].mxu1  ;;  %v2007_v21 = vpop.f32.mrb[65].mxu0 }
 0x194   : > { %v1459_v43 = vpop.f32.mrb[66].mxu1  ;;  %v2008_v54 = vpop.f32.mrb[66].mxu0 }
 0x195   : > { %2314 = vst.msk [vmem:[%s4090_s30 + $0x38] sm:$0xf] %vm2299_vm7, %v2730_v15  ;;  %v2731_v41 = vpack.c.bf16 %v2154_v9, %v2154_v9  ;;  %v2084_v42 = vadd.f32 %v2005_v10, %v1457_v61  ;;  %v1460_v23 = vadd.f32 %v1459_v43, %v4019_v33  ;;  %v1461_v4 = vpop.f32.mrb[67].mxu1  ;;  %v2010_v11 = vpop.f32.mrb[67].mxu0 }
 0x197   : > { %2315 = vst.msk [vmem:[%s4090_s30 + $0x3c] sm:$0xf] %vm2299_vm7, %v2731_v41  ;;  %v2123_v48 = vadd.f32 %v4081_v60, %v2084_v42  ;;  %v2085_v13 = vadd.f32 %v2008_v54, %v1460_v23 }
 0x199   : > { %v2155_v26 = vmax.f32 %v2123_v48, 0.0  ;;  %v2124_v36 = vadd.f32 %v4081_v60, %v2085_v13 }
 0x19a   : > { %v1464_v39 = vpop.f32.mrb[68].mxu1  ;;  %v2013_v44 = vpop.f32.mrb[68].mxu0 }
 0x19b   : > { %v2732_v0 = vpack.c.bf16 %v2155_v26, %v2155_v26  ;;  %v2156_v59 = vmax.f32 %v2124_v36, 0.0  ;;  %v1465_v30 = vadd.f32 %v1464_v39, %v4023_v17  ;;  %v1466_v20 = vpop.f32.mrb[69].mxu1  ;;  %v2015_v33 = vpop.f32.mrb[69].mxu0 }
 0x19c   : > { %v1467_v27 = vpop.f32.mrb[70].mxu1  ;;  %v2016_v14 = vpop.f32.mrb[70].mxu0 }
 0x19d   : > { %2316 = vst.msk [vmem:[%s4090_s30 + $0x40] sm:$0xf] %vm2299_vm7, %v2732_v0  ;;  %v2733_v7 = vpack.c.bf16 %v2156_v59, %v2156_v59  ;;  %v2086_v47 = vadd.f32 %v2013_v44, %v1465_v30  ;;  %v1468_v57 = vadd.f32 %v1467_v27, %v4027_v25  ;;  %v1469_v62 = vpop.f32.mrb[71].mxu1  ;;  %v2018_v63 = vpop.f32.mrb[71].mxu0 }
 0x19f   : > { %2317 = vst.msk [vmem:[%s4090_s30 + $0x44] sm:$0xf] %vm2299_vm7, %v2733_v7  ;;  %v2125_v34 = vadd.f32 %v4081_v60, %v2086_v47  ;;  %v2087_v3 = vadd.f32 %v2016_v14, %v1468_v57 }
 0x1a1   : > { %v2157_v5 = vmax.f32 %v2125_v34, 0.0  ;;  %v2126_v17 = vadd.f32 %v4081_v60, %v2087_v3 }
 0x1a2   : > { %v1472_v45 = vpop.f32.mrb[72].mxu1  ;;  %v2021_v53 = vpop.f32.mrb[72].mxu0 }
 0x1a3   : > { %v2734_v40 = vpack.c.bf16 %v2157_v5, %v2157_v5  ;;  %v2158_v46 = vmax.f32 %v2126_v17, 0.0  ;;  %v1473_v58 = vadd.f32 %v1472_v45, %v4031_v18  ;;  %v1474_v2 = vpop.f32.mrb[73].mxu1  ;;  %v2023_v25 = vpop.f32.mrb[73].mxu0 }
 0x1a4   : > { %v1475_v51 = vpop.f32.mrb[74].mxu1  ;;  %v2024_v37 = vpop.f32.mrb[74].mxu0 }
 0x1a5   : > { %2318 = vst.msk [vmem:[%s4090_s30 + $0x48] sm:$0xf] %vm2299_vm7, %v2734_v40  ;;  %v2735_v29 = vpack.c.bf16 %v2158_v46, %v2158_v46  ;;  %v2088_v49 = vadd.f32 %v2021_v53, %v1473_v58  ;;  %v1476_v50 = vadd.f32 %v1475_v51, %v4035_v52  ;;  %v1477_v12 = vpop.f32.mrb[75].mxu1  ;;  %v2026_v38 = vpop.f32.mrb[75].mxu0 }
 0x1a7   : > { %2319 = vst.msk [vmem:[%s4090_s30 + $0x4c] sm:$0xf] %vm2299_vm7, %v2735_v29  ;;  %v2127_v1 = vadd.f32 %v4081_v60, %v2088_v49  ;;  %v2089_v28 = vadd.f32 %v2024_v37, %v1476_v50 }
 0x1a9   : > { %v2159_v10 = vmax.f32 %v2127_v1, 0.0  ;;  %v2128_v18 = vadd.f32 %v4081_v60, %v2089_v28 }
 0x1aa   : > { %v1480_v15 = vpop.f32.mrb[76].mxu1  ;;  %v2029_v9 = vpop.f32.mrb[76].mxu0 }
 0x1ab   : > { %v2736_v61 = vpack.c.bf16 %v2159_v10, %v2159_v10  ;;  %v2160_v8 = vmax.f32 %v2128_v18, 0.0  ;;  %v1481_v21 = vadd.f32 %v1480_v15, %v4039_v56  ;;  %v1482_v43 = vpop.f32.mrb[77].mxu1  ;;  %v2031_v52 = vpop.f32.mrb[77].mxu0 }
 0x1ac   : > { %v1483_v54 = vpop.f32.mrb[78].mxu1  ;;  %v2032_v41 = vpop.f32.mrb[78].mxu0 }
 0x1ad   : > { %2320 = vst.msk [vmem:[%s4090_s30 + $0x50] sm:$0xf] %vm2299_vm7, %v2736_v61  ;;  %v2737_v42 = vpack.c.bf16 %v2160_v8, %v2160_v8  ;;  %v2090_v23 = vadd.f32 %v2029_v9, %v1481_v21  ;;  %v1484_v4 = vadd.f32 %v1483_v54, %v4043_v19  ;;  %v1485_v11 = vpop.f32.mrb[79].mxu1  ;;  %v2034_v48 = vpop.f32.mrb[79].mxu0 }
 0x1af   : > { %2321 = vst.msk [vmem:[%s4090_s30 + $0x54] sm:$0xf] %vm2299_vm7, %v2737_v42  ;;  %v2129_v13 = vadd.f32 %v4081_v60, %v2090_v23  ;;  %v2091_v26 = vadd.f32 %v2032_v41, %v1484_v4 }
 0x1b1   : > { %v2161_v36 = vmax.f32 %v2129_v13, 0.0  ;;  %v2130_v56 = vadd.f32 %v4081_v60, %v2091_v26 }
 0x1b2   : > { %v1488_v39 = vpop.f32.mrb[80].mxu1  ;;  %v2037_v44 = vpop.f32.mrb[80].mxu0 }
 0x1b3   : > { %v2738_v0 = vpack.c.bf16 %v2161_v36, %v2161_v36  ;;  %v2162_v59 = vmax.f32 %v2130_v56, 0.0  ;;  %v1489_v30 = vadd.f32 %v1488_v39, %v4047_v6  ;;  %v1490_v20 = vpop.f32.mrb[81].mxu1  ;;  %v2039_v19 = vpop.f32.mrb[81].mxu0 }
 0x1b4   : > { %v1491_v33 = vpop.f32.mrb[82].mxu1  ;;  %v2040_v27 = vpop.f32.mrb[82].mxu0 }
 0x1b5   : > { %2322 = vst.msk [vmem:[%s4090_s30 + $0x58] sm:$0xf] %vm2299_vm7, %v2738_v0  ;;  %v2739_v14 = vpack.c.bf16 %v2162_v59, %v2162_v59  ;;  %v2092_v7 = vadd.f32 %v2037_v44, %v1489_v30  ;;  %v1492_v47 = vadd.f32 %v1491_v33, %v4051_v55  ;;  %v1493_v57 = vpop.f32.mrb[83].mxu1  ;;  %v2042_v62 = vpop.f32.mrb[83].mxu0 }
 0x1b7   : > { %2323 = vst.msk [vmem:[%s4090_s30 + $0x5c] sm:$0xf] %vm2299_vm7, %v2739_v14  ;;  %v2131_v63 = vadd.f32 %v4081_v60, %v2092_v7  ;;  %v2093_v34 = vadd.f32 %v2040_v27, %v1492_v47 }
 0x1b9   : > { %v2163_v3 = vmax.f32 %v2131_v63, 0.0  ;;  %v2132_v6 = vadd.f32 %v4081_v60, %v2093_v34 }
 0x1ba   : > { %v1496_v5 = vpop.f32.mrb[84].mxu1  ;;  %v2045_v17 = vpop.f32.mrb[84].mxu0 }
 0x1bb   : > { %v2740_v45 = vpack.c.bf16 %v2163_v3, %v2163_v3  ;;  %v2164_v53 = vmax.f32 %v2132_v6, 0.0  ;;  %v1497_v40 = vadd.f32 %v1496_v5, %v4055_v16  ;;  %v1498_v46 = vpop.f32.mrb[85].mxu1  ;;  %v2047_v55 = vpop.f32.mrb[85].mxu0 }
 0x1bc   : > { %v1499_v58 = vpop.f32.mrb[86].mxu1  ;;  %v2048_v2 = vpop.f32.mrb[86].mxu0 }
 0x1bd   : > { %2324 = vst.msk [vmem:[%s4090_s30 + $0x60] sm:$0xf] %vm2299_vm7, %v2740_v45  ;;  %v2741_v25 = vpack.c.bf16 %v2164_v53, %v2164_v53  ;;  %v2094_v51 = vadd.f32 %v2045_v17, %v1497_v40  ;;  %v1500_v37 = vadd.f32 %v1499_v58, %v4059_v24  ;;  %v1501_v29 = vpop.f32.mrb[87].mxu1  ;;  %v2050_v49 = vpop.f32.mrb[87].mxu0 }
 0x1bf   : > { %2325 = vst.msk [vmem:[%s4090_s30 + $0x64] sm:$0xf] %vm2299_vm7, %v2741_v25  ;;  %v2133_v50 = vadd.f32 %v4081_v60, %v2094_v51  ;;  %v2095_v12 = vadd.f32 %v2048_v2, %v1500_v37 }
 0x1c1   : > { %v2165_v38 = vmax.f32 %v2133_v50, 0.0  ;;  %v2134_v16 = vadd.f32 %v4081_v60, %v2095_v12 }
 0x1c2   : > { %v1504_v1 = vpop.f32.mrb[88].mxu1  ;;  %v2053_v28 = vpop.f32.mrb[88].mxu0 }
 0x1c3   : > { %v2742_v10 = vpack.c.bf16 %v2165_v38, %v2165_v38  ;;  %v2166_v18 = vmax.f32 %v2134_v16, 0.0  ;;  %v1505_v15 = vadd.f32 %v1504_v1, %v4063_v32  ;;  %v1506_v9 = vpop.f32.mrb[89].mxu1  ;;  %v2055_v24 = vpop.f32.mrb[89].mxu0 }
 0x1c4   : > { %v1507_v61 = vpop.f32.mrb[90].mxu1  ;;  %v2056_v8 = vpop.f32.mrb[90].mxu0 }
 0x1c5   : > { %2326 = vst.msk [vmem:[%s4090_s30 + $0x68] sm:$0xf] %vm2299_vm7, %v2742_v10  ;;  %v2743_v21 = vpack.c.bf16 %v2166_v18, %v2166_v18  ;;  %v2096_v43 = vadd.f32 %v2053_v28, %v1505_v15  ;;  %v1508_v52 = vadd.f32 %v1507_v61, %v4067_v22  ;;  %v1509_v54 = vpop.f32.mrb[91].mxu1  ;;  %v2058_v41 = vpop.f32.mrb[91].mxu0 }
 0x1c7   : > { %2327 = vst.msk [vmem:[%s4090_s30 + $0x6c] sm:$0xf] %vm2299_vm7, %v2743_v21  ;;  %v2135_v42 = vadd.f32 %v4081_v60, %v2096_v43  ;;  %v2097_v23 = vadd.f32 %v2056_v8, %v1508_v52 }
 0x1c9   : > { %v2167_v4 = vmax.f32 %v2135_v42, 0.0  ;;  %v2136_v32 = vadd.f32 %v4081_v60, %v2097_v23 }
 0x1ca   : > { %v1512_v11 = vpop.f32.mrb[92].mxu1  ;;  %v2061_v48 = vpop.f32.mrb[92].mxu0 }
 0x1cb   : > { %v2744_v13 = vpack.c.bf16 %v2167_v4, %v2167_v4  ;;  %v2168_v26 = vmax.f32 %v2136_v32, 0.0  ;;  %v1513_v36 = vadd.f32 %v1512_v11, %v4071_v35  ;;  %v1514_v56 = vpop.f32.mrb[93].mxu1  ;;  %v2063_v22 = vpop.f32.mrb[93].mxu0 }
 0x1cc   : > { %v1515_v39 = vpop.f32.mrb[94].mxu1  ;;  %v2064_v44 = vpop.f32.mrb[94].mxu0 }
 0x1cd   : > { %2328 = vst.msk [vmem:[%s4090_s30 + $0x70] sm:$0xf] %vm2299_vm7, %v2744_v13  ;;  %v2745_v0 = vpack.c.bf16 %v2168_v26, %v2168_v26  ;;  %v2098_v59 = vadd.f32 %v2061_v48, %v1513_v36  ;;  %v1516_v30 = vadd.f32 %v1515_v39, %v4075_v31  ;;  %v1517_v20 = vpop.f32.mrb[95].mxu1  ;;  %v2066_v19 = vpop.f32.mrb[95].mxu0 }
 0x1cf   : > { %2329 = vst.msk [vmem:[%s4090_s30 + $0x74] sm:$0xf] %vm2299_vm7, %v2745_v0  ;;  %v2137_v33 = vadd.f32 %v4081_v60, %v2098_v59  ;;  %v2099_v27 = vadd.f32 %v2064_v44, %v1516_v30 }
 0x1d1   : > { %v2169_v35 = vmax.f32 %v2137_v33, 0.0  ;;  %v2138_v14 = vadd.f32 %v4081_v60, %v2099_v27 }
 0x1d3   : > { %v2746_v7 = vpack.c.bf16 %v2169_v35, %v2169_v35  ;;  %v2170_v47 = vmax.f32 %v2138_v14, 0.0 }
 0x1d5   : > { %2330 = vst.msk [vmem:[%s4090_s30 + $0x78] sm:$0xf] %vm2299_vm7, %v2746_v7  ;;  %v2747_v57 = vpack.c.bf16 %v2170_v47, %v2170_v47 }
 0x1d7   : > { %2331 = vst.msk [vmem:[%s4090_s30 + $0x7c] sm:$0xf] %vm2299_vm7, %v2747_v57 }
 0x1d8 PF: > { %s13_s14 = sadd.s32 1, %s2904_s14   ;;  %s4294_s12 = smov %s2900_s13 }
 0x1d9   : > { %p10_p5 = scmp.ge.s32.totalorder %s13_s14, 4   ;;  %s4295_s13 = smov %s4297_s15 }
 0x1db   :  { %12 = sbr.rel (!%p10_p5) target bundleno = 2 (0x2), region = 64 }

// kernel: _lambda_.10
= control target key start
LH: loop header
LB: loop body
LE: loop exit
PB: predicated region body
PF: predicated region fallthrough
CT: control target
= control target key end

     0   :  { %s1442_s12 = smov 0   ;;  %s1444_s13 = smov 0   ;;  %s1809_s0 = inlined_call_operand.vmem [shape: bf16[2,8,10,192], index: 0, kind: input, shape index: {}]   ;;  %s1810_s1 = inlined_call_operand.vmem [shape: bf16[3,192,128], index: 1, kind: input, shape index: {}]   ;;  %s1811_s2 = inlined_call_operand.vmem [shape: f32[1,128], index: 2, kind: input, shape index: {}]   ;;  %s1812_s3 = inlined_call_operand.vmem [shape: bf16[2,8,8,128], index: 3, kind: output, shape index: {}]  }
   0x1   :  { %s1446_s14 = smov 0  }
   0x2 LB: > { %s25_s15 = sadd.s32 1, %s1415_s13  ;;  %p1143_p0 = scmp.ge.s32.totalorder %s1419_s14, 1  ;;  %s1419_s14 = sphi %s1446_s14, %s13_s14   ;;  %s1415_s13 = sphi %s1444_s13, %s1818_s13   ;;  %s1411_s12 = sphi %s1442_s12, %s1817_s12  }
   0x3   : > { %p27_p1 = scmp.ge.s32.totalorder %s25_s15, 2  ;;  %p159_p2 = scmp.lt.s32.totalorder %s1419_s14, 3 }
   0x5   : > { %s1820_s15 = smov (%p27_p1, %s25_s15), 0  ;;  %p160_p3 = pnand %p1143_p0, %p159_p2 }
   0x6   : > { %v1353_v0 = vld [vmem:[%s1810_s1 + $0x60] sm:$0xff] (!%p160_p3)   ;;  %v1421_v1 = vmov (!%p160_p3), 0   ;;  %v1355_v3 = vld [vmem:[%s1810_s1 + $0x68] sm:$0xff] (!%p160_p3)   ;;  %v1357_v5 = vld [vmem:[%s1810_s1 + $0x70] sm:$0xff] (!%p160_p3)   ;;  %p193_p4 = scmp.lt.s32.totalorder (!%p160_p3), %s1411_s12, 1  ;;  %vm494_vm0 = vcmask (!%p160_p3), 523264  }
   0x7   : > { %163 = sbr.rel (%p160_p3) target bundleno = 335 (0x14f), region = 32  ;;  %507 = vmatprep.subr.bf16.mxu0 (!%p160_p3), %v1421_v1  ;;  %692 = vmatprep.subr.bf16.mxu1 (!%p160_p3), %v1421_v1  ;;  %v1354_v2 = vld [vmem:[%s1810_s1] sm:$0xff] (!%p160_p3)   ;;  %v1356_v4 = vld [vmem:[%s1810_s1 + $0x8] sm:$0xff] (!%p160_p3)   ;;  %v1358_v6 = vld [vmem:[%s1810_s1 + $0x10] sm:$0xff] (!%p160_p3)   ;;  %vm254_vm1 = vsmask.f32 (!%p160_p3), 3328 }
   0x8   : > { %508 = vmatpush1.bf16.msra.mxu0 (!%p160_p3), %v1353_v0  ;;  %693 = vmatpush1.bf16.msra.mxu1 (!%p160_p3), %v1354_v2  ;;  %v1359_v7 = vld [vmem:[%s1810_s1 + $0x78] sm:$0xff] (!%p160_p3)   ;;  %v1361_v9 = vld [vmem:[%s1810_s1 + $0x80] sm:$0xff] (!%p160_p3)   ;;  %v1363_v11 = vld [vmem:[%s1810_s1 + $0x88] sm:$0xff] (!%p160_p3)   ;;  %vm255_vm2 = vsmask.f32 (!%p160_p3), 7440  ;;  %vm765_vm4 = vcmask (!%p160_p3), 1042432  }
   0x9   : > { %509 = vmatprep.subr.bf16.mxu0 (!%p160_p3), %v1421_v1  ;;  %694 = vmatprep.subr.bf16.mxu1 (!%p160_p3), %v1421_v1  ;;  %v1360_v8 = vld [vmem:[%s1810_s1 + $0x18] sm:$0xff] (!%p160_p3)   ;;  %v1362_v10 = vld [vmem:[%s1810_s1 + $0x20] sm:$0xff] (!%p160_p3)   ;;  %v1364_v12 = vld [vmem:[%s1810_s1 + $0x28] sm:$0xff] (!%p160_p3)   ;;  %vm766_vm5 = vcmask (!%p160_p3), 1046532  }
   0xa   : > { %v1365_v13 = vld [vmem:[%s1810_s1 + $0x90] sm:$0xff] (!%p160_p3)   ;;  %v1367_v15 = vld [vmem:[%s1810_s1 + $0x98] sm:$0xff] (!%p160_p3)   ;;  %v1369_v30 = vld [vmem:[%s1810_s1 + $0xa0] sm:$0xff] (!%p160_p3)  }
   0xb   : > { %v1366_v14 = vld [vmem:[%s1810_s1 + $0x30] sm:$0xff] (!%p160_p3)   ;;  %v1368_v19 = vld [vmem:[%s1810_s1 + $0x38] sm:$0xff] (!%p160_p3)   ;;  %vm1561_vm3 = vmor (!%p160_p3), %vm254_vm1, %vm255_vm2 }
   0xc   : > { %510 = vmatpush1.bf16.msra.mxu0 (!%p160_p3), %v1355_v3  ;;  %695 = vmatpush1.bf16.msra.mxu1 (!%p160_p3), %v1356_v4  ;;  %v1370_v38 = vld [vmem:[%s1810_s1 + $0x40] sm:$0xff] (!%p160_p3)   ;;  %v1371_v40 = vld [vmem:[%s1810_s1 + $0xa8] sm:$0xff] (!%p160_p3)   ;;  %v1373_v58 = vld [vmem:[%s1810_s1 + $0xb0] sm:$0xff] (!%p160_p3)  }
   0xd   : > { %511 = vmatprep.subr.bf16.mxu0 (!%p160_p3), %v1421_v1  ;;  %696 = vmatprep.subr.bf16.mxu1 (!%p160_p3), %v1421_v1  ;;  %v1372_v43 = vld [vmem:[%s1810_s1 + $0x48] sm:$0xff] (!%p160_p3)   ;;  %v1374_v62 = vld [vmem:[%s1810_s1 + $0x50] sm:$0xff] (!%p160_p3)   ;;  %vm1721_vm6 = vmor (!%p160_p3), %vm765_vm4, %vm766_vm5 }
   0xe   : > { %s1822_s12 = smov (!%p193_p4, %s1411_s12), 1 }
   0xf   : > { %s1279_s11 = sshll.u32 %s1822_s12, 7  ;;  %s1280_s26 = sshll.u32 %s1822_s12, 5 }
  0x10   : > { %512 = vmatpush1.bf16.msra.mxu0 %v1357_v5  ;;  %697 = vmatpush1.bf16.msra.mxu1 %v1358_v6  ;;  %s1518_s20 = scalar_lea.vmem %s1809_s0, %s1279_s11  ;;  %s211_s28 = scalar_lea.vmem %s1812_s3, %s1280_s26 }
  0x11   : > { %513 = vmatprep.subr.bf16.mxu0 %v1421_v1  ;;  %698 = vmatprep.subr.bf16.mxu1 %v1421_v1  ;;  %v1532_v16 = vld [vmem:[%s1518_s20] sm:$0xff]  ;;  %v1535_v17 = vld [vmem:[%s1518_s20 + $0x8] sm:$0x11]  ;;  %v1538_v18 = vld [vmem:[%s1518_s20 + $0x10] sm:$0xff] }
  0x12   : > { %v1544_v20 = vld [vmem:[%s1518_s20 + $0x18] sm:$0x11]  ;;  %v258_v21 = vshrl.u32 %v1532_v16, 16  ;;  %v261_v22 = vshll.u32 %v1532_v16, 16  ;;  %v1197_v23 = vcombine.high %v1532_v16, %v1538_v18  ;;  %v267_v24 = vshll.u32 %v1535_v17, 16  ;;  %v1574_v42 = vld [vmem:[%s1518_s20 + $0x20] sm:$0xff] }
  0x13   : > { %v272_v25 = vshrl.u32 %v1538_v18, 16  ;;  %v275_v26 = vshll.u32 %v1538_v18, 16  ;;  %v281_v27 = vshll.u32 %v1544_v20, 16  ;;  %v1584_v45 = vld [vmem:[%s1518_s20 + $0x28] sm:$0x11]  ;;  %v1587_v46 = vld [vmem:[%s1518_s20 + $0x30] sm:$0xff] }
  0x14   : > { %514 = vmatpush1.bf16.msra.mxu0 %v1359_v7  ;;  %699 = vmatpush1.bf16.msra.mxu1 %v1360_v8  ;;  %v260_v28 = vrot.slane %v258_v21, 4  ;;  %v263_v29 = vrot.slane %v261_v22, 5  ;;  %v269_v31 = vrot.slane %v267_v24, 5  ;;  %v286_v47 = vshrl.u32 %v1574_v42, 16  ;;  %v1595_v49 = vld [vmem:[%s1518_s20 + $0x38] sm:$0x11] }
  0x15   : > { %515 = vmatprep.subr.bf16.mxu0 %v1421_v1  ;;  %700 = vmatprep.subr.bf16.mxu1 %v1421_v1  ;;  %v274_v32 = vrot.slane %v272_v25, 4  ;;  %v277_v33 = vrot.slane %v275_v26, 5  ;;  %v283_v37 = vrot.slane %v281_v27, 5  ;;  %v289_v50 = vshll.u32 %v1574_v42, 16  ;;  %v1611_v61 = vld [vmem:[%s1518_s20 + $0x40] sm:$0xff]  ;;  %v1620_v2 = vld [vmem:[%s1518_s20 + $0x50] sm:$0xff] }
  0x16   : > { %1216 = vmatprep.mubr.msk.bf16.mxu1 %vm494_vm0, %v1197_v23  ;;  %v264_v34 = vor.u32 %v263_v29, %v260_v28  ;;  %v300_v51 = vshrl.u32 %v1587_v46, 16  ;;  %v288_v53 = vrot.slane %v286_v47, 4  ;;  %v303_v54 = vshll.u32 %v1587_v46, 16  ;;  %v1617_v0 = vld [vmem:[%s1518_s20 + $0x48] sm:$0x11]  ;;  %v1375_v21 = vld [vmem:[%s1810_s1 + $0xb8] sm:$0xff]  }
  0x17   : > { %v278_v36 = vor.u32 %v277_v33, %v274_v32  ;;  %v291_v55 = vrot.slane %v289_v50, 5  ;;  %v295_v56 = vshll.u32 %v1584_v45, 16  ;;  %v309_v60 = vshll.u32 %v1595_v49, 16  ;;  %v1626_v6 = vld [vmem:[%s1518_s20 + $0x58] sm:$0x11]  ;;  %v1635_v22 = vld [vmem:[%s1518_s20 + $0x60] sm:$0xff] }
  0x18   : > { %516 = vmatpush1.bf16.msra.mxu0 %v1361_v9  ;;  %701 = vmatpush1.bf16.msra.mxu1 %v1362_v10  ;;  %v265_v39 = vrot.slane %v264_v34, 4  ;;  %v302_v57 = vrot.slane %v300_v51, 4  ;;  %v305_v59 = vrot.slane %v303_v54, 5  ;;  %v314_v3 = vshrl.u32 %v1611_v61, 16  ;;  %v1376_v23 = vld [vmem:[%s1810_s1 + $0x58] sm:$0xff]   ;;  %v1645_v26 = vld [vmem:[%s1518_s20 + $0x70] sm:$0xff] }
  0x19   : > { %517 = vmatprep.subr.bf16.mxu0 %v1421_v1  ;;  %702 = vmatprep.subr.bf16.mxu1 %v1421_v1  ;;  %v279_v41 = vrot.slane %v278_v36, 4  ;;  %v292_v63 = vor.u32 %v291_v55, %v288_v53  ;;  %v317_v4 = vshll.u32 %v1611_v61, 16  ;;  %v328_v7 = vshrl.u32 %v1620_v2, 16  ;;  %v1380_v54 = vld [vmem:[%s1810_s1 + $0xc8] sm:$0xff]   ;;  %v1673_v55 = vld [vmem:[%s1518_s20 + $0x78] sm:$0x11] }
  0x1a   : > { %v1581_v44 = vsel %vm1561_vm3, %v265_v39, %v269_v31  ;;  %v306_v5 = vor.u32 %v305_v59, %v302_v57  ;;  %v331_v8 = vshll.u32 %v1620_v2, 16  ;;  %v297_v10 = vrot.slane %v295_v56, 5 }
  0x1b   : > { %v1592_v48 = vsel %vm1561_vm3, %v279_v41, %v283_v37  ;;  %v293_v9 = vrot.slane %v292_v63, 4  ;;  %v323_v25 = vshll.u32 %v1617_v0, 16  ;;  %v342_v32 = vshrl.u32 %v1635_v22, 16  ;;  %v1379_v37 = vld [vmem:[%s1810_s1 + $0xc0] sm:$0xff]  }
  0x1c   : > { %518 = vmatpush1.bf16.msra.mxu0 %v1363_v11  ;;  %703 = vmatpush1.bf16.msra.mxu1 %v1364_v12  ;;  %v1173_v52 = vcombine.high %v1581_v44, %v1592_v48  ;;  %v316_v11 = vrot.slane %v314_v3, 4  ;;  %v319_v12 = vrot.slane %v317_v4, 5  ;;  %v1172_v24 = vcombine.low %v1581_v44, %v1592_v48  ;;  %v1667_v48 = vld [vmem:[%s1518_s20 + $0x68] sm:$0x11]  ;;  %v1381_v3 = vld [vmem:[%s1810_s1 + $0xd0] sm:$0xff]  }
  0x1d   : > { %519 = vmatprep.subr.bf16.mxu0 %v1421_v1  ;;  %704 = vmatprep.subr.bf16.mxu1 %v1421_v1  ;;  %v298_v27 = vsel %vm1561_vm3, %v293_v9, %v297_v10  ;;  %v345_v33 = vshll.u32 %v1635_v22, 16  ;;  %v356_v34 = vshrl.u32 %v1645_v26, 16  ;;  %v1196_v36 = vcombine.low %v1532_v16, %v1538_v18 }
  0x1e   : > { %1192 = vmatprep.mubr.msk.bf16.mxu0 %vm494_vm0, %v1173_v52  ;;  %v320_v28 = vor.u32 %v319_v12, %v316_v11  ;;  %v1199_v39 = vcombine.high %v1574_v42, %v1587_v46  ;;  %v344_v50 = vrot.slane %v342_v32, 4  ;;  %v365_v63 = vshll.u32 %v1673_v55, 16  ;;  %v1382_v12 = vld [vmem:[%s1810_s1 + $0xd8] sm:$0xff]  }
  0x1f   : > { %v347_v51 = vrot.slane %v345_v33, 5  ;;  %v358_v52 = vrot.slane %v356_v34, 4  ;;  %v1198_v4 = vcombine.low %v1574_v42, %v1587_v46  ;;  %v774_v35 = vrot.slane %v1544_v20, 5 }
  0x20   : > { %520 = vmatpush1.bf16.msra.mxu0 %v1365_v13  ;;  %705 = vmatpush1.bf16.msra.mxu1 %v1366_v14  ;;  %v307_v13 = vrot.slane %v306_v5, 4  ;;  %v311_v14 = vrot.slane %v309_v60, 5  ;;  %v367_v11 = vrot.slane %v365_v63, 5  ;;  %v1224_v20 = vrot.slane %v1611_v61, 9 }
  0x21   : > { %521 = vmatprep.subr.bf16.mxu0 %v1421_v1  ;;  %706 = vmatprep.subr.bf16.mxu1 %v1421_v1  ;;  %v348_v60 = vor.u32 %v347_v51, %v344_v50  ;;  %v1226_v50 = vrot.slane %v1635_v22, 9  ;;  %v794_v51 = vrot.slane %v1667_v48, 5 }
  0x22   : > { %v312_v31 = vsel %vm1561_vm3, %v307_v13, %v311_v14 }
  0x23   : > { %v1175_v41 = vcombine.high %v298_v27, %v312_v31  ;;  %v1174_v56 = vcombine.low %v298_v27, %v312_v31  ;;  %v1220_v27 = vrot.slane %v1532_v16, 9  ;;  %v1225_v31 = vrot.slane %v1620_v2, 9 }
  0x24   : > { %522 = vmatpush1.bf16.msra.mxu0 %v1367_v15  ;;  %707 = vmatpush1.bf16.msra.mxu1 %v1368_v19  ;;  %v330_v15 = vrot.slane %v328_v7, 4  ;;  %v333_v19 = vrot.slane %v331_v8, 5  ;;  %v1201_v7 = vcombine.high %v1611_v61, %v1620_v2  ;;  %v349_v8 = vrot.slane %v348_v60, 4 }
  0x25   : > { %523 = vmatprep.subr.bf16.mxu0 %v1421_v1  ;;  %708 = vmatprep.subr.bf16.mxu1 %v1421_v1  ;;  %v790_v16 = vrot.slane %v1626_v6, 5 }
  0x26   : > { %v334_v29 = vor.u32 %v333_v19, %v330_v15  ;;  %v1383_v19 = vld [vmem:[%s1810_s1 + $0xe0] sm:$0xff]  }
  0x27   : > { %v791_v33 = vsel %vm1721_vm6, %v1225_v31, %v790_v16 }
  0x28   : > { %524 = vmatpush1.bf16.msra.mxu0 %v1369_v30  ;;  %709 = vmatpush1.bf16.msra.mxu1 %v1370_v38  ;;  %v337_v30 = vshll.u32 %v1626_v6, 16  ;;  %v359_v38 = vshll.u32 %v1645_v26, 16  ;;  %v335_v44 = vrot.slane %v334_v29, 4  ;;  %v1386_v29 = vld [vmem:[%s1810_s1 + $0xe8] sm:$0xff]  }
  0x29   : > { %525 = vmatprep.subr.bf16.mxu0 %v1421_v1  ;;  %710 = vmatprep.subr.bf16.mxu1 %v1421_v1 }
  0x2a   : > { %v339_v47 = vrot.slane %v337_v30, 5  ;;  %v361_v53 = vrot.slane %v359_v38, 5  ;;  %v786_v30 = vrot.slane %v1617_v0, 5  ;;  %v1387_v0 = vld [vmem:[%s1810_s1 + $0xf0] sm:$0xff]   ;;  %v1391_v38 = vld [vmem:[%s1810_s1 + $0x100] sm:$0xff]  }
  0x2c   : > { %526 = vmatpush1.bf16.msra.mxu0 %v1371_v40  ;;  %711 = vmatpush1.bf16.msra.mxu1 %v1372_v43  ;;  %v325_v40 = vrot.slane %v323_v25, 5  ;;  %v321_v43 = vrot.slane %v320_v28, 4  ;;  %v340_v59 = vsel %vm1561_vm3, %v335_v44, %v339_v47  ;;  %v1203_v25 = vcombine.high %v1635_v22, %v1645_v26 }
  0x2d   : > { %527 = vmatprep.subr.bf16.mxu0 %v1421_v1  ;;  %712 = vmatprep.subr.bf16.mxu1 %v1421_v1  ;;  %v1221_v28 = vrot.slane %v1538_v18, 9  ;;  %v787_v6 = vsel %vm1721_vm6, %v1224_v20, %v786_v30  ;;  %v1223_v44 = vrot.slane %v1587_v46, 9  ;;  %v782_v47 = vrot.slane %v1595_v49, 5 }
  0x2e   : > { %v326_v57 = vsel %vm1561_vm3, %v321_v43, %v325_v40  ;;  %v1395_v40 = vld [vmem:[%s1810_s1 + $0x110] sm:$0xff]   ;;  %v778_v43 = vrot.slane %v1584_v45, 5  ;;  %v795_v49 = vsel %vm1721_vm6, %v1226_v50, %v794_v51 }
  0x2f   : > { %v1177_v5 = vcombine.high %v326_v57, %v340_v59  ;;  %v1176_v13 = vcombine.low %v326_v57, %v340_v59  ;;  %v783_v46 = vsel %vm1721_vm6, %v1223_v44, %v782_v47 }
  0x30   : > { %528 = vmatpush1.bf16.msra.mxu0 %v1373_v58  ;;  %713 = vmatpush1.bf16.msra.mxu1 %v1374_v62  ;;  %v351_v58 = vshll.u32 %v1667_v48, 16  ;;  %v362_v62 = vor.u32 %v361_v53, %v358_v52  ;;  %v1227_v52 = vrot.slane %v1645_v26, 9  ;;  %v798_v53 = vrot.slane %v1673_v55, 5 }
  0x31   : > { %529 = vmatprep.subr.bf16.mxu0 %v1421_v1  ;;  %714 = vmatprep.subr.bf16.mxu1 %v1421_v1  ;;  %v1256_v48 = vcombine.low %v787_v6, %v791_v33 }
  0x32   : > { %v353_v9 = vrot.slane %v351_v58, 5  ;;  %v363_v10 = vrot.slane %v362_v62, 4 }
  0x34   : > { %530 = vmatpush1.bf16.msra.mxu0 %v1375_v21  ;;  %715 = vmatpush1.bf16.msra.mxu1 %v1376_v23  ;;  %v354_v14 = vsel %vm1561_vm3, %v349_v8, %v353_v9  ;;  %v368_v15 = vsel %vm1561_vm3, %v363_v10, %v367_v11  ;;  %v1200_v21 = vcombine.low %v1611_v61, %v1620_v2  ;;  %v770_v23 = vrot.slane %v1535_v17, 5 }
  0x35   : > { %937 = vmatprep.subr.bf16.mxu0 %v1421_v1  ;;  %1304 = vmatprep.subr.bf16.mxu1 %v1421_v1  ;;  %v1178_v18 = vcombine.low %v354_v14, %v368_v15  ;;  %v775_v61 = vsel %vm1721_vm6, %v1221_v28, %v774_v35  ;;  %v1202_v2 = vcombine.low %v1635_v22, %v1645_v26 }
  0x36   : > { %v771_v32 = vsel %vm1721_vm6, %v1220_v27, %v770_v23  ;;  %v799_v22 = vsel %vm1721_vm6, %v1227_v52, %v798_v53 }
  0x37   : > { %540 = vmatmul.mubr.bf16.vlgmr.msra.gmra.mrb[0].mxu0 %v1172_v24  ;;  %725 = vmatmul.mubr.bf16.vlgmr.msra.gmra.mrb[0].mxu1 %v1196_v36  ;;  %v1179_v24 = vcombine.high %v354_v14, %v368_v15  ;;  %v1253_v34 = vcombine.high %v771_v32, %v775_v61  ;;  %v1257_v36 = vcombine.high %v787_v6, %v791_v33 }
  0x38   : > { %938 = vmatpush1.bf16.msra.mxu0 %v1379_v37  ;;  %1316 = vmatpush1.bf16.msra.mxu1 %v1379_v37  ;;  %v1390_v37 = vld [vmem:[%s1810_s1 + $0xf8] sm:$0xff]   ;;  %v1252_v26 = vcombine.low %v771_v32, %v775_v61  ;;  %v1259_v55 = vcombine.high %v795_v49, %v799_v22 }
  0x39   : > { %939 = vmatprep.subr.bf16.mxu0 %v1421_v1  ;;  %1305 = vmatprep.subr.bf16.mxu1 %v1421_v1 }
  0x3a   : > { %1193 = vmatprep.mubr.msk.bf16.mxu0 %vm494_vm0, %v1175_v41  ;;  %1217 = vmatprep.mubr.msk.bf16.mxu1 %vm494_vm0, %v1199_v39  ;;  %v1394_v39 = vld [vmem:[%s1810_s1 + $0x108] sm:$0xff]   ;;  %v1222_v41 = vrot.slane %v1574_v42, 9  ;;  %v1396_v42 = vld [vmem:[%s1810_s1 + $0x118] sm:$0xff]  }
  0x3c   : > { %940 = vmatpush1.bf16.msra.mxu0 %v1380_v54  ;;  %1317 = vmatpush1.bf16.msra.mxu1 %v1380_v54  ;;  %v779_v45 = vsel %vm1721_vm6, %v1222_v41, %v778_v43 }
  0x3d   : > { %941 = vmatprep.subr.bf16.mxu0 %v1421_v1  ;;  %1306 = vmatprep.subr.bf16.mxu1 %v1421_v1  ;;  %v1255_v54 = vcombine.high %v779_v45, %v783_v46 }
  0x3f   : > { %548 = vmatmul.mubr.bf16.gmra.mrb[4].mxu0 %v1174_v56  ;;  %733 = vmatmul.mubr.bf16.gmra.mrb[4].mxu1 %v1198_v4  ;;  %v1254_v56 = vcombine.low %v779_v45, %v783_v46 }
  0x40   : > { %942 = vmatpush1.bf16.msra.mxu0 %v1381_v3  ;;  %1318 = vmatpush1.bf16.msra.mxu1 %v1381_v3 }
  0x41   : > { %943 = vmatprep.subr.bf16.mxu0 %v1421_v1  ;;  %1307 = vmatprep.subr.bf16.mxu1 %v1421_v1 }
  0x42   : > { %1194 = vmatprep.mubr.msk.bf16.mxu0 %vm494_vm0, %v1177_v5  ;;  %1218 = vmatprep.mubr.msk.bf16.mxu1 %vm494_vm0, %v1201_v7 }
  0x44   : > { %944 = vmatpush1.bf16.msra.mxu0 %v1382_v12  ;;  %1319 = vmatpush1.bf16.msra.mxu1 %v1382_v12 }
  0x45   : > { %945 = vmatprep.subr.bf16.mxu0 %v1421_v1  ;;  %1308 = vmatprep.subr.bf16.mxu1 %v1421_v1 }
  0x47   : > { %556 = vmatmul.mubr.bf16.gmra.mrb[8].mxu0 %v1176_v13  ;;  %741 = vmatmul.mubr.bf16.gmra.mrb[8].mxu1 %v1200_v21 }
  0x48   : > { %946 = vmatpush1.bf16.msra.mxu0 %v1383_v19  ;;  %1320 = vmatpush1.bf16.msra.mxu1 %v1383_v19 }
  0x49   : > { %947 = vmatprep.subr.bf16.mxu0 %v1421_v1  ;;  %1309 = vmatprep.subr.bf16.mxu1 %v1421_v1 }
  0x4a   : > { %1195 = vmatprep.mubr.msk.bf16.mxu0 %vm494_vm0, %v1179_v24  ;;  %1219 = vmatprep.mubr.msk.bf16.mxu1 %vm494_vm0, %v1203_v25 }
  0x4c   : > { %948 = vmatpush1.bf16.msra.mxu0 %v1386_v29  ;;  %1321 = vmatpush1.bf16.msra.mxu1 %v1386_v29 }
  0x4d   : > { %949 = vmatprep.subr.bf16.mxu0 %v1421_v1  ;;  %1310 = vmatprep.subr.bf16.mxu1 %v1421_v1 }
  0x4f   : > { %564 = vmatmul.mubr.bf16.gmra.mrb[12].mxu0 %v1178_v18  ;;  %749 = vmatmul.mubr.bf16.gmra.mrb[12].mxu1 %v1202_v2 }
  0x50   : > { %950 = vmatpush1.bf16.msra.mxu0 %v1387_v0  ;;  %1322 = vmatpush1.bf16.msra.mxu1 %v1387_v0 }
  0x51   : > { %951 = vmatprep.subr.bf16.mxu0 %v1421_v1  ;;  %1311 = vmatprep.subr.bf16.mxu1 %v1421_v1 }
  0x52   : > { %1272 = vmatprep.mubr.msk.bf16.mxu0 %vm494_vm0, %v1253_v34  ;;  %1274 = vmatprep.mubr.msk.bf16.mxu1 %vm494_vm0, %v1257_v36 }
  0x54   : > { %952 = vmatpush1.bf16.msra.mxu0 %v1390_v37  ;;  %1323 = vmatpush1.bf16.msra.mxu1 %v1390_v37  ;;  %v1276_v37 = vld [vmem:[%s1811_s2] ss:$0 sm:$0xff] }
  0x55   : > { %953 = vmatprep.subr.bf16.mxu0 %v1421_v1  ;;  %1312 = vmatprep.subr.bf16.mxu1 %v1421_v1 }
  0x58   : > { %954 = vmatpush1.bf16.msra.mxu0 %v1391_v38  ;;  %1324 = vmatpush1.bf16.msra.mxu1 %v1391_v38 }
  0x59   : > { %955 = vmatprep.subr.bf16.mxu0 %v1421_v1  ;;  %1313 = vmatprep.subr.bf16.mxu1 %v1421_v1 }
  0x5c   : > { %956 = vmatpush1.bf16.msra.mxu0 %v1394_v39  ;;  %1325 = vmatpush1.bf16.msra.mxu1 %v1394_v39 }
  0x5d   : > { %957 = vmatprep.subr.bf16.mxu0 %v1421_v1  ;;  %1314 = vmatprep.subr.bf16.mxu1 %v1421_v1 }
  0x60   : > { %958 = vmatpush1.bf16.msra.mxu0 %v1395_v40  ;;  %1326 = vmatpush1.bf16.msra.mxu1 %v1395_v40 }
  0x61   : > { %959 = vmatprep.subr.bf16.mxu0 %v1421_v1  ;;  %1315 = vmatprep.subr.bf16.mxu1 %v1421_v1  ;;  %v1258_v1 = vcombine.low %v795_v49, %v799_v22 }
  0x64   : > { %960 = vmatpush1.bf16.msra.mxu0 %v1396_v42  ;;  %1327 = vmatpush1.bf16.msra.mxu1 %v1396_v42 }
  0x67   : > { %970 = vmatmul.mubr.bf16.vlgmr.msra.gmra.mrb[16].mxu0 %v1252_v26  ;;  %986 = vmatmul.mubr.bf16.vlgmr.msra.gmra.mrb[16].mxu1 %v1256_v48 }
  0x68   : > { %1273 = vmatprep.mubr.msk.bf16.mxu0 %vm494_vm0, %v1255_v54  ;;  %1275 = vmatprep.mubr.msk.bf16.mxu1 %vm494_vm0, %v1259_v55 }
  0x6f   : > { %978 = vmatmul.mubr.bf16.gmra.mrb[20].mxu0 %v1254_v56  ;;  %994 = vmatmul.mubr.bf16.gmra.mrb[20].mxu1 %v1258_v1 }
 0x10a   : > { %v541_v57 = vpop.f32.mrb[0].mxu0  ;;  %v726_v58 = vpop.f32.mrb[0].mxu1 }
 0x10b   : > { %v543_v59 = vpop.f32.mrb[1].mxu0  ;;  %v727_v60 = vadd.f32 %v726_v58, %v541_v57  ;;  %v728_v62 = vpop.f32.mrb[1].mxu1 }
 0x10c   : > { %v544_v63 = vpop.f32.mrb[2].mxu0  ;;  %v729_v3 = vpop.f32.mrb[2].mxu1 }
 0x10d   : > { %v546_v4 = vpop.f32.mrb[3].mxu0  ;;  %v730_v5 = vadd.f32 %v729_v3, %v544_v63  ;;  %v731_v7 = vpop.f32.mrb[3].mxu1 }
 0x112   : > { %v549_v8 = vpop.f32.mrb[4].mxu0  ;;  %v734_v9 = vpop.f32.mrb[4].mxu1 }
 0x113   : > { %v551_v10 = vpop.f32.mrb[5].mxu0  ;;  %v735_v11 = vadd.f32 %v734_v9, %v549_v8  ;;  %v736_v12 = vpop.f32.mrb[5].mxu1 }
 0x114   : > { %v552_v13 = vpop.f32.mrb[6].mxu0  ;;  %v737_v14 = vpop.f32.mrb[6].mxu1 }
 0x115   : > { %v554_v15 = vpop.f32.mrb[7].mxu0  ;;  %v738_v19 = vadd.f32 %v737_v14, %v552_v13  ;;  %v739_v21 = vpop.f32.mrb[7].mxu1 }
 0x11a   : > { %v557_v23 = vpop.f32.mrb[8].mxu0  ;;  %v742_v24 = vpop.f32.mrb[8].mxu1 }
 0x11b   : > { %v559_v35 = vpop.f32.mrb[9].mxu0  ;;  %v743_v25 = vadd.f32 %v742_v24, %v557_v23  ;;  %v744_v27 = vpop.f32.mrb[9].mxu1 }
 0x11c   : > { %v560_v28 = vpop.f32.mrb[10].mxu0  ;;  %v745_v29 = vpop.f32.mrb[10].mxu1 }
 0x11d   : > { %v562_v17 = vpop.f32.mrb[11].mxu0  ;;  %v746_v20 = vadd.f32 %v745_v29, %v560_v28  ;;  %v747_v30 = vpop.f32.mrb[11].mxu1 }
 0x122   : > { %v565_v31 = vpop.f32.mrb[12].mxu0  ;;  %v750_v16 = vpop.f32.mrb[12].mxu1 }
 0x123   : > { %v567_v18 = vpop.f32.mrb[13].mxu0  ;;  %v751_v32 = vadd.f32 %v750_v16, %v565_v31  ;;  %v752_v61 = vpop.f32.mrb[13].mxu1 }
 0x124   : > { %v568_v0 = vpop.f32.mrb[14].mxu0  ;;  %v753_v2 = vpop.f32.mrb[14].mxu1 }
 0x125   : > { %v570_v6 = vpop.f32.mrb[15].mxu0  ;;  %v754_v33 = vadd.f32 %v753_v2, %v568_v0  ;;  %v755_v34 = vpop.f32.mrb[15].mxu1 }
 0x13a   : > { %v971_v36 = vpop.f32.mrb[16].mxu0  ;;  %v987_v39 = vpop.f32.mrb[16].mxu1 }
 0x13b   : > { %v1002_v38 = vadd.f32 %v971_v36, %v727_v60  ;;  %v973_v40 = vpop.f32.mrb[17].mxu0  ;;  %v1006_v41 = vadd.f32 %v987_v39, %v743_v25  ;;  %v989_v43 = vpop.f32.mrb[17].mxu1 }
 0x13c   : > { %v974_v44 = vpop.f32.mrb[18].mxu0  ;;  %v990_v51 = vpop.f32.mrb[18].mxu1 }
 0x13d   : > { %v1017_v47 = vadd.f32 %v1276_v37, %v1002_v38  ;;  %v1003_v50 = vadd.f32 %v974_v44, %v730_v5  ;;  %v976_v52 = vpop.f32.mrb[19].mxu0  ;;  %v1021_v53 = vadd.f32 %v1276_v37, %v1006_v41  ;;  %v1007_v42 = vadd.f32 %v990_v51, %v746_v20  ;;  %v992_v45 = vpop.f32.mrb[19].mxu1 }
 0x13f   : > { %v1018_v46 = vadd.f32 %v1276_v37, %v1003_v50  ;;  %v1022_v49 = vadd.f32 %v1276_v37, %v1007_v42  ;;  %v1025_v22 = vmax.f32 %v1017_v47, 0.0  ;;  %v1029_v48 = vmax.f32 %v1021_v53, 0.0 }
 0x141   : > { %v1026_v26 = vmax.f32 %v1018_v46, 0.0  ;;  %v1030_v54 = vmax.f32 %v1022_v49, 0.0 }
 0x142   : > { %v979_v55 = vpop.f32.mrb[20].mxu0  ;;  %v995_v57 = vpop.f32.mrb[20].mxu1 }
 0x143   : > { %v1284_v56 = vpack.c.bf16 %v1026_v26, %v1025_v22  ;;  %v1004_v1 = vadd.f32 %v979_v55, %v735_v11  ;;  %v981_v58 = vpop.f32.mrb[21].mxu0  ;;  %v1294_v59 = vpack.c.bf16 %v1030_v54, %v1029_v48  ;;  %v1008_v60 = vadd.f32 %v995_v57, %v751_v32  ;;  %v997_v62 = vpop.f32.mrb[21].mxu1 }
 0x144   : > { %v982_v63 = vpop.f32.mrb[22].mxu0  ;;  %v998_v5 = vpop.f32.mrb[22].mxu1 }
 0x145   : > { %1285 = vst [vmem:[%s211_s28] sm:$0xff] %v1284_v56   ;;  %v1019_v3 = vadd.f32 %v1276_v37, %v1004_v1  ;;  %v1005_v4 = vadd.f32 %v982_v63, %v738_v19  ;;  %v984_v7 = vpop.f32.mrb[23].mxu0  ;;  %1302 = vst [vmem:[%s211_s28 + $0x10] sm:$0xff] %v1294_v59   ;;  %v1023_v8 = vadd.f32 %v1276_v37, %v1008_v60  ;;  %v1000_v10 = vpop.f32.mrb[23].mxu1 }
 0x146   : > { %v1009_v9 = vadd.f32 %v998_v5, %v754_v33 }
 0x147   : > { %v1020_v12 = vadd.f32 %v1276_v37, %v1005_v4  ;;  %v1027_v14 = vmax.f32 %v1019_v3, 0.0  ;;  %v1031_v11 = vmax.f32 %v1023_v8, 0.0 }
 0x148   : > { %v1024_v13 = vadd.f32 %v1276_v37, %v1009_v9 }
 0x149   : > { %v1028_v15 = vmax.f32 %v1020_v12, 0.0 }
 0x14a   : > { %v1032_v21 = vmax.f32 %v1024_v13, 0.0 }
 0x14b   : > { %v1289_v23 = vpack.c.bf16 %v1028_v15, %v1027_v14 }
 0x14c   : > { %v1299_v24 = vpack.c.bf16 %v1032_v21, %v1031_v11 }
 0x14d   : > { %1301 = vst [vmem:[%s211_s28 + $0x8] sm:$0xff] %v1289_v23  }
 0x14e   : > { %1303 = vst [vmem:[%s211_s28 + $0x18] sm:$0xff] %v1299_v24  }
 0x14f PF: > { %s13_s14 = sadd.s32 1, %s1419_s14   ;;  %s1817_s12 = smov %s1415_s13 }
 0x150   : > { %p10_p5 = scmp.ge.s32.totalorder %s13_s14, 4   ;;  %s1818_s13 = smov %s1820_s15 }
 0x152   :  { %12 = sbr.rel (!%p10_p5) target bundleno = 2 (0x2), region = 64 }

// kernel: _lambda_.12
= control target key start
LH: loop header
LB: loop body
LE: loop exit
PB: predicated region body
PF: predicated region fallthrough
CT: control target
= control target key end

     0   :  { %s395_s6 = smov 0   ;;  %s397_s7 = smov 0   ;;  %s436_s0 = inlined_call_operand.vmem [shape: bf16[2,8,4,256], index: 0, kind: input, shape index: {}]   ;;  %s437_s1 = inlined_call_operand.vmem [shape: bf16[2,4,4,128], index: 1, kind: output, shape index: {}]  }
   0x1   :  { %s399_s8 = smov 0  }
   0x2 LB: > { %s23_s9 = sadd.s32 1, %s379_s7  ;;  %p328_p0 = scmp.ge.s32.totalorder %s383_s8, 1  ;;  %s383_s8 = sphi %s399_s8, %s11_s8   ;;  %s379_s7 = sphi %s397_s7, %s439_s7   ;;  %s375_s6 = sphi %s395_s6, %s438_s6  }
   0x3   : > { %p25_p1 = scmp.ge.s32.totalorder %s23_s9, 2  ;;  %p109_p2 = scmp.lt.s32.totalorder %s383_s8, 3 }
   0x5   : > { %s441_s9 = smov (%p25_p1, %s23_s9), 0  ;;  %p110_p3 = pnand %p328_p0, %p109_p2 }
   0x6   : > { %p139_p4 = scmp.lt.s32.totalorder (!%p110_p3), %s375_s6, 1  ;;  %vm200_vm0 = vcmask (!%p110_p3), 1041408  }
   0x7   : > { %113 = sbr.rel (%p110_p3) target bundleno = 30 (0x1e), region = 24 }
   0xe   : > { %s443_s6 = smov (!%p139_p4, %s375_s6), 1 }
   0xf   : > { %s335_s10 = sshll.u32 %s443_s6, 5  ;;  %s336_s14 = sshll.u32 %s443_s6, 3 }
  0x10   : > { %s147_s13 = scalar_lea.vmem %s436_s0, %s335_s10  ;;  %s157_s17 = scalar_lea.vmem %s437_s1, %s336_s14 }
  0x11   : > { %v160_v0 = vld [vmem:[%s147_s13] sm:$0xf]  ;;  %v161_v1 = vld [vmem:[%s147_s13 + $0x4] sm:$0xf]  ;;  %v162_v2 = vld [vmem:[%s147_s13 + $0x8] sm:$0xf] }
  0x12   : > { %v176_v3 = vrot.slane %v160_v0, 2  ;;  %v177_v4 = vrot.slane %v161_v1, 2  ;;  %v163_v5 = vld [vmem:[%s147_s13 + $0xc] sm:$0xf]  ;;  %v178_v6 = vrot.slane %v162_v2, 2 }
  0x13   : > { %v179_v7 = vrot.slane %v163_v5, 2  ;;  %v164_v8 = vld [vmem:[%s147_s13 + $0x10] sm:$0xf]  ;;  %v165_v9 = vld [vmem:[%s147_s13 + $0x14] sm:$0xf] }
  0x14   : > { %v192_v10 = vmax.bf16 %v176_v3, %v160_v0  ;;  %v193_v11 = vmax.bf16 %v177_v4, %v161_v1  ;;  %v194_v12 = vmax.bf16 %v178_v6, %v162_v2  ;;  %v180_v13 = vrot.slane %v164_v8, 2  ;;  %v166_v14 = vld [vmem:[%s147_s13 + $0x18] sm:$0xf]  ;;  %v167_v15 = vld [vmem:[%s147_s13 + $0x1c] sm:$0xf] }
  0x15   : > { %v195_v16 = vmax.bf16 %v179_v7, %v163_v5  ;;  %v181_v17 = vrot.slane %v165_v9, 2  ;;  %v182_v18 = vrot.slane %v166_v14, 2  ;;  %v183_v19 = vrot.slane %v167_v15, 2 }
  0x16   : > { %v203_v20 = vsel %vm200_vm0, %v192_v10, 4286644096  ;;  %v206_v21 = vsel %vm200_vm0, %v193_v11, 4286644096  ;;  %v210_v22 = vsel %vm200_vm0, %v194_v12, 4286644096  ;;  %v196_v23 = vmax.bf16 %v180_v13, %v164_v8 }
  0x17   : > { %v208_v24 = vmax.bf16 %v206_v21, %v203_v20  ;;  %v213_v25 = vsel %vm200_vm0, %v195_v16, 4286644096  ;;  %v197_v26 = vmax.bf16 %v181_v17, %v165_v9  ;;  %v198_v27 = vmax.bf16 %v182_v18, %v166_v14 }
  0x18   : > { %v215_v28 = vmax.bf16 %v213_v25, %v210_v22  ;;  %v217_v29 = vsel %vm200_vm0, %v196_v23, 4286644096  ;;  %v199_v30 = vmax.bf16 %v183_v19, %v167_v15 }
  0x19   : > { %230 = vst [vmem:[%s157_s17] sm:$0x3] %v208_v24  ;;  %v220_v31 = vsel %vm200_vm0, %v197_v26, 4286644096  ;;  %v224_v32 = vsel %vm200_vm0, %v198_v27, 4286644096 }
  0x1a   : > { %231 = vst [vmem:[%s157_s17 + $0x2] sm:$0x3] %v215_v28  ;;  %v222_v33 = vmax.bf16 %v220_v31, %v217_v29  ;;  %v227_v34 = vsel %vm200_vm0, %v199_v30, 4286644096 }
  0x1b   : > { %v229_v35 = vmax.bf16 %v227_v34, %v224_v32 }
  0x1c   : > { %232 = vst [vmem:[%s157_s17 + $0x4] sm:$0x3] %v222_v33 }
  0x1d   : > { %233 = vst [vmem:[%s157_s17 + $0x6] sm:$0x3] %v229_v35 }
  0x1e PF: > { %s11_s8 = sadd.s32 1, %s383_s8   ;;  %s438_s6 = smov %s379_s7 }
  0x1f   : > { %p8_p5 = scmp.ge.s32.totalorder %s11_s8, 4   ;;  %s439_s7 = smov %s441_s9 }
  0x21   :  { %10 = sbr.rel (!%p8_p5) target bundleno = 2 (0x2), region = 54 }

// kernel: _lambda_.11
= control target key start
LH: loop header
LB: loop body
LE: loop exit
PB: predicated region body
PF: predicated region fallthrough
CT: control target
= control target key end

     0   :  { %s2497_s12 = smov 0   ;;  %s2499_s13 = smov 0   ;;  %s3119_s0 = inlined_call_operand.vmem [shape: bf16[2,8,10,384], index: 0, kind: input, shape index: {}]   ;;  %s3120_s1 = inlined_call_operand.vmem [shape: bf16[3,384,128], index: 1, kind: input, shape index: {}]   ;;  %s3121_s2 = inlined_call_operand.vmem [shape: f32[1,128], index: 2, kind: input, shape index: {}]   ;;  %s3122_s3 = inlined_call_operand.vmem [shape: bf16[2,8,8,128], index: 3, kind: output, shape index: {}]  }
   0x1   :  { %s2501_s14 = smov 0  }
   0x2 LB: > { %s25_s15 = sadd.s32 1, %s2471_s13  ;;  %p1825_p0 = scmp.ge.s32.totalorder %s2475_s14, 1  ;;  %s2475_s14 = sphi %s2501_s14, %s13_s14   ;;  %s2471_s13 = sphi %s2499_s13, %s3128_s13   ;;  %s2467_s12 = sphi %s2497_s12, %s3127_s12  }
   0x3   : > { %p27_p1 = scmp.ge.s32.totalorder %s25_s15, 2  ;;  %p159_p2 = scmp.lt.s32.totalorder %s2475_s14, 3 }
   0x5   : > { %s3130_s15 = smov (%p27_p1, %s25_s15), 0  ;;  %p160_p3 = pnand %p1825_p0, %p159_p2 }
   0x6   : > { %v2369_v0 = vld [vmem:[%s3120_s1 + $0x100] sm:$0xff] (!%p160_p3)   ;;  %v2372_v3 = vld [vmem:[%s3120_s1 + $0x108] sm:$0xff] (!%p160_p3)   ;;  %v2375_v6 = vld [vmem:[%s3120_s1 + $0x110] sm:$0xff] (!%p160_p3)   ;;  %p193_p4 = scmp.lt.s32.totalorder (!%p160_p3), %s2467_s12, 1  ;;  %vm294_vm0 = vsmask.f32 (!%p160_p3), 3328 }
   0x7   : > { %163 = sbr.rel (%p160_p3) target bundleno = 363 (0x16b), region = 32  ;;  %v2370_v1 = vld [vmem:[%s3120_s1 + $0x140] sm:$0xff] (!%p160_p3)   ;;  %2076 = vmatprep.subr.bf16.mxu0 (!%p160_p3), %v2369_v0  ;;  %v2373_v4 = vld [vmem:[%s3120_s1 + $0x148] sm:$0xff] (!%p160_p3)   ;;  %v2376_v7 = vld [vmem:[%s3120_s1 + $0x150] sm:$0xff] (!%p160_p3)   ;;  %vm295_vm1 = vsmask.f32 (!%p160_p3), 7440 }
   0x8   : > { %v2371_v2 = vld [vmem:[%s3120_s1 + $0xc0] sm:$0xff] (!%p160_p3)   ;;  %2232 = vmatprep.subr.bf16.mxu1 (!%p160_p3), %v2370_v1  ;;  %v2374_v5 = vld [vmem:[%s3120_s1 + $0xc8] sm:$0xff] (!%p160_p3)   ;;  %v2377_v8 = vld [vmem:[%s3120_s1 + $0xd0] sm:$0xff] (!%p160_p3)   ;;  %vm1246_vm3 = vcmask (!%p160_p3), 1042432   ;;  %vm1247_vm4 = vcmask (!%p160_p3), 1046532  }
   0x9   : > { %2077 = vmatpush3.bf16.msra.mxu0 (!%p160_p3), %v2371_v2  ;;  %2233 = vmatpush3.bf16.msra.mxu1 (!%p160_p3), %v2370_v1  ;;  %v2378_v9 = vld [vmem:[%s3120_s1 + $0x118] sm:$0xff] (!%p160_p3)   ;;  %v2381_v12 = vld [vmem:[%s3120_s1 + $0x120] sm:$0xff] (!%p160_p3)   ;;  %v2384_v15 = vld [vmem:[%s3120_s1 + $0x128] sm:$0xff] (!%p160_p3)  }
   0xa   : > { %2078 = vmatprep.subr.bf16.mxu0 (!%p160_p3), %v2372_v3  ;;  %2234 = vmatprep.subr.bf16.mxu1 (!%p160_p3), %v2373_v4  ;;  %v2379_v10 = vld [vmem:[%s3120_s1 + $0x158] sm:$0xff] (!%p160_p3)   ;;  %v2382_v13 = vld [vmem:[%s3120_s1 + $0x160] sm:$0xff] (!%p160_p3)   ;;  %v2385_v16 = vld [vmem:[%s3120_s1 + $0x168] sm:$0xff] (!%p160_p3)  }
   0xb   : > { %v2380_v11 = vld [vmem:[%s3120_s1 + $0xd8] sm:$0xff] (!%p160_p3)   ;;  %v2383_v14 = vld [vmem:[%s3120_s1 + $0xe0] sm:$0xff] (!%p160_p3)   ;;  %v2386_v17 = vld [vmem:[%s3120_s1 + $0xe8] sm:$0xff] (!%p160_p3)  }
   0xc   : > { %v2387_v18 = vld [vmem:[%s3120_s1 + $0x130] sm:$0xff] (!%p160_p3)   ;;  %v2390_v21 = vld [vmem:[%s3120_s1 + $0x138] sm:$0xff] (!%p160_p3)   ;;  %v2393_v49 = vld [vmem:[%s3120_s1 + $0x40] sm:$0xff] (!%p160_p3)  }
   0xd   : > { %2079 = vmatpush3.bf16.msra.mxu0 (!%p160_p3), %v2374_v5  ;;  %2235 = vmatpush3.bf16.msra.mxu1 (!%p160_p3), %v2373_v4  ;;  %v2388_v19 = vld [vmem:[%s3120_s1 + $0x170] sm:$0xff] (!%p160_p3)   ;;  %v2391_v22 = vld [vmem:[%s3120_s1 + $0x178] sm:$0xff] (!%p160_p3)   ;;  %vm2638_vm2 = vmor (!%p160_p3), %vm294_vm0, %vm295_vm1 }
   0xe   : > { %2080 = vmatprep.subr.bf16.mxu0 %v2375_v6  ;;  %2236 = vmatprep.subr.bf16.mxu1 %v2376_v7  ;;  %s3132_s12 = smov (!%p193_p4, %s2467_s12), 1  ;;  %v2389_v20 = vld [vmem:[%s3120_s1 + $0xf0] sm:$0xff]   ;;  %v2392_v34 = vld [vmem:[%s3120_s1 + $0xf8] sm:$0xff]   ;;  %v2648_v55 = vld [vmem:[%s3120_s1 + $0x80] sm:$0xff]  }
   0xf   : > { %s2344_s27 = smul.u32 192, %s3132_s12  ;;  %vm2719_vm5 = vmor %vm1246_vm3, %vm1247_vm4  ;;  %s2052_s29 = sshll.u32 %s3132_s12, 5 }
  0x10   : > { %s3102_s5 = scalar_lea.vmem %s3122_s3, %s2052_s29 }
  0x11   : > { %2081 = vmatpush3.bf16.msra.mxu0 %v2377_v8  ;;  %2237 = vmatpush3.bf16.msra.mxu1 %v2376_v7  ;;  %s2585_s9 = scalar_lea.vmem %s3119_s0, %s2344_s27 }
  0x12   : > { %2082 = vmatprep.subr.bf16.mxu0 %v2378_v9  ;;  %2238 = vmatprep.subr.bf16.mxu1 %v2379_v10  ;;  %v2597_v23 = vld [vmem:[%s2585_s9] sm:$0xff]  ;;  %v2600_v24 = vld [vmem:[%s2585_s9 + $0xc] sm:$0x11]  ;;  %v2603_v25 = vld [vmem:[%s2585_s9 + $0x18] sm:$0xff] }
  0x13   : > { %v2606_v26 = vld [vmem:[%s2585_s9 + $0x24] sm:$0x11]  ;;  %v298_v27 = vshrl.u32 %v2597_v23, 16  ;;  %v301_v28 = vshll.u32 %v2597_v23, 16  ;;  %v307_v29 = vshll.u32 %v2600_v24, 16  ;;  %v326_v30 = vshrl.u32 %v2603_v25, 16 }
  0x14   : > { %v329_v31 = vshll.u32 %v2603_v25, 16  ;;  %v335_v32 = vshll.u32 %v2606_v26, 16  ;;  %v2615_v33 = vld [vmem:[%s2585_s9 + $0x8] sm:$0xf]  ;;  %v1251_v37 = vrot.slane %v2600_v24, 5  ;;  %v1259_v57 = vrot.slane %v2606_v26, 5 }
  0x15   : > { %2083 = vmatpush3.bf16.msra.mxu0 %v2380_v11  ;;  %2239 = vmatpush3.bf16.msra.mxu1 %v2379_v10  ;;  %v300_v35 = vrot.slane %v298_v27, 4  ;;  %v303_v36 = vrot.slane %v301_v28, 5  ;;  %v2622_v38 = vld [vmem:[%s2585_s9 + $0x14] sm:$0x1]  ;;  %v309_v39 = vrot.slane %v307_v29, 5  ;;  %v328_v40 = vrot.slane %v326_v30, 4 }
  0x16   : > { %2084 = vmatprep.subr.bf16.mxu0 %v2381_v12  ;;  %2240 = vmatprep.subr.bf16.mxu1 %v2382_v13  ;;  %v331_v41 = vrot.slane %v329_v31, 5  ;;  %v337_v42 = vrot.slane %v335_v32, 5  ;;  %v2625_v43 = vld [vmem:[%s2585_s9 + $0x20] sm:$0xf]  ;;  %v2628_v45 = vld [vmem:[%s2585_s9 + $0x2c] sm:$0x1] }
  0x17   : > { %v304_v44 = vor.u32 %v303_v36, %v300_v35  ;;  %v312_v46 = vshrl.u32 %v2615_v33, 16  ;;  %v315_v47 = vshll.u32 %v2615_v33, 16  ;;  %v321_v48 = vshll.u32 %v2622_v38, 16  ;;  %v2656_v4 = vld [vmem:[%s2585_s9 + $0x38] sm:$0xf]  ;;  %v2398_v36 = vld [vmem:[%s3120_s1 + $0x8] sm:$0xff]  }
  0x18   : > { %v332_v51 = vor.u32 %v331_v41, %v328_v40  ;;  %v340_v52 = vshrl.u32 %v2625_v43, 16  ;;  %v343_v53 = vshll.u32 %v2625_v43, 16  ;;  %v349_v54 = vshll.u32 %v2628_v45, 16  ;;  %v2661_v7 = vld [vmem:[%s2585_s9 + $0x44] sm:$0x1] }
  0x19   : > { %2085 = vmatpush3.bf16.msra.mxu0 %v2383_v14  ;;  %2241 = vmatpush3.bf16.msra.mxu1 %v2382_v13  ;;  %v305_v56 = vrot.slane %v304_v44, 4  ;;  %v314_v58 = vrot.slane %v312_v46, 4  ;;  %v317_v59 = vrot.slane %v315_v47, 5  ;;  %v323_v61 = vrot.slane %v321_v48, 5  ;;  %v2664_v8 = vld [vmem:[%s2585_s9 + $0x50] sm:$0xf] }
  0x1a   : > { %2086 = vmatprep.subr.bf16.mxu0 %v2384_v15  ;;  %2242 = vmatprep.subr.bf16.mxu1 %v2385_v16  ;;  %v333_v60 = vrot.slane %v332_v51, 4  ;;  %v342_v62 = vrot.slane %v340_v52, 4  ;;  %v345_v63 = vrot.slane %v343_v53, 5  ;;  %v351_v2 = vrot.slane %v349_v54, 5  ;;  %v2667_v9 = vld [vmem:[%s2585_s9 + $0x5c] sm:$0x1] }
  0x1b   : > { %v310_v0 = vsel %vm2638_vm2, %v305_v56, %v309_v39  ;;  %v318_v1 = vor.u32 %v317_v59, %v314_v58  ;;  %v1255_v3 = vrot.slane %v2622_v38, 5  ;;  %v368_v13 = vshrl.u32 %v2656_v4, 16  ;;  %v2690_v39 = vld [vmem:[%s2585_s9 + $0x30] sm:$0xff]  ;;  %v2696_v46 = vld [vmem:[%s2585_s9 + $0x3c] sm:$0x11] }
  0x1c   : > { %v338_v5 = vsel %vm2638_vm2, %v333_v60, %v337_v42  ;;  %v346_v6 = vor.u32 %v345_v63, %v342_v62  ;;  %v371_v15 = vshll.u32 %v2656_v4, 16  ;;  %v405_v27 = vshll.u32 %v2667_v9, 16  ;;  %v2693_v42 = vld [vmem:[%s2585_s9 + $0x48] sm:$0xff]  ;;  %v2699_v47 = vld [vmem:[%s2585_s9 + $0x54] sm:$0x11] }
  0x1d   : > { %2087 = vmatpush3.bf16.msra.mxu0 %v2386_v17  ;;  %2243 = vmatpush3.bf16.msra.mxu1 %v2385_v16  ;;  %v1877_v10 = vcombine.low %v310_v0, %v338_v5  ;;  %v1878_v11 = vcombine.high %v310_v0, %v338_v5  ;;  %v319_v12 = vrot.slane %v318_v1, 4  ;;  %v377_v16 = vshll.u32 %v2661_v7, 16  ;;  %v2399_v63 = vld [vmem:[%s3120_s1 + $0x50] sm:$0xff]   ;;  %v2397_v1 = vld [vmem:[%s3120_s1 + $0x88] sm:$0xff]  }
  0x1e   : > { %2088 = vmatprep.subr.bf16.mxu0 %v2387_v18  ;;  %2244 = vmatprep.subr.bf16.mxu1 %v2388_v19  ;;  %v347_v14 = vrot.slane %v346_v6, 4  ;;  %v396_v17 = vshrl.u32 %v2664_v8, 16  ;;  %v2395_v18 = vld [vmem:[%s3120_s1] sm:$0xff]   ;;  %v1263_v29 = vrot.slane %v2628_v45, 5  ;;  %v373_v30 = vrot.slane %v371_v15, 5 }
  0x1f   : > { %794 = vmatprep.mubr.bf16.mxu0 %v1878_v11  ;;  %v407_v41 = vrot.slane %v405_v27, 5  ;;  %v357_v51 = vshll.u32 %v2690_v39, 16  ;;  %v363_v52 = vshll.u32 %v2696_v46, 16  ;;  %v382_v54 = vshrl.u32 %v2693_v42, 16 }
  0x20   : > { %v352_v28 = vsel %vm2638_vm2, %v347_v14, %v351_v2  ;;  %v398_v31 = vrot.slane %v396_v17, 4  ;;  %v385_v56 = vshll.u32 %v2693_v42, 16  ;;  %v391_v58 = vshll.u32 %v2699_v47, 16 }
  0x21   : > { %2089 = vmatpush3.bf16.msra.mxu0 %v2389_v20  ;;  %2245 = vmatpush3.bf16.msra.mxu1 %v2388_v19  ;;  %v2396_v19 = vld [vmem:[%s3120_s1 + $0x48] sm:$0xff]   ;;  %v324_v20 = vsel %vm2638_vm2, %v319_v12, %v323_v61  ;;  %v359_v61 = vrot.slane %v357_v51, 5  ;;  %v365_v62 = vrot.slane %v363_v52, 5  ;;  %v384_v2 = vrot.slane %v382_v54, 4 }
  0x22   : > { %2090 = vmatprep.subr.bf16.mxu0 %v2390_v21  ;;  %2246 = vmatprep.subr.bf16.mxu1 %v2391_v22  ;;  %v370_v21 = vrot.slane %v368_v13, 4  ;;  %v1879_v32 = vcombine.low %v324_v20, %v352_v28  ;;  %v387_v5 = vrot.slane %v385_v56, 5  ;;  %v393_v6 = vrot.slane %v391_v58, 5  ;;  %v2401_v13 = vld [vmem:[%s3120_s1 + $0x10] sm:$0xff]   ;;  %v2754_v28 = vld [vmem:[%s2585_s9 + $0x60] sm:$0xff] }
  0x23   : > { %v1949_v14 = vrot.slane %v2597_v23, 9  ;;  %v1951_v17 = vrot.slane %v2603_v25, 9  ;;  %v1271_v24 = vrot.slane %v2661_v7, 5  ;;  %v1950_v56 = vrot.slane %v2615_v33, 9 }
  0x24   : > { %v374_v40 = vor.u32 %v373_v30, %v370_v21  ;;  %2248 = vmatprep.mubr.bf16.mxu1 %v1879_v32  ;;  %v388_v15 = vor.u32 %v387_v5, %v384_v2  ;;  %v2760_v30 = vld [vmem:[%s2585_s9 + $0x78] sm:$0xff]  ;;  %v2769_v32 = vld [vmem:[%s2585_s9 + $0x84] sm:$0x11]  ;;  %v1954_v45 = vrot.slane %v2656_v4, 9  ;;  %v1915_v7 = vcombine.low %v2615_v33, %v2625_v43 }
  0x25   : > { %2091 = vmatpush3.bf16.msra.mxu0 %v2392_v34  ;;  %2247 = vmatpush3.bf16.msra.mxu1 %v2391_v22  ;;  %v399_v22 = vshll.u32 %v2664_v8, 16  ;;  %v379_v34 = vrot.slane %v377_v16, 5  ;;  %v2402_v16 = vld [vmem:[%s3120_s1 + $0x58] sm:$0xff]   ;;  %v2738_v20 = vsel %vm2719_vm5, %v1949_v14, %v1251_v37  ;;  %v2748_v27 = vsel %vm2719_vm5, %v1951_v17, %v1259_v57  ;;  %v2406_v5 = vld [vmem:[%s3120_s1 + $0xa0] sm:$0xff]  }
  0x26   : > { %2128 = vmatprep.subr.bf16.mxu0 %v2393_v49  ;;  %2256 = vmatprep.subr.bf16.mxu1 %v2648_v55  ;;  %v375_v48 = vrot.slane %v374_v40, 4  ;;  %v354_v49 = vshrl.u32 %v2690_v39, 16  ;;  %v389_v21 = vrot.slane %v388_v15, 4  ;;  %v2014_v26 = vcombine.high %v2738_v20, %v2748_v27  ;;  %v2405_v40 = vld [vmem:[%s3120_s1 + $0x60] sm:$0xff]   ;;  %v2809_v17 = vld [vmem:[%s2585_s9 + $0xb4] sm:$0x11] }
  0x27   : > { %v401_v35 = vrot.slane %v399_v22, 5  ;;  %v2404_v22 = vld [vmem:[%s3120_s1 + $0x18] sm:$0xff]   ;;  %v441_v51 = vshll.u32 %v2760_v30, 16  ;;  %v447_v54 = vshll.u32 %v2769_v32, 16  ;;  %v1275_v33 = vrot.slane %v2699_v47, 5 }
  0x28   : > { %795 = vmatmul.mubr.bf16.vlgmr.msra.gmra.mrb[0].mxu0 %v1877_v10  ;;  %v380_v59 = vsel %vm2638_vm2, %v375_v48, %v379_v34  ;;  %v356_v60 = vrot.slane %v354_v49, 4  ;;  %v394_v57 = vsel %vm2638_vm2, %v389_v21, %v393_v6  ;;  %v410_v34 = vshrl.u32 %v2754_v28, 16  ;;  %v2403_v48 = vld [vmem:[%s3120_s1 + $0x98] sm:$0xff]   ;;  %v2409_v21 = vld [vmem:[%s3120_s1 + $0xa8] sm:$0xff]  }
  0x29   : > { %2129 = vmatpush3.bf16.msra.mxu0 %v2395_v18  ;;  %v402_v44 = vor.u32 %v401_v35, %v398_v31  ;;  %v2013_v31 = vcombine.low %v2738_v20, %v2748_v27  ;;  %v413_v35 = vshll.u32 %v2754_v28, 16  ;;  %v438_v49 = vshrl.u32 %v2760_v30, 16  ;;  %v2803_v15 = vld [vmem:[%s2585_s9 + $0x9c] sm:$0x11] }
  0x2a   : > { %2130 = vmatprep.subr.bf16.mxu0 %v2396_v19  ;;  %v360_v12 = vor.u32 %v359_v61, %v356_v60  ;;  %v2400_v19 = vld [vmem:[%s3120_s1 + $0x90] sm:$0xff]   ;;  %v412_v52 = vrot.slane %v410_v34, 4  ;;  %v443_v60 = vrot.slane %v441_v51, 5  ;;  %v2407_v61 = vld [vmem:[%s3120_s1 + $0x20] sm:$0xff]   ;;  %v2821_v34 = vld [vmem:[%s2585_s9 + $0x68] sm:$0xf] }
  0x2b   : > { %v403_v53 = vrot.slane %v402_v44, 4  ;;  %v2831_v51 = vld [vmem:[%s2585_s9 + $0x80] sm:$0xf] }
  0x2c   : > { %v361_v18 = vrot.slane %v360_v12, 4  ;;  %v2797_v12 = vld [vmem:[%s2585_s9 + $0x90] sm:$0xff] }
  0x2d   : > { %2131 = vmatpush3.bf16.msra.mxu0 %v2398_v36  ;;  %v408_v0 = vsel %vm2638_vm2, %v403_v53, %v407_v41  ;;  %v415_v53 = vrot.slane %v413_v35, 5  ;;  %v2411_v35 = vld [vmem:[%s3120_s1 + $0x70] sm:$0xff]  }
  0x2e   : > { %v1882_v11 = vcombine.low %v380_v59, %v408_v0  ;;  %2132 = vmatprep.subr.bf16.mxu0 %v2399_v63  ;;  %v366_v37 = vsel %vm2638_vm2, %v361_v18, %v365_v62  ;;  %v440_v59 = vrot.slane %v438_v49, 4  ;;  %v449_v63 = vrot.slane %v447_v54, 5  ;;  %v2408_v0 = vld [vmem:[%s3120_s1 + $0x68] sm:$0xff]   ;;  %v2828_v49 = vld [vmem:[%s2585_s9 + $0x74] sm:$0x1] }
  0x2f   : > { %v1881_v41 = vcombine.high %v366_v37, %v394_v57  ;;  %v1880_v44 = vcombine.low %v366_v37, %v394_v57  ;;  %v416_v62 = vor.u32 %v415_v53, %v412_v52  ;;  %v466_v18 = vshrl.u32 %v2797_v12, 16 }
  0x30   : > { %2249 = vmatmul.mubr.bf16.vlgmr.msra.gmra.mrb[0].mxu1 %v1882_v11  ;;  %v2410_v11 = vld [vmem:[%s3120_s1 + $0x28] sm:$0xff]   ;;  %v475_v37 = vshll.u32 %v2803_v15, 16 }
  0x31   : > { %2133 = vmatpush3.bf16.msra.mxu0 %v2401_v13  ;;  %2257 = vmatpush3.bf16.msra.mxu1 %v2648_v55  ;;  %v2757_v55 = vld [vmem:[%s2585_s9 + $0x6c] sm:$0x11]  ;;  %v417_v2 = vrot.slane %v416_v62, 4  ;;  %v1952_v13 = vrot.slane %v2625_v43, 9  ;;  %v433_v62 = vshll.u32 %v2828_v49, 16 }
  0x32   : > { %2134 = vmatprep.subr.bf16.mxu0 %v2402_v16  ;;  %2258 = vmatprep.subr.bf16.mxu1 %v2397_v1  ;;  %v419_v36 = vshll.u32 %v2757_v55, 16  ;;  %v2806_v16 = vld [vmem:[%s2585_s9 + $0xa8] sm:$0xff]  ;;  %v477_v53 = vrot.slane %v475_v37, 5  ;;  %v2429_v43 = vld [vmem:[%s3120_s1 + $0x1d0] sm:$0xff]  }
  0x33   : > { %802 = vmatprep.mubr.bf16.mxu0 %v1881_v41  ;;  %v494_v57 = vshrl.u32 %v2806_v16, 16  ;;  %v468_v41 = vrot.slane %v466_v18, 4  ;;  %v2904_v38 = vsel %vm2719_vm5, %v1952_v13, %v1263_v29  ;;  %v1913_v29 = vcombine.low %v2597_v23, %v2603_v25 }
  0x34   : > { %v421_v58 = vrot.slane %v419_v36, 5  ;;  %803 = vmatmul.mubr.bf16.gmra.mrb[4].mxu0 %v1880_v44  ;;  %v497_v44 = vshll.u32 %v2806_v16, 16  ;;  %v1956_v13 = vrot.slane %v2664_v8, 9 }
  0x35   : > { %2135 = vmatpush3.bf16.msra.mxu0 %v2404_v22  ;;  %2259 = vmatpush3.bf16.msra.mxu1 %v2397_v1  ;;  %v444_v1 = vor.u32 %v443_v60, %v440_v59  ;;  %v469_v22 = vshll.u32 %v2797_v12, 16  ;;  %v496_v54 = vrot.slane %v494_v57, 4  ;;  %v2835_v59 = vld [vmem:[%s2585_s9 + $0x8c] sm:$0x1]  ;;  %v424_v60 = vshrl.u32 %v2821_v34, 16 }
  0x36   : > { %2136 = vmatprep.subr.bf16.mxu0 %v2405_v40  ;;  %2260 = vmatprep.subr.bf16.mxu1 %v2400_v19  ;;  %v422_v14 = vsel %vm2638_vm2, %v417_v2, %v421_v58  ;;  %v503_v58 = vshll.u32 %v2809_v17, 16  ;;  %v455_v2 = vshll.u32 %v2831_v51, 16 }
  0x37   : > { %v445_v6 = vrot.slane %v444_v1, 4  ;;  %v471_v52 = vrot.slane %v469_v22, 5  ;;  %v452_v1 = vshrl.u32 %v2831_v51, 16  ;;  %v2413_v22 = vld [vmem:[%s3120_s1 + $0x30] sm:$0xff]  }
  0x39   : > { %2137 = vmatpush3.bf16.msra.mxu0 %v2407_v61  ;;  %2261 = vmatpush3.bf16.msra.mxu1 %v2400_v19  ;;  %v450_v19 = vsel %vm2638_vm2, %v445_v6, %v449_v63  ;;  %v427_v61 = vshll.u32 %v2821_v34, 16  ;;  %v472_v63 = vor.u32 %v471_v52, %v468_v41  ;;  %v2412_v6 = vld [vmem:[%s3120_s1 + $0xb0] sm:$0xff]   ;;  %v454_v57 = vrot.slane %v452_v1, 4  ;;  %v2414_v52 = vld [vmem:[%s3120_s1 + $0x78] sm:$0xff]  }
  0x3a   : > { %2138 = vmatprep.subr.bf16.mxu0 %v2408_v0  ;;  %2262 = vmatprep.subr.bf16.mxu1 %v2403_v48  ;;  %v1884_v36 = vcombine.high %v422_v14, %v450_v19  ;;  %v1883_v40 = vcombine.low %v422_v14, %v450_v19  ;;  %v505_v0 = vrot.slane %v503_v58, 5  ;;  %v426_v14 = vrot.slane %v424_v60, 4 }
  0x3b   : > { %v429_v18 = vrot.slane %v427_v61, 5  ;;  %v435_v19 = vrot.slane %v433_v62, 5  ;;  %v473_v37 = vrot.slane %v472_v63, 4  ;;  %v2863_v61 = vld [vmem:[%s2585_s9 + $0xb0] sm:$0xf] }
  0x3c   : > { %810 = vmatprep.mubr.bf16.mxu0 %v1884_v36  ;;  %v461_v36 = vshll.u32 %v2835_v59, 16  ;;  %v2866_v62 = vld [vmem:[%s2585_s9 + $0xbc] sm:$0x1] }
  0x3d   : > { %2139 = vmatpush3.bf16.msra.mxu0 %v2410_v11  ;;  %2263 = vmatpush3.bf16.msra.mxu1 %v2403_v48  ;;  %v499_v48 = vrot.slane %v497_v44, 5  ;;  %v430_v41 = vor.u32 %v429_v18, %v426_v14  ;;  %v2850_v44 = vld [vmem:[%s2585_s9 + $0x98] sm:$0xf]  ;;  %v478_v58 = vsel %vm2638_vm2, %v473_v37, %v477_v53 }
  0x3e   : > { %2264 = vmatprep.subr.bf16.mxu1 %v2406_v5  ;;  %2140 = vmatprep.subr.bf16.mxu0 %v2411_v35  ;;  %v457_v35 = vrot.slane %v455_v2, 5  ;;  %v463_v60 = vrot.slane %v461_v36, 5  ;;  %v480_v63 = vshrl.u32 %v2850_v44, 16  ;;  %v2415_v53 = vld [vmem:[%s3120_s1 + $0xb8] sm:$0xff]   ;;  %v508_v36 = vshrl.u32 %v2863_v61, 16 }
  0x3f   : > { %811 = vmatmul.mubr.bf16.gmra.mrb[8].mxu0 %v1883_v40  ;;  %v500_v11 = vor.u32 %v499_v48, %v496_v54  ;;  %v1914_v54 = vcombine.high %v2597_v23, %v2603_v25  ;;  %v431_v2 = vrot.slane %v430_v41, 4  ;;  %v2424_v23 = vld [vmem:[%s3120_s1 + $0x1c8] sm:$0xff]   ;;  %v1962_v27 = vrot.slane %v2850_v44, 9 }
  0x40   : > { %v458_v48 = vor.u32 %v457_v35, %v454_v57  ;;  %v482_v57 = vrot.slane %v480_v63, 4  ;;  %v510_v63 = vrot.slane %v508_v36, 4 }
  0x41   : > { %2265 = vmatpush3.bf16.msra.mxu1 %v2406_v5  ;;  %v501_v40 = vrot.slane %v500_v11, 4  ;;  %v2853_v5 = vld [vmem:[%s2585_s9 + $0xa4] sm:$0x1]  ;;  %2141 = vmatpush3.bf16.msra.mxu0 %v2413_v22  ;;  %v483_v11 = vshll.u32 %v2850_v44, 16 }
  0x42   : > { %2266 = vmatprep.subr.bf16.mxu1 %v2409_v21  ;;  %v489_v14 = vshll.u32 %v2853_v5, 16  ;;  %2142 = vmatprep.subr.bf16.mxu0 %v2414_v52  ;;  %v459_v37 = vrot.slane %v458_v48, 4  ;;  %v511_v52 = vshll.u32 %v2863_v61, 16 }
  0x43   : > { %v506_v1 = vsel %vm2638_vm2, %v501_v40, %v505_v0  ;;  %v436_v0 = vsel %vm2638_vm2, %v431_v2, %v435_v19  ;;  %v485_v35 = vrot.slane %v483_v11, 5  ;;  %v2416_v40 = vld [vmem:[%s3120_s1 + $0x38] sm:$0xff]  }
  0x44   : > { %v1887_v18 = vcombine.high %v478_v58, %v506_v1  ;;  %v1886_v22 = vcombine.low %v478_v58, %v506_v1  ;;  %v464_v41 = vsel %vm2638_vm2, %v459_v37, %v463_v60  ;;  %v517_v58 = vshll.u32 %v2866_v62, 16  ;;  %v2420_v60 = vld [vmem:[%s3120_s1 + $0x1c0] sm:$0xff]  }
  0x45   : > { %2267 = vmatpush3.bf16.msra.mxu1 %v2409_v21  ;;  %v1279_v21 = vrot.slane %v2667_v9, 5  ;;  %v2893_v9 = vsel %vm2719_vm5, %v1950_v56, %v1255_v3  ;;  %v1885_v19 = vcombine.low %v436_v0, %v464_v41  ;;  %v486_v48 = vor.u32 %v485_v35, %v482_v57  ;;  %2143 = vmatpush3.bf16.msra.mxu0 %v2416_v40  ;;  %v2421_v56 = vld [vmem:[%s3120_s1 + $0x200] sm:$0xff]  }
  0x46   : > { %2268 = vmatprep.subr.bf16.mxu1 %v2412_v6  ;;  %818 = vmatprep.mubr.bf16.mxu0 %v1887_v18  ;;  %v491_v1 = vrot.slane %v489_v14, 5  ;;  %v513_v2 = vrot.slane %v511_v52, 5  ;;  %v519_v14 = vrot.slane %v517_v58, 5  ;;  %v1917_v37 = vcombine.high %v2690_v39, %v2693_v42  ;;  %v2431_v58 = vld [vmem:[%s3120_s1 + $0x190] sm:$0xff]  }
  0x47   : > { %819 = vmatmul.mubr.bf16.gmra.mrb[12].mxu0 %v1886_v22  ;;  %2252 = vmatprep.mubr.bf16.mxu1 %v1885_v19  ;;  %v487_v3 = vrot.slane %v486_v48, 4  ;;  %v2423_v22 = vld [vmem:[%s3120_s1 + $0x180] sm:$0xff]   ;;  %v2933_v25 = vsel %vm2719_vm5, %v1956_v13, %v1279_v21  ;;  %v1953_v57 = vrot.slane %v2690_v39, 9  ;;  %v1267_v35 = vrot.slane %v2696_v46, 5  ;;  %v2426_v21 = vld [vmem:[%s3120_s1 + $0x188] sm:$0xff]  }
  0x48   : > { %1132 = vmatprep.mubr.bf16.mxu0 %v1914_v54  ;;  %v514_v11 = vor.u32 %v513_v2, %v510_v63  ;;  %2180 = vmatprep.subr.bf16.mxu0 %v2420_v60  ;;  %v1955_v40 = vrot.slane %v2693_v42, 9  ;;  %v1916_v41 = vcombine.low %v2690_v39, %v2693_v42  ;;  %v1920_v19 = vcombine.high %v2754_v28, %v2760_v30  ;;  %v2432_v39 = vld [vmem:[%s3120_s1 + $0x1d8] sm:$0xff]   ;;  %v2425_v63 = vld [vmem:[%s3120_s1 + $0x208] sm:$0xff]   ;;  %v2430_v2 = vld [vmem:[%s3120_s1 + $0x210] sm:$0xff]  }
  0x49   : > { %2269 = vmatpush3.bf16.msra.mxu1 %v2412_v6  ;;  %v2015_v6 = vcombine.low %v2893_v9, %v2904_v38  ;;  %v492_v54 = vsel %vm2638_vm2, %v487_v3, %v491_v1  ;;  %v2949_v50 = vsel %vm2719_vm5, %v1953_v57, %v1267_v35  ;;  %v1918_v48 = vcombine.low %v2656_v4, %v2664_v8  ;;  %v2434_v60 = vld [vmem:[%s3120_s1 + $0x198] sm:$0xff]   ;;  %v2437_v4 = vld [vmem:[%s3120_s1 + $0x1e0] sm:$0xff]   ;;  %v2441_v38 = vld [vmem:[%s3120_s1 + $0x228] sm:$0xff]  }
  0x4a   : > { %2270 = vmatprep.subr.bf16.mxu1 %v2415_v53  ;;  %v515_v18 = vrot.slane %v514_v11, 4  ;;  %v2957_v46 = vsel %vm2719_vm5, %v1955_v40, %v1275_v33  ;;  %v1921_v42 = vcombine.low %v2821_v34, %v2831_v51  ;;  %v1957_v8 = vrot.slane %v2754_v28, 9  ;;  %v2438_v35 = vld [vmem:[%s3120_s1 + $0x220] sm:$0xff]   ;;  %v2450_v9 = vld [vmem:[%s3120_s1 + $0x1f8] sm:$0xff]  }
  0x4b   : > { %v2017_v52 = vcombine.high %v2949_v50, %v2957_v46  ;;  %v2016_v47 = vcombine.low %v2949_v50, %v2957_v46  ;;  %v1283_v1 = vrot.slane %v2757_v55, 5  ;;  %v1919_v3 = vcombine.low %v2754_v28, %v2760_v30  ;;  %v2440_v28 = vld [vmem:[%s3120_s1 + $0x1e8] sm:$0xff]  }
  0x4c   : > { %v520_v0 = vsel %vm2638_vm2, %v515_v18, %v519_v14  ;;  %v1959_v11 = vrot.slane %v2760_v30, 9  ;;  %v2439_v14 = vld [vmem:[%s3120_s1 + $0x1a0] sm:$0xff]   ;;  %v1924_v30 = vcombine.low %v2850_v44, %v2863_v61  ;;  %v1307_v57 = vrot.slane %v2809_v17, 5 }
  0x4d   : > { %2271 = vmatpush3.bf16.msra.mxu1 %v2415_v53  ;;  %v2926_v53 = vsel %vm2719_vm5, %v1954_v45, %v1271_v24  ;;  %v1888_v36 = vcombine.low %v492_v54, %v520_v0  ;;  %v3001_v55 = vsel %vm2719_vm5, %v1957_v8, %v1283_v1  ;;  %v1291_v45 = vrot.slane %v2769_v32, 5  ;;  %v2433_v32 = vld [vmem:[%s3120_s1 + $0x218] sm:$0xff]   ;;  %v2447_v0 = vld [vmem:[%s3120_s1 + $0x1f0] sm:$0xff]  }
  0x4e   : > { %2280 = vmatprep.subr.bf16.mxu1 %v2421_v56  ;;  %v2018_v24 = vcombine.low %v2926_v53, %v2933_v25  ;;  %v1299_v54 = vrot.slane %v2803_v15, 5  ;;  %v1922_v17 = vcombine.low %v2797_v12, %v2806_v16  ;;  %v1287_v33 = vrot.slane %v2828_v49, 5 }
  0x4f   : > { %1133 = vmatmul.mubr.bf16.vlgmr.msra.gmra.mrb[16].mxu0 %v1913_v29  ;;  %2253 = vmatmul.mubr.bf16.gmra.mrb[4].mxu1 %v1888_v36  ;;  %v1961_v29 = vrot.slane %v2797_v12, 9  ;;  %v3012_v13 = vsel %vm2719_vm5, %v1959_v11, %v1291_v45  ;;  %v1964_v49 = vrot.slane %v2863_v61, 9 }
  0x50   : > { %2181 = vmatpush3.bf16.msra.mxu0 %v2423_v22  ;;  %1140 = vmatprep.mubr.bf16.mxu0 %v1917_v37  ;;  %v2020_v18 = vcombine.high %v3001_v55, %v3012_v13  ;;  %v2019_v22 = vcombine.low %v3001_v55, %v3012_v13  ;;  %v1963_v37 = vrot.slane %v2806_v16, 9 }
  0x51   : > { %2182 = vmatprep.subr.bf16.mxu0 %v2424_v23  ;;  %2272 = vmatprep.mubr.bf16.mxu1 %v1915_v7  ;;  %v2442_v23 = vld [vmem:[%s3120_s1 + $0x1a8] sm:$0xff]   ;;  %v1300_v15 = vsel %vm2719_vm5, %v1961_v29, %v1299_v54 }
  0x52   : > { %v1308_v7 = vsel %vm2719_vm5, %v1963_v37, %v1307_v57 }
  0x53   : > { %v2023_v36 = vcombine.high %v1300_v15, %v1308_v7  ;;  %v2022_v40 = vcombine.low %v1300_v15, %v1308_v7 }
  0x54   : > { %2183 = vmatpush3.bf16.msra.mxu0 %v2426_v21  ;;  %v2449_v21 = vld [vmem:[%s3120_s1 + $0x1b0] sm:$0xff]  }
  0x55   : > { %2184 = vmatprep.subr.bf16.mxu0 %v2429_v43  ;;  %v1960_v43 = vrot.slane %v2831_v51, 9  ;;  %v1311_v51 = vrot.slane %v2866_v62, 5 }
  0x57   : > { %1141 = vmatmul.mubr.bf16.gmra.mrb[20].mxu0 %v1916_v41  ;;  %2273 = vmatmul.mubr.bf16.vlgmr.msra.gmra.mrb[0].mxu1 %v1918_v48  ;;  %v1295_v41 = vrot.slane %v2835_v59, 5  ;;  %v1312_v44 = vsel %vm2719_vm5, %v1964_v49, %v1311_v51 }
  0x58   : > { %2185 = vmatpush3.bf16.msra.mxu0 %v2431_v58  ;;  %1148 = vmatprep.mubr.bf16.mxu0 %v1920_v19 }
  0x59   : > { %2186 = vmatprep.subr.bf16.mxu0 %v2432_v39  ;;  %2281 = vmatpush3.bf16.msra.mxu1 %v2421_v56  ;;  %v1923_v56 = vcombine.high %v2797_v12, %v2806_v16  ;;  %v2452_v12 = vld [vmem:[%s3120_s1 + $0x1b8] sm:$0xff]   ;;  %v2448_v16 = vld [vmem:[%s3120_s1 + $0x230] sm:$0xff]   ;;  %v1296_v20 = vsel %vm2719_vm5, %v1960_v43, %v1295_v41 }
  0x5a   : > { %2276 = vmatprep.mubr.bf16.mxu1 %v1921_v42  ;;  %2282 = vmatprep.subr.bf16.mxu1 %v2425_v63 }
  0x5c   : > { %2187 = vmatpush3.bf16.msra.mxu0 %v2434_v60 }
  0x5d   : > { %2188 = vmatprep.subr.bf16.mxu0 %v2437_v4  ;;  %2283 = vmatpush3.bf16.msra.mxu1 %v2425_v63 }
  0x5e   : > { %2284 = vmatprep.subr.bf16.mxu1 %v2430_v2 }
  0x5f   : > { %1149 = vmatmul.mubr.bf16.gmra.mrb[24].mxu0 %v1919_v3  ;;  %2277 = vmatmul.mubr.bf16.gmra.mrb[4].mxu1 %v1924_v30 }
  0x60   : > { %2189 = vmatpush3.bf16.msra.mxu0 %v2439_v14  ;;  %1156 = vmatprep.mubr.bf16.mxu0 %v1923_v56 }
  0x61   : > { %2190 = vmatprep.subr.bf16.mxu0 %v2440_v28  ;;  %2285 = vmatpush3.bf16.msra.mxu1 %v2430_v2 }
  0x62   : > { %2296 = vmatprep.mubr.bf16.mxu1 %v2015_v6  ;;  %2286 = vmatprep.subr.bf16.mxu1 %v2433_v32  ;;  %v2451_v6 = vld [vmem:[%s3120_s1 + $0x238] sm:$0xff]  }
  0x64   : > { %2191 = vmatpush3.bf16.msra.mxu0 %v2442_v23 }
  0x65   : > { %2192 = vmatprep.subr.bf16.mxu0 %v2447_v0  ;;  %2287 = vmatpush3.bf16.msra.mxu1 %v2433_v32 }
  0x66   : > { %2288 = vmatprep.subr.bf16.mxu1 %v2438_v35 }
  0x67   : > { %1157 = vmatmul.mubr.bf16.gmra.mrb[28].mxu0 %v1922_v17 }
  0x68   : > { %2193 = vmatpush3.bf16.msra.mxu0 %v2449_v21  ;;  %1586 = vmatprep.mubr.bf16.mxu0 %v2014_v26  ;;  %v1958_v26 = vrot.slane %v2821_v34, 9  ;;  %v1303_v34 = vrot.slane %v2853_v5, 5 }
  0x69   : > { %2194 = vmatprep.subr.bf16.mxu0 %v2450_v9  ;;  %2289 = vmatpush3.bf16.msra.mxu1 %v2438_v35 }
  0x6a   : > { %2290 = vmatprep.subr.bf16.mxu1 %v2441_v38  ;;  %v1288_v58 = vsel %vm2719_vm5, %v1958_v26, %v1287_v33  ;;  %v1304_v59 = vsel %vm2719_vm5, %v1962_v27, %v1303_v34 }
  0x6b   : > { %v2024_v5 = vcombine.low %v1304_v59, %v1312_v44 }
  0x6c   : > { %2195 = vmatpush3.bf16.msra.mxu0 %v2452_v12 }
  0x6d   : > { %2291 = vmatpush3.bf16.msra.mxu1 %v2441_v38 }
  0x6e   : > { %2292 = vmatprep.subr.bf16.mxu1 %v2448_v16 }
  0x6f   : > { %1587 = vmatmul.mubr.bf16.vlgmr.msra.gmra.mrb[32].mxu0 %v2013_v31  ;;  %v2021_v31 = vcombine.low %v1288_v58, %v1296_v20 }
  0x70   : > { %1594 = vmatprep.mubr.bf16.mxu0 %v2017_v52 }
  0x71   : > { %2293 = vmatpush3.bf16.msra.mxu1 %v2448_v16 }
  0x72   : > { %2294 = vmatprep.subr.bf16.mxu1 %v2451_v6 }
  0x75   : > { %2295 = vmatpush3.bf16.msra.mxu1 %v2451_v6 }
  0x77   : > { %1595 = vmatmul.mubr.bf16.gmra.mrb[36].mxu0 %v2016_v47 }
  0x78   : > { %1602 = vmatprep.mubr.bf16.mxu0 %v2020_v18  ;;  %2297 = vmatmul.mubr.bf16.vlgmr.msra.gmra.mrb[0].mxu1 %v2018_v24 }
  0x79   : > { %2300 = vmatprep.mubr.bf16.mxu1 %v2021_v31 }
  0x7f   : > { %1603 = vmatmul.mubr.bf16.gmra.mrb[40].mxu0 %v2019_v22 }
  0x80   : > { %1610 = vmatprep.mubr.bf16.mxu0 %v2023_v36  ;;  %2301 = vmatmul.mubr.bf16.gmra.mrb[4].mxu1 %v2024_v5 }
  0x87   : > { %1611 = vmatmul.mubr.bf16.gmra.mrb[44].mxu0 %v2022_v40 }
  0xfb   : > { %v2092_v61 = vpop.f32.mrb[0].mxu0 }
  0xfc   : > { %v2093_v62 = vpop.f32.mrb[1].mxu0 }
  0xfd   : > { %v2094_v50 = vadd.f32 %v2093_v62, %v2092_v61  ;;  %v2095_v46 = vpop.f32.mrb[2].mxu0 }
  0xfe   : > { %v2096_v52 = vpop.f32.mrb[3].mxu0 }
  0xff   : > { %v2097_v47 = vadd.f32 %v2096_v52, %v2095_v46 }
 0x107   : > { %v2098_v53 = vpop.f32.mrb[4].mxu0 }
 0x108   : > { %v2099_v25 = vpop.f32.mrb[5].mxu0 }
 0x109   : > { %v2100_v24 = vadd.f32 %v2099_v25, %v2098_v53  ;;  %v2101_v19 = vpop.f32.mrb[6].mxu0  ;;  %v2049_v53 = vld [vmem:[%s3121_s2] ss:$0 sm:$0xff] }
 0x10a   : > { %v2102_v48 = vpop.f32.mrb[7].mxu0 }
 0x10b   : > { %v2103_v39 = vadd.f32 %v2102_v48, %v2101_v19 }
 0x112   : > { %v2104_v42 = vpop.f32.mrb[8].mxu0 }
 0x113   : > { %v2105_v10 = vpop.f32.mrb[9].mxu0 }
 0x114   : > { %v2106_v63 = vadd.f32 %v2105_v10, %v2104_v42  ;;  %v2107_v60 = vpop.f32.mrb[10].mxu0 }
 0x115   : > { %v2108_v4 = vpop.f32.mrb[11].mxu0 }
 0x116   : > { %v2109_v8 = vadd.f32 %v2108_v4, %v2107_v60 }
 0x11a   : > { %v2110_v1 = vpop.f32.mrb[12].mxu0 }
 0x11b   : > { %v2111_v2 = vpop.f32.mrb[13].mxu0 }
 0x11c   : > { %v2112_v3 = vadd.f32 %v2111_v2, %v2110_v1  ;;  %v2113_v11 = vpop.f32.mrb[14].mxu0 }
 0x11d   : > { %v2114_v14 = vpop.f32.mrb[15].mxu0 }
 0x11e   : > { %v2115_v56 = vadd.f32 %v2114_v14, %v2113_v11 }
 0x122   : > { %v2144_v55 = vpop.f32.mrb[16].mxu0 }
 0x123   : > { %v2145_v45 = vpop.f32.mrb[17].mxu0 }
 0x124   : > { %v2146_v28 = vadd.f32 %v2145_v45, %v2144_v55  ;;  %v2147_v30 = vpop.f32.mrb[18].mxu0 }
 0x125   : > { %v2148_v29 = vpop.f32.mrb[19].mxu0 }
 0x126   : > { %v2307_v13 = vadd.f32 %v2146_v28, %v2094_v50  ;;  %v2149_v54 = vadd.f32 %v2148_v29, %v2147_v30 }
 0x128   : > { %v2313_v32 = vadd.f32 %v2149_v54, %v2097_v47 }
 0x12a   : > { %v2150_v18 = vpop.f32.mrb[20].mxu0 }
 0x12b   : > { %v2151_v22 = vpop.f32.mrb[21].mxu0 }
 0x12c   : > { %v2152_v37 = vadd.f32 %v2151_v22, %v2150_v18  ;;  %v2153_v23 = vpop.f32.mrb[22].mxu0 }
 0x12d   : > { %v2154_v15 = vpop.f32.mrb[23].mxu0 }
 0x12e   : > { %v2304_v57 = vadd.f32 %v2152_v37, %v2100_v24  ;;  %v2155_v0 = vadd.f32 %v2154_v15, %v2153_v23 }
 0x130   : > { %v2310_v7 = vadd.f32 %v2155_v0, %v2103_v39 }
 0x132   : > { %v2156_v35 = vpop.f32.mrb[24].mxu0 }
 0x133   : > { %v2157_v17 = vpop.f32.mrb[25].mxu0 }
 0x134   : > { %v2158_v36 = vadd.f32 %v2157_v17, %v2156_v35  ;;  %v2159_v40 = vpop.f32.mrb[26].mxu0 }
 0x135   : > { %v2160_v21 = vpop.f32.mrb[27].mxu0 }
 0x136   : > { %v2319_v9 = vadd.f32 %v2158_v36, %v2106_v63  ;;  %v2161_v38 = vadd.f32 %v2160_v21, %v2159_v40 }
 0x138   : > { %v2325_v12 = vadd.f32 %v2161_v38, %v2109_v8 }
 0x13a   : > { %v2162_v16 = vpop.f32.mrb[28].mxu0 }
 0x13b   : > { %v2163_v6 = vpop.f32.mrb[29].mxu0 }
 0x13c   : > { %v2164_v26 = vadd.f32 %v2163_v6, %v2162_v16  ;;  %v2165_v33 = vpop.f32.mrb[30].mxu0 }
 0x13d   : > { %v2166_v43 = vpop.f32.mrb[31].mxu0 }
 0x13e   : > { %v3091_v41 = vadd.f32 %v2164_v26, %v2112_v3  ;;  %v2167_v58 = vadd.f32 %v2166_v43, %v2165_v33 }
 0x140   : > { %v3093_v20 = vadd.f32 %v2167_v58, %v2115_v56 }
 0x142   : > { %v2196_v27 = vpop.f32.mrb[32].mxu0 }
 0x143   : > { %v2197_v31 = vpop.f32.mrb[33].mxu0 }
 0x144   : > { %v2198_v34 = vadd.f32 %v2197_v31, %v2196_v27  ;;  %v2199_v49 = vpop.f32.mrb[34].mxu0 }
 0x145   : > { %v2200_v51 = vpop.f32.mrb[35].mxu0 }
 0x146   : > { %v2308_v59 = vadd.f32 %v2307_v13, %v2198_v34  ;;  %v2201_v44 = vadd.f32 %v2200_v51, %v2199_v49 }
 0x148   : > { %v2314_v5 = vadd.f32 %v2313_v32, %v2201_v44 }
 0x14a   : > { %v2202_v61 = vpop.f32.mrb[36].mxu0 }
 0x14b   : > { %v2203_v62 = vpop.f32.mrb[37].mxu0  ;;  %v2298_v50 = vpop.f32.mrb[0].mxu1 }
 0x14c   : > { %v2204_v46 = vadd.f32 %v2203_v62, %v2202_v61  ;;  %v2205_v52 = vpop.f32.mrb[38].mxu0  ;;  %v1653_v47 = vpop.f32.mrb[1].mxu1 }
 0x14d   : > { %v2206_v25 = vpop.f32.mrb[39].mxu0  ;;  %v2309_v24 = vadd.f32 %v2308_v59, %v1653_v47  ;;  %v2299_v19 = vpop.f32.mrb[2].mxu1 }
 0x14e   : > { %v2305_v48 = vadd.f32 %v2304_v57, %v2204_v46  ;;  %v2207_v39 = vadd.f32 %v2206_v25, %v2205_v52  ;;  %v1656_v42 = vpop.f32.mrb[3].mxu1 }
 0x14f   : > { %v1699_v10 = vadd.f32 %v2309_v24, %v2049_v53  ;;  %v2315_v63 = vadd.f32 %v2314_v5, %v1656_v42 }
 0x150   : > { %v2306_v60 = vadd.f32 %v2305_v48, %v2298_v50  ;;  %v2311_v4 = vadd.f32 %v2310_v7, %v2207_v39 }
 0x151   : > { %v1700_v8 = vadd.f32 %v2315_v63, %v2049_v53  ;;  %v1707_v14 = vmax.f32 %v1699_v10, 0.0 }
 0x152   : > { %v1701_v1 = vadd.f32 %v2306_v60, %v2049_v53  ;;  %v2312_v2 = vadd.f32 %v2311_v4, %v2299_v19  ;;  %v2208_v3 = vpop.f32.mrb[40].mxu0 }
 0x153   : > { %v2209_v11 = vpop.f32.mrb[41].mxu0  ;;  %v1708_v56 = vmax.f32 %v1700_v8, 0.0  ;;  %v2302_v55 = vpop.f32.mrb[4].mxu1 }
 0x154   : > { %v1702_v45 = vadd.f32 %v2312_v2, %v2049_v53  ;;  %v2210_v28 = vadd.f32 %v2209_v11, %v2208_v3  ;;  %v2211_v30 = vpop.f32.mrb[42].mxu0  ;;  %v1709_v29 = vmax.f32 %v1701_v1, 0.0  ;;  %v1669_v13 = vpop.f32.mrb[5].mxu1 }
 0x155   : > { %v2212_v54 = vpop.f32.mrb[43].mxu0  ;;  %v2056_v32 = vpack.c.bf16 %v1708_v56, %v1707_v14  ;;  %v2303_v18 = vpop.f32.mrb[6].mxu1 }
 0x156   : > { %v1710_v22 = vmax.f32 %v1702_v45, 0.0  ;;  %v2320_v37 = vadd.f32 %v2319_v9, %v2210_v28  ;;  %v2213_v23 = vadd.f32 %v2212_v54, %v2211_v30  ;;  %v1672_v15 = vpop.f32.mrb[7].mxu1 }
 0x157   : > { %2057 = vst [vmem:[%s3102_s5] sm:$0xff] %v2056_v32  }
 0x158   : > { %v2061_v57 = vpack.c.bf16 %v1710_v22, %v1709_v29  ;;  %v2321_v0 = vadd.f32 %v2320_v37, %v1669_v13  ;;  %v2326_v7 = vadd.f32 %v2325_v12, %v2213_v23 }
 0x15a   : > { %2073 = vst [vmem:[%s3102_s5 + $0x8] sm:$0xff] %v2061_v57   ;;  %v1703_v35 = vadd.f32 %v2321_v0, %v2049_v53  ;;  %v2327_v17 = vadd.f32 %v2326_v7, %v1672_v15  ;;  %v2214_v36 = vpop.f32.mrb[44].mxu0 }
 0x15b   : > { %v2215_v40 = vpop.f32.mrb[45].mxu0 }
 0x15c   : > { %v1704_v21 = vadd.f32 %v2327_v17, %v2049_v53  ;;  %v2216_v38 = vadd.f32 %v2215_v40, %v2214_v36  ;;  %v2217_v16 = vpop.f32.mrb[46].mxu0  ;;  %v1711_v26 = vmax.f32 %v1703_v35, 0.0 }
 0x15d   : > { %v2218_v6 = vpop.f32.mrb[47].mxu0 }
 0x15e   : > { %v1712_v33 = vmax.f32 %v1704_v21, 0.0  ;;  %v2317_v9 = vadd.f32 %v3091_v41, %v2216_v38  ;;  %v2219_v43 = vadd.f32 %v2218_v6, %v2217_v16 }
 0x160   : > { %v2066_v58 = vpack.c.bf16 %v1712_v33, %v1711_v26  ;;  %v2318_v27 = vadd.f32 %v2317_v9, %v2302_v55  ;;  %v2323_v12 = vadd.f32 %v3093_v20, %v2219_v43 }
 0x162   : > { %2074 = vst [vmem:[%s3102_s5 + $0x10] sm:$0xff] %v2066_v58   ;;  %v1705_v31 = vadd.f32 %v2318_v27, %v2049_v53  ;;  %v2324_v34 = vadd.f32 %v2323_v12, %v2303_v18 }
 0x164   : > { %v1706_v49 = vadd.f32 %v2324_v34, %v2049_v53  ;;  %v1713_v51 = vmax.f32 %v1705_v31, 0.0 }
 0x166   : > { %v1714_v59 = vmax.f32 %v1706_v49, 0.0 }
 0x168   : > { %v2071_v44 = vpack.c.bf16 %v1714_v59, %v1713_v51 }
 0x16a   : > { %2075 = vst [vmem:[%s3102_s5 + $0x18] sm:$0xff] %v2071_v44  }
 0x16b PF: > { %s13_s14 = sadd.s32 1, %s2475_s14   ;;  %s3127_s12 = smov %s2471_s13 }
 0x16c   : > { %p10_p5 = scmp.ge.s32.totalorder %s13_s14, 4   ;;  %s3128_s13 = smov %s3130_s15 }
 0x16e   :  { %12 = sbr.rel (!%p10_p5) target bundleno = 2 (0x2), region = 64 }

// kernel: _lambda_.13
= control target key start
LH: loop header
LB: loop body
LE: loop exit
PB: predicated region body
PF: predicated region fallthrough
CT: control target
= control target key end

     0   :  { %s2069_s12 = smov 0   ;;  %s2071_s13 = smov 0   ;;  %s2596_s0 = inlined_call_operand.vmem [shape: bf16[2,4,6,384], index: 0, kind: input, shape index: {}]   ;;  %s2597_s1 = inlined_call_operand.vmem [shape: bf16[3,384,256], index: 1, kind: input, shape index: {}]   ;;  %s2598_s2 = inlined_call_operand.vmem [shape: f32[1,256], index: 2, kind: input, shape index: {}]   ;;  %s2599_s3 = inlined_call_operand.vmem [shape: bf16[2,4,4,256], index: 3, kind: output, shape index: {}]  }
   0x1   :  { %s2073_s14 = smov 0   ;;  %s2075_s15 = smov 0  }
   0x2   :  { %s2077_s16 = smov 0  }
   0x3 LB: > { %s22_s17 = sadd.s32 1, %s2038_s14  ;;  %s25_s18 = sadd.s32 1, %s2042_s15  ;;  %s2046_s16 = sphi %s2077_s16, %s13_s16   ;;  %s2042_s15 = sphi %s2075_s15, %s2603_s15   ;;  %s2038_s14 = sphi %s2073_s14, %s2602_s14   ;;  %s2034_s13 = sphi %s2071_s13, %s2601_s13   ;;  %s2030_s12 = sphi %s2069_s12, %s2600_s12  }
   0x4   : > { %p23_p0 = scmp.ge.s32.totalorder %s22_s17, 4  ;;  %p1494_p1 = scmp.ge.s32.totalorder %s2046_s16, 1 }
   0x5   : > { %p157_p2 = scmp.lt.s32.totalorder %s2046_s16, 9 }
   0x6   : > { %s2605_s17 = smov (%p23_p0, %s22_s17), 0  ;;  %s2607_s18 = smov (!%p23_p0, %s25_s18), %s2042_s15 }
   0x7   : > { %p158_p3 = pnand %p1494_p1, %p157_p2  ;;  %p27_p4 = scmp.ge.s32.totalorder %s2607_s18, 2 }
   0x8   : > { %v1789_v0 = vld [vmem:[%s2597_s1 + $0x184] ss:$8 sps:$4 sm:$0xff] (!%p158_p3)   ;;  %v2048_v2 = vmov (!%p158_p3), 0   ;;  %p189_p5 = scmp.lt.s32.totalorder (!%p158_p3), %s2034_s13, 1  ;;  %v1793_v3 = vld [vmem:[%s2597_s1 + $0x180] ss:$8 sps:$4 sm:$0xff] (!%p158_p3)  }
   0x9   : > { %s2609_s18 = smov (%p27_p4, %s2607_s18), 0  ;;  %161 = sbr.rel (%p158_p3) target bundleno = 394 (0x18a), region = 32 }
   0xa   : > { %v1791_v1 = vld [vmem:[%s2597_s1 + $0x284] ss:$8 sps:$4 sm:$0xff] (!%p158_p3)   ;;  %652 = vmatprep.mubr.bf16.mxu1 (!%p158_p3), %v2048_v2  ;;  %579 = vmatprep.subr.bf16.mxu0 (!%p158_p3), %v1789_v0  ;;  %v1794_v4 = vld [vmem:[%s2597_s1 + $0x280] ss:$8 sps:$4 sm:$0xff] (!%p158_p3)   ;;  %p191_p6 = scmp.lt.s32.totalorder (!%p158_p3), %s2030_s12, 3 }
   0xb   : > { %620 = vmatprep.subr.bf16.mxu1 (!%p158_p3), %v1791_v1  ;;  %v1795_v5 = vld [vmem:[%s2597_s1 + $0x194] ss:$8 sps:$4 sm:$0xff] (!%p158_p3)   ;;  %580 = vmatpush1.bf16.msra.mxu0 (!%p158_p3), %v1793_v3  ;;  %v1799_v7 = vld [vmem:[%s2597_s1 + $0x190] ss:$8 sps:$4 sm:$0xff] (!%p158_p3)   ;;  %v1801_v9 = vld [vmem:[%s2597_s1 + $0x1a4] ss:$8 sps:$4 sm:$0xff] (!%p158_p3)  }
   0xc   : > { %621 = vmatpush1.bf16.msra.mxu1 (!%p158_p3), %v1794_v4  ;;  %v1797_v6 = vld [vmem:[%s2597_s1 + $0x294] ss:$8 sps:$4 sm:$0xff] (!%p158_p3)   ;;  %581 = vmatprep.subr.bf16.mxu0 (!%p158_p3), %v1795_v5  ;;  %v1800_v8 = vld [vmem:[%s2597_s1 + $0x290] ss:$8 sps:$4 sm:$0xff] (!%p158_p3)   ;;  %v1803_v10 = vld [vmem:[%s2597_s1 + $0x2a4] ss:$8 sps:$4 sm:$0xff] (!%p158_p3)  }
   0xd   : > { %622 = vmatprep.subr.bf16.mxu1 (!%p158_p3), %v1797_v6  ;;  %v1805_v11 = vld [vmem:[%s2597_s1 + $0x1a0] ss:$8 sps:$4 sm:$0xff] (!%p158_p3)   ;;  %v1807_v13 = vld [vmem:[%s2597_s1 + $0x1b4] ss:$8 sps:$4 sm:$0xff] (!%p158_p3)   ;;  %v1811_v15 = vld [vmem:[%s2597_s1 + $0x1b0] ss:$8 sps:$4 sm:$0xff] (!%p158_p3)  }
   0xe   : > { %v1806_v12 = vld [vmem:[%s2597_s1 + $0x2a0] ss:$8 sps:$4 sm:$0xff] (!%p158_p3)   ;;  %v1809_v14 = vld [vmem:[%s2597_s1 + $0x2b4] ss:$8 sps:$4 sm:$0xff] (!%p158_p3)   ;;  %v1812_v16 = vld [vmem:[%s2597_s1 + $0x2b0] ss:$8 sps:$4 sm:$0xff] (!%p158_p3)  }
   0xf   : > { %582 = vmatpush1.bf16.msra.mxu0 (!%p158_p3), %v1799_v7  ;;  %v1813_v17 = vld [vmem:[%s2597_s1 + $0x1c4] ss:$8 sps:$4 sm:$0xff] (!%p158_p3)   ;;  %v1817_v19 = vld [vmem:[%s2597_s1 + $0x1c0] ss:$8 sps:$4 sm:$0xff] (!%p158_p3)   ;;  %v1819_v21 = vld [vmem:[%s2597_s1 + $0x1d4] ss:$8 sps:$4 sm:$0xff] (!%p158_p3)  }
  0x10   : > { %s2611_s13 = smov (!%p189_p5, %s2034_s13), 1  ;;  %s2613_s12 = smov (!%p191_p6, %s2030_s12), 3  ;;  %623 = vmatpush1.bf16.msra.mxu1 %v1800_v8  ;;  %583 = vmatprep.subr.bf16.mxu0 %v1801_v9  ;;  %v1815_v18 = vld [vmem:[%s2597_s1 + $0x2c4] ss:$8 sps:$4 sm:$0xff]   ;;  %v1818_v20 = vld [vmem:[%s2597_s1 + $0x2c0] ss:$8 sps:$4 sm:$0xff]  }
  0x11   : > { %624 = vmatprep.subr.bf16.mxu1 %v1803_v10  ;;  %s1747_s27 = smul.u32 12, %s2611_s13  ;;  %v1821_v22 = vld [vmem:[%s2597_s1 + $0x2d4] ss:$8 sps:$4 sm:$0xff]   ;;  %v1823_v23 = vld [vmem:[%s2597_s1 + $0x1d0] ss:$8 sps:$4 sm:$0xff]   ;;  %s1496_s11 = sshll.u32 %s2613_s12, 1 }
  0x12   : > { %s1746_s30 = smul.u32 3, %s2613_s12  ;;  %v1824_v24 = vld [vmem:[%s2597_s1 + $0x2d0] ss:$8 sps:$4 sm:$0xff]   ;;  %v1825_v25 = vld [vmem:[%s2597_s1 + $0x1e4] ss:$8 sps:$4 sm:$0xff]   ;;  %s1497_s19 = sshll.u32 %s2611_s13, 3 }
  0x13   : > { %584 = vmatpush1.bf16.msra.mxu0 %v1805_v11  ;;  %v1827_v26 = vld [vmem:[%s2597_s1 + $0x2e4] ss:$8 sps:$4 sm:$0xff]   ;;  %v1829_v27 = vld [vmem:[%s2597_s1 + $0x1e0] ss:$8 sps:$4 sm:$0xff]   ;;  %v1831_v29 = vld [vmem:[%s2597_s1 + $0x1f4] ss:$8 sps:$4 sm:$0xff]   ;;  %s204_s20 = sadd.s32 %s1497_s19, %s1496_s11 }
  0x14   : > { %625 = vmatpush1.bf16.msra.mxu1 %v1806_v12  ;;  %585 = vmatprep.subr.bf16.mxu0 %v1807_v13  ;;  %s195_s21 = sadd.s32 %s1747_s27, %s1746_s30  ;;  %v1830_v28 = vld [vmem:[%s2597_s1 + $0x2e0] ss:$8 sps:$4 sm:$0xff]   ;;  %v1833_v31 = vld [vmem:[%s2597_s1 + $0x2f4] ss:$8 sps:$4 sm:$0xff]   ;;  %v1835_v33 = vld [vmem:[%s2597_s1 + $0x1f0] ss:$8 sps:$4 sm:$0xff]  }
  0x15   : > { %626 = vmatprep.subr.bf16.mxu1 %v1809_v14  ;;  %s1495_s26 = sshll.u32 %s195_s21, 2  ;;  %v1836_v35 = vld [vmem:[%s2597_s1 + $0x2f0] ss:$8 sps:$4 sm:$0xff]   ;;  %v1837_v37 = vld [vmem:[%s2597_s1 + $0x204] ss:$8 sps:$4 sm:$0xff]   ;;  %s1498_s21 = sshll.u32 %s204_s20, 1 }
  0x16   : > { %s2195_s10 = scalar_lea.vmem %s2596_s0, %s1495_s26  ;;  %v1841_v38 = vld [vmem:[%s2597_s1 + $0x4] ss:$8 sps:$4 sm:$0xff]   ;;  %v1839_v39 = vld [vmem:[%s2597_s1] ss:$8 sps:$4 sm:$0xff]   ;;  %v1844_v42 = vld [vmem:[%s2597_s1 + $0x214] ss:$8 sps:$4 sm:$0xff]   ;;  %s206_s12 = scalar_lea.vmem %s2599_s3, %s1498_s21 }
  0x17   : > { %586 = vmatpush1.bf16.msra.mxu0 %v1811_v15  ;;  %v2207_v30 = vld [vmem:[%s2195_s10 + $0x8] ss:$0 sps:$4 sm:$0x77]   ;;  %v1848_v43 = vld [vmem:[%s2597_s1 + $0x14] ss:$8 sps:$4 sm:$0xff]  }
  0x18   : > { %627 = vmatpush1.bf16.msra.mxu1 %v1812_v16  ;;  %587 = vmatprep.subr.bf16.mxu0 %v1813_v17  ;;  %v332_v32 = vshll.u32 %v2207_v30, 16  ;;  %v330_v34 = vshrl.u32 %v2207_v30, 16  ;;  %v1842_v41 = vld [vmem:[%s2597_s1 + $0x200] ss:$8 sps:$4 sm:$0xff]   ;;  %v1846_v44 = vld [vmem:[%s2597_s1 + $0x10] ss:$8 sps:$4 sm:$0xff]  }
  0x19   : > { %628 = vmatprep.subr.bf16.mxu1 %v1815_v18  ;;  %v1849_v45 = vld [vmem:[%s2597_s1 + $0x210] ss:$8 sps:$4 sm:$0xff]   ;;  %v1850_v46 = vld [vmem:[%s2597_s1 + $0x224] ss:$8 sps:$4 sm:$0xff]   ;;  %v1852_v48 = vld [vmem:[%s2597_s1 + $0x20] ss:$8 sps:$4 sm:$0xff]  }
  0x1a   : > { %v334_v36 = vrot.slane %v332_v32, 1  ;;  %v1854_v47 = vld [vmem:[%s2597_s1 + $0x24] ss:$8 sps:$4 sm:$0xff]   ;;  %v1855_v49 = vld [vmem:[%s2597_s1 + $0x220] ss:$8 sps:$4 sm:$0xff]  }
  0x1b   : > { %588 = vmatpush1.bf16.msra.mxu0 %v1817_v19  ;;  %v1856_v50 = vld [vmem:[%s2597_s1 + $0x234] ss:$8 sps:$4 sm:$0xff]   ;;  %v1858_v52 = vld [vmem:[%s2597_s1 + $0x30] ss:$8 sps:$4 sm:$0xff]   ;;  %v208_v53 = vld [vmem:[%s2195_s10] sm:$0x77] }
  0x1c   : > { %629 = vmatpush1.bf16.msra.mxu1 %v1818_v20  ;;  %589 = vmatprep.subr.bf16.mxu0 %v1819_v21  ;;  %v335_v40 = vor.u32 %v334_v36, %v330_v34  ;;  %v1860_v51 = vld [vmem:[%s2597_s1 + $0x34] ss:$8 sps:$4 sm:$0xff]   ;;  %v1861_v54 = vld [vmem:[%s2597_s1 + $0x230] ss:$8 sps:$4 sm:$0xff]   ;;  %v1862_v55 = vld [vmem:[%s2597_s1 + $0x244] ss:$8 sps:$4 sm:$0xff]   ;;  %v2272_v56 = vcombine.high %v208_v53, %v208_v53  ;;  %v2295_v4 = vcombine.low %v208_v53, %v208_v53 }
  0x1d   : > { %630 = vmatprep.subr.bf16.mxu1 %v1821_v22  ;;  %v1866_v57 = vld [vmem:[%s2597_s1 + $0x44] ss:$8 sps:$4 sm:$0xff]   ;;  %v1864_v60 = vld [vmem:[%s2597_s1 + $0x40] ss:$8 sps:$4 sm:$0xff]   ;;  %v1868_v63 = vld [vmem:[%s2597_s1 + $0x254] ss:$8 sps:$4 sm:$0xff]  }
  0x1e   : > { %v323_v58 = vshrl.u32 %v2272_v56, 16  ;;  %v325_v59 = vshll.u32 %v2272_v56, 16  ;;  %v1867_v61 = vld [vmem:[%s2597_s1 + $0x240] ss:$8 sps:$4 sm:$0xff]   ;;  %v1872_v0 = vld [vmem:[%s2597_s1 + $0x54] ss:$8 sps:$4 sm:$0xff]  }
  0x1f   : > { %590 = vmatpush1.bf16.msra.mxu0 %v1823_v23  ;;  %v1870_v3 = vld [vmem:[%s2597_s1 + $0x50] ss:$8 sps:$4 sm:$0xff]   ;;  %v1874_v6 = vld [vmem:[%s2597_s1 + $0x264] ss:$8 sps:$4 sm:$0xff]   ;;  %v1876_v8 = vld [vmem:[%s2597_s1 + $0x60] ss:$8 sps:$4 sm:$0xff]  }
  0x20   : > { %631 = vmatpush1.bf16.msra.mxu1 %v1824_v24  ;;  %591 = vmatprep.subr.bf16.mxu0 %v1825_v25  ;;  %v327_v62 = vrot.slane %v325_v59, 1  ;;  %v1873_v5 = vld [vmem:[%s2597_s1 + $0x250] ss:$8 sps:$4 sm:$0xff]   ;;  %v1878_v7 = vld [vmem:[%s2597_s1 + $0x64] ss:$8 sps:$4 sm:$0xff]   ;;  %v318_v9 = vshll.u32 %v2295_v4, 16 }
  0x21   : > { %632 = vmatprep.subr.bf16.mxu1 %v1827_v26  ;;  %v1879_v10 = vld [vmem:[%s2597_s1 + $0x260] ss:$8 sps:$4 sm:$0xff]   ;;  %v1880_v11 = vld [vmem:[%s2597_s1 + $0x274] ss:$8 sps:$4 sm:$0xff]   ;;  %v1882_v13 = vld [vmem:[%s2597_s1 + $0x70] ss:$8 sps:$4 sm:$0xff]  }
  0x22   : > { %v328_v1 = vor.u32 %v327_v62, %v323_v58  ;;  %v1884_v12 = vld [vmem:[%s2597_s1 + $0x74] ss:$8 sps:$4 sm:$0xff]   ;;  %v316_v14 = vshrl.u32 %v2295_v4, 16  ;;  %v320_v15 = vrot.slane %v318_v9, 1  ;;  %v1885_v16 = vld [vmem:[%s2597_s1 + $0x270] ss:$8 sps:$4 sm:$0xff]  }
  0x23   : > { %592 = vmatpush1.bf16.msra.mxu0 %v1829_v27  ;;  %v1890_v17 = vld [vmem:[%s2597_s1 + $0x84] ss:$8 sps:$4 sm:$0xff]   ;;  %v1888_v20 = vld [vmem:[%s2597_s1 + $0x80] ss:$8 sps:$4 sm:$0xff]   ;;  %v1896_v22 = vld [vmem:[%s2597_s1 + $0x94] ss:$8 sps:$4 sm:$0xff]  }
  0x24   : > { %633 = vmatpush1.bf16.msra.mxu1 %v1830_v28  ;;  %593 = vmatprep.subr.bf16.mxu0 %v1831_v29  ;;  %v1893_v18 = vld [vmem:[%s2597_s1 + $0x104] ss:$8 sps:$4 sm:$0xff]   ;;  %v321_v19 = vor.u32 %v320_v15, %v316_v14  ;;  %v1891_v21 = vld [vmem:[%s2597_s1 + $0x100] ss:$8 sps:$4 sm:$0xff]   ;;  %v1899_v23 = vld [vmem:[%s2597_s1 + $0x114] ss:$8 sps:$4 sm:$0xff]  }
  0x25   : > { %634 = vmatprep.subr.bf16.mxu1 %v1833_v31  ;;  %611 = vmatprep.mubr.bf16.mxu0 %v328_v1  ;;  %v1894_v24 = vld [vmem:[%s2597_s1 + $0x90] ss:$8 sps:$4 sm:$0xff]   ;;  %v1902_v26 = vld [vmem:[%s2597_s1 + $0xa4] ss:$8 sps:$4 sm:$0xff]   ;;  %v1900_v28 = vld [vmem:[%s2597_s1 + $0xa0] ss:$8 sps:$4 sm:$0xff]  }
  0x26   : > { %v1897_v25 = vld [vmem:[%s2597_s1 + $0x110] ss:$8 sps:$4 sm:$0xff]   ;;  %v1905_v27 = vld [vmem:[%s2597_s1 + $0x124] ss:$8 sps:$4 sm:$0xff]   ;;  %v1903_v29 = vld [vmem:[%s2597_s1 + $0x120] ss:$8 sps:$4 sm:$0xff]  }
  0x27   : > { %594 = vmatpush1.bf16.msra.mxu0 %v1835_v33  ;;  %v1908_v31 = vld [vmem:[%s2597_s1 + $0xb4] ss:$8 sps:$4 sm:$0xff]   ;;  %v1906_v33 = vld [vmem:[%s2597_s1 + $0xb0] ss:$8 sps:$4 sm:$0xff]   ;;  %v1917_v36 = vld [vmem:[%s2597_s1 + $0x144] ss:$8 sps:$4 sm:$0xff]  }
  0x28   : > { %635 = vmatpush1.bf16.msra.mxu1 %v1836_v35  ;;  %595 = vmatprep.subr.bf16.mxu0 %v1837_v37  ;;  %v1911_v32 = vld [vmem:[%s2597_s1 + $0x134] ss:$8 sps:$4 sm:$0xff]   ;;  %v1909_v34 = vld [vmem:[%s2597_s1 + $0x130] ss:$8 sps:$4 sm:$0xff]   ;;  %v1914_v35 = vld [vmem:[%s2597_s1 + $0xc4] ss:$8 sps:$4 sm:$0xff]  }
  0x29   : > { %904 = vmatprep.subr.bf16.mxu1 %v1841_v38  ;;  %v1912_v37 = vld [vmem:[%s2597_s1 + $0xc0] ss:$8 sps:$4 sm:$0xff]   ;;  %v1036_v58 = vrot.slane %v2272_v56, 1  ;;  %v1939_v59 = vld [vmem:[%s2597_s1 + $0x310] ss:$8 sps:$4 sm:$0xff]  }
  0x2a   : > { %v1915_v38 = vld [vmem:[%s2597_s1 + $0x140] ss:$8 sps:$4 sm:$0xff]   ;;  %v1945_v1 = vld [vmem:[%s2597_s1 + $0x330] ss:$8 sps:$4 sm:$0xff]   ;;  %v1953_v9 = vld [vmem:[%s2597_s1 + $0x354] ss:$8 sps:$4 sm:$0xff]  }
  0x2b   : > { %653 = vmatmul.mubr.bf16.vlgmr.msra.gmra.mrb[0].mxu1 %v335_v40  ;;  %596 = vmatpush1.bf16.msra.mxu0 %v1842_v41  ;;  %v1923_v40 = vld [vmem:[%s2597_s1 + $0x154] ss:$8 sps:$4 sm:$0xff]   ;;  %v1918_v41 = vld [vmem:[%s2597_s1 + $0xd0] ss:$8 sps:$4 sm:$0xff]   ;;  %v1936_v53 = vld [vmem:[%s2597_s1 + $0x300] ss:$8 sps:$4 sm:$0xff]  }
  0x2c   : > { %905 = vmatpush1.bf16.msra.mxu1 %v1839_v39  ;;  %597 = vmatprep.subr.bf16.mxu0 %v1844_v42  ;;  %v1920_v39 = vld [vmem:[%s2597_s1 + $0xd4] ss:$8 sps:$4 sm:$0xff]   ;;  %v1921_v42 = vld [vmem:[%s2597_s1 + $0x150] ss:$8 sps:$4 sm:$0xff]   ;;  %v1942_v62 = vld [vmem:[%s2597_s1 + $0x320] ss:$8 sps:$4 sm:$0xff]  }
  0x2d   : > { %906 = vmatprep.subr.bf16.mxu1 %v1848_v43  ;;  %936 = vmatprep.mubr.bf16.mxu1 %v2272_v56  ;;  %v1926_v43 = vld [vmem:[%s2597_s1 + $0xe4] ss:$8 sps:$4 sm:$0xff]   ;;  %v1954_v15 = vld [vmem:[%s2597_s1 + $0x360] ss:$8 sps:$4 sm:$0xff]  }
  0x2e   : > { %v1974_v56 = vld [vmem:[%s2597_s1 + $0x424] ss:$8 sps:$4 sm:$0xff]  }
  0x2f   : > { %598 = vmatpush1.bf16.msra.mxu0 %v1849_v45  ;;  %v1924_v45 = vld [vmem:[%s2597_s1 + $0xe0] ss:$8 sps:$4 sm:$0xff]   ;;  %v1998_v14 = vld [vmem:[%s2597_s1 + $0x464] ss:$8 sps:$4 sm:$0xff]  }
  0x30   : > { %907 = vmatpush1.bf16.msra.mxu1 %v1846_v44  ;;  %599 = vmatprep.subr.bf16.mxu0 %v1850_v46  ;;  %v1929_v44 = vld [vmem:[%s2597_s1 + $0x164] ss:$8 sps:$4 sm:$0xff]   ;;  %v1927_v46 = vld [vmem:[%s2597_s1 + $0x160] ss:$8 sps:$4 sm:$0xff]  }
  0x31   : > { %908 = vmatprep.subr.bf16.mxu1 %v1854_v47  ;;  %v1932_v47 = vld [vmem:[%s2597_s1 + $0xf4] ss:$8 sps:$4 sm:$0xff]  }
  0x33   : > { %600 = vmatpush1.bf16.msra.mxu0 %v1855_v49  ;;  %v1930_v49 = vld [vmem:[%s2597_s1 + $0xf0] ss:$8 sps:$4 sm:$0xff]  }
  0x34   : > { %909 = vmatpush1.bf16.msra.mxu1 %v1852_v48  ;;  %601 = vmatprep.subr.bf16.mxu0 %v1856_v50  ;;  %v1935_v48 = vld [vmem:[%s2597_s1 + $0x174] ss:$8 sps:$4 sm:$0xff]   ;;  %v1933_v50 = vld [vmem:[%s2597_s1 + $0x170] ss:$8 sps:$4 sm:$0xff]  }
  0x35   : > { %910 = vmatprep.subr.bf16.mxu1 %v1860_v51  ;;  %v1938_v51 = vld [vmem:[%s2597_s1 + $0x304] ss:$8 sps:$4 sm:$0xff]  }
  0x37   : > { %602 = vmatpush1.bf16.msra.mxu0 %v1861_v54  ;;  %v1960_v54 = vld [vmem:[%s2597_s1 + $0x400] ss:$8 sps:$4 sm:$0xff]  }
  0x38   : > { %911 = vmatpush1.bf16.msra.mxu1 %v1858_v52  ;;  %603 = vmatprep.subr.bf16.mxu0 %v1862_v55  ;;  %v1962_v52 = vld [vmem:[%s2597_s1 + $0x404] ss:$8 sps:$4 sm:$0xff]   ;;  %v1941_v55 = vld [vmem:[%s2597_s1 + $0x314] ss:$8 sps:$4 sm:$0xff]  }
  0x39   : > { %912 = vmatprep.subr.bf16.mxu1 %v1866_v57  ;;  %v1968_v57 = vld [vmem:[%s2597_s1 + $0x414] ss:$8 sps:$4 sm:$0xff]  }
  0x3b   : > { %604 = vmatpush1.bf16.msra.mxu0 %v1867_v61  ;;  %v1944_v61 = vld [vmem:[%s2597_s1 + $0x324] ss:$8 sps:$4 sm:$0xff]  }
  0x3c   : > { %913 = vmatpush1.bf16.msra.mxu1 %v1864_v60  ;;  %605 = vmatprep.subr.bf16.mxu0 %v1868_v63  ;;  %v1966_v60 = vld [vmem:[%s2597_s1 + $0x410] ss:$8 sps:$4 sm:$0xff]   ;;  %v1972_v63 = vld [vmem:[%s2597_s1 + $0x420] ss:$8 sps:$4 sm:$0xff]  }
  0x3d   : > { %914 = vmatprep.subr.bf16.mxu1 %v1872_v0  ;;  %v1947_v0 = vld [vmem:[%s2597_s1 + $0x334] ss:$8 sps:$4 sm:$0xff]  }
  0x3f   : > { %606 = vmatpush1.bf16.msra.mxu0 %v1873_v5  ;;  %v1950_v5 = vld [vmem:[%s2597_s1 + $0x344] ss:$8 sps:$4 sm:$0xff]  }
  0x40   : > { %915 = vmatpush1.bf16.msra.mxu1 %v1870_v3  ;;  %607 = vmatprep.subr.bf16.mxu0 %v1874_v6  ;;  %v1978_v3 = vld [vmem:[%s2597_s1 + $0x430] ss:$8 sps:$4 sm:$0xff]   ;;  %v1986_v6 = vld [vmem:[%s2597_s1 + $0x444] ss:$8 sps:$4 sm:$0xff]  }
  0x41   : > { %916 = vmatprep.subr.bf16.mxu1 %v1878_v7  ;;  %v1948_v7 = vld [vmem:[%s2597_s1 + $0x340] ss:$8 sps:$4 sm:$0xff]  }
  0x43   : > { %608 = vmatpush1.bf16.msra.mxu0 %v1879_v10  ;;  %v1992_v10 = vld [vmem:[%s2597_s1 + $0x454] ss:$8 sps:$4 sm:$0xff]  }
  0x44   : > { %917 = vmatpush1.bf16.msra.mxu1 %v1876_v8  ;;  %609 = vmatprep.subr.bf16.mxu0 %v1880_v11  ;;  %v1984_v8 = vld [vmem:[%s2597_s1 + $0x440] ss:$8 sps:$4 sm:$0xff]   ;;  %v1951_v11 = vld [vmem:[%s2597_s1 + $0x350] ss:$8 sps:$4 sm:$0xff]  }
  0x45   : > { %918 = vmatprep.subr.bf16.mxu1 %v1884_v12  ;;  %v1990_v12 = vld [vmem:[%s2597_s1 + $0x450] ss:$8 sps:$4 sm:$0xff]  }
  0x47   : > { %610 = vmatpush1.bf16.msra.mxu0 %v1885_v16  ;;  %v1996_v16 = vld [vmem:[%s2597_s1 + $0x460] ss:$8 sps:$4 sm:$0xff]  }
  0x48   : > { %919 = vmatpush1.bf16.msra.mxu1 %v1882_v13  ;;  %945 = vmatprep.subr.bf16.mxu0 %v1893_v18  ;;  %v1956_v13 = vld [vmem:[%s2597_s1 + $0x364] ss:$8 sps:$4 sm:$0xff]   ;;  %v2004_v18 = vld [vmem:[%s2597_s1 + $0x474] ss:$8 sps:$4 sm:$0xff]  }
  0x49   : > { %920 = vmatprep.subr.bf16.mxu1 %v1890_v17  ;;  %v1959_v17 = vld [vmem:[%s2597_s1 + $0x374] ss:$8 sps:$4 sm:$0xff]  }
  0x4a   : > { %612 = vmatmul.mubr.bf16.vlgmr.msra.gmra.mrb[0].mxu0 %v321_v19  ;;  %v1957_v19 = vld [vmem:[%s2597_s1 + $0x370] ss:$8 sps:$4 sm:$0xff]  }
  0x4b   : > { %946 = vmatpush1.bf16.msra.mxu0 %v1891_v21  ;;  %977 = vmatprep.mubr.bf16.mxu0 %v2048_v2  ;;  %v1965_v21 = vld [vmem:[%s2597_s1 + $0x384] ss:$8 sps:$4 sm:$0xff]  }
  0x4c   : > { %921 = vmatpush1.bf16.msra.mxu1 %v1888_v20  ;;  %947 = vmatprep.subr.bf16.mxu0 %v1899_v23  ;;  %v2002_v20 = vld [vmem:[%s2597_s1 + $0x470] ss:$8 sps:$4 sm:$0xff]   ;;  %v1963_v23 = vld [vmem:[%s2597_s1 + $0x380] ss:$8 sps:$4 sm:$0xff]  }
  0x4d   : > { %922 = vmatprep.subr.bf16.mxu1 %v1896_v22  ;;  %v1037_v22 = vrot.slane %v2207_v30, 1 }
  0x4f   : > { %948 = vmatpush1.bf16.msra.mxu0 %v1897_v25  ;;  %v1969_v25 = vld [vmem:[%s2597_s1 + $0x390] ss:$8 sps:$4 sm:$0xff]  }
  0x50   : > { %923 = vmatpush1.bf16.msra.mxu1 %v1894_v24  ;;  %949 = vmatprep.subr.bf16.mxu0 %v1905_v27  ;;  %v1971_v24 = vld [vmem:[%s2597_s1 + $0x394] ss:$8 sps:$4 sm:$0xff]  }
  0x51   : > { %924 = vmatprep.subr.bf16.mxu1 %v1902_v26  ;;  %v1975_v26 = vld [vmem:[%s2597_s1 + $0x3a0] ss:$8 sps:$4 sm:$0xff]   ;;  %v1983_v27 = vld [vmem:[%s2597_s1 + $0x3b4] ss:$8 sps:$4 sm:$0xff]  }
  0x53   : > { %950 = vmatpush1.bf16.msra.mxu0 %v1903_v29  ;;  %v1989_v29 = vld [vmem:[%s2597_s1 + $0x3c4] ss:$8 sps:$4 sm:$0xff]  }
  0x54   : > { %925 = vmatpush1.bf16.msra.mxu1 %v1900_v28  ;;  %951 = vmatprep.subr.bf16.mxu0 %v1911_v32  ;;  %v1981_v28 = vld [vmem:[%s2597_s1 + $0x3b0] ss:$8 sps:$4 sm:$0xff]   ;;  %v1995_v32 = vld [vmem:[%s2597_s1 + $0x3d4] ss:$8 sps:$4 sm:$0xff]  }
  0x55   : > { %926 = vmatprep.subr.bf16.mxu1 %v1908_v31  ;;  %v1987_v31 = vld [vmem:[%s2597_s1 + $0x3c0] ss:$8 sps:$4 sm:$0xff]  }
  0x57   : > { %952 = vmatpush1.bf16.msra.mxu0 %v1909_v34  ;;  %v2001_v34 = vld [vmem:[%s2597_s1 + $0x3e4] ss:$8 sps:$4 sm:$0xff]  }
  0x58   : > { %927 = vmatpush1.bf16.msra.mxu1 %v1906_v33  ;;  %953 = vmatprep.subr.bf16.mxu0 %v1917_v36  ;;  %v1993_v33 = vld [vmem:[%s2597_s1 + $0x3d0] ss:$8 sps:$4 sm:$0xff]   ;;  %v2007_v36 = vld [vmem:[%s2597_s1 + $0x3f4] ss:$8 sps:$4 sm:$0xff]  }
  0x59   : > { %928 = vmatprep.subr.bf16.mxu1 %v1914_v35  ;;  %v1999_v35 = vld [vmem:[%s2597_s1 + $0x3e0] ss:$8 sps:$4 sm:$0xff]  }
  0x5b   : > { %954 = vmatpush1.bf16.msra.mxu0 %v1915_v38  ;;  %v1035_v38 = vrot.slane %v2295_v4, 1 }
  0x5c   : > { %929 = vmatpush1.bf16.msra.mxu1 %v1912_v37  ;;  %955 = vmatprep.subr.bf16.mxu0 %v1923_v40  ;;  %v2005_v37 = vld [vmem:[%s2597_s1 + $0x3f0] ss:$8 sps:$4 sm:$0xff]  }
  0x5d   : > { %930 = vmatprep.subr.bf16.mxu1 %v1920_v39 }
  0x5f   : > { %956 = vmatpush1.bf16.msra.mxu0 %v1921_v42 }
  0x60   : > { %931 = vmatpush1.bf16.msra.mxu1 %v1918_v41  ;;  %957 = vmatprep.subr.bf16.mxu0 %v1929_v44 }
  0x61   : > { %932 = vmatprep.subr.bf16.mxu1 %v1926_v43 }
  0x63   : > { %958 = vmatpush1.bf16.msra.mxu0 %v1927_v46 }
  0x64   : > { %933 = vmatpush1.bf16.msra.mxu1 %v1924_v45  ;;  %959 = vmatprep.subr.bf16.mxu0 %v1935_v48 }
  0x65   : > { %934 = vmatprep.subr.bf16.mxu1 %v1932_v47 }
  0x67   : > { %960 = vmatpush1.bf16.msra.mxu0 %v1933_v50 }
  0x68   : > { %935 = vmatpush1.bf16.msra.mxu1 %v1930_v49  ;;  %1281 = vmatprep.subr.bf16.mxu0 %v1938_v51 }
  0x69   : > { %1322 = vmatprep.subr.bf16.mxu1 %v1962_v52 }
  0x6a   : > { %978 = vmatmul.mubr.bf16.vlgmr.msra.gmra.mrb[4].mxu0 %v2207_v30  ;;  %v1977_v30 = vld [vmem:[%s2597_s1 + $0x3a4] ss:$8 sps:$4 sm:$0xff]  }
  0x6b   : > { %937 = vmatmul.mubr.bf16.vlgmr.msra.gmra.mrb[4].mxu1 %v2295_v4  ;;  %1282 = vmatpush1.bf16.msra.mxu0 %v1936_v53 }
  0x6c   : > { %1323 = vmatpush1.bf16.msra.mxu1 %v1960_v54  ;;  %1283 = vmatprep.subr.bf16.mxu0 %v1941_v55 }
  0x6d   : > { %1324 = vmatprep.subr.bf16.mxu1 %v1968_v57  ;;  %1354 = vmatprep.mubr.bf16.mxu1 %v2048_v2  ;;  %v1980_v2 = vld [vmem:[%s2597_s1 + $0x434] ss:$8 sps:$4 sm:$0xff]  }
  0x6e   : > { %1313 = vmatprep.mubr.bf16.mxu0 %v1036_v58 }
  0x6f   : > { %1284 = vmatpush1.bf16.msra.mxu0 %v1939_v59 }
  0x70   : > { %1325 = vmatpush1.bf16.msra.mxu1 %v1966_v60  ;;  %1285 = vmatprep.subr.bf16.mxu0 %v1944_v61 }
  0x71   : > { %1326 = vmatprep.subr.bf16.mxu1 %v1974_v56 }
  0x73   : > { %1286 = vmatpush1.bf16.msra.mxu0 %v1942_v62 }
  0x74   : > { %1327 = vmatpush1.bf16.msra.mxu1 %v1972_v63  ;;  %1287 = vmatprep.subr.bf16.mxu0 %v1947_v0  ;;  %v1367_v0 = vlaneseq }
  0x75   : > { %1328 = vmatprep.subr.bf16.mxu1 %v1980_v2 }
  0x76   : > { %v1368_v2 = vshrl.u32 %v1367_v0, 7 }
  0x77   : > { %1288 = vmatpush1.bf16.msra.mxu0 %v1945_v1 }
  0x78   : > { %1329 = vmatpush1.bf16.msra.mxu1 %v1978_v3  ;;  %1289 = vmatprep.subr.bf16.mxu0 %v1950_v5  ;;  %v1369_v1 = vsub.s32 0, %v1368_v2  ;;  %v1365_v3 = vld [vmem:[%s2598_s2] sm:$0x3]  ;;  %v1373_v5 = vsub.s32 1, %v1368_v2 }
  0x79   : > { %1330 = vmatprep.subr.bf16.mxu1 %v1986_v6 }
  0x7b   : > { %1290 = vmatpush1.bf16.msra.mxu0 %v1948_v7 }
  0x7c   : > { %1331 = vmatpush1.bf16.msra.mxu1 %v1984_v8  ;;  %1291 = vmatprep.subr.bf16.mxu0 %v1953_v9  ;;  %v1370_v8 = vrot.slane %v1365_v3, %v1369_v1 }
  0x7d   : > { %1332 = vmatprep.subr.bf16.mxu1 %v1992_v10 }
  0x7f   : > { %1292 = vmatpush1.bf16.msra.mxu0 %v1951_v11  ;;  %v1374_v11 = vrot.slane %v1365_v3, %v1373_v5 }
  0x80   : > { %1333 = vmatpush1.bf16.msra.mxu1 %v1990_v12  ;;  %1293 = vmatprep.subr.bf16.mxu0 %v1956_v13 }
  0x81   : > { %1334 = vmatprep.subr.bf16.mxu1 %v1998_v14 }
  0x83   : > { %1294 = vmatpush1.bf16.msra.mxu0 %v1954_v15 }
  0x84   : > { %1335 = vmatpush1.bf16.msra.mxu1 %v1996_v16  ;;  %1295 = vmatprep.subr.bf16.mxu0 %v1959_v17 }
  0x85   : > { %1336 = vmatprep.subr.bf16.mxu1 %v2004_v18 }
  0x87   : > { %1296 = vmatpush1.bf16.msra.mxu0 %v1957_v19 }
  0x88   : > { %1337 = vmatpush1.bf16.msra.mxu1 %v2002_v20  ;;  %1297 = vmatprep.subr.bf16.mxu0 %v1965_v21 }
  0x8b   : > { %1355 = vmatmul.mubr.bf16.vlgmr.msra.gmra.mrb[8].mxu1 %v1037_v22  ;;  %1298 = vmatpush1.bf16.msra.mxu0 %v1963_v23 }
  0x8c   : > { %1299 = vmatprep.subr.bf16.mxu0 %v1971_v24 }
  0x8f   : > { %1300 = vmatpush1.bf16.msra.mxu0 %v1969_v25 }
  0x90   : > { %1301 = vmatprep.subr.bf16.mxu0 %v1977_v30 }
  0x93   : > { %1302 = vmatpush1.bf16.msra.mxu0 %v1975_v26 }
  0x94   : > { %1303 = vmatprep.subr.bf16.mxu0 %v1983_v27 }
  0x97   : > { %1304 = vmatpush1.bf16.msra.mxu0 %v1981_v28 }
  0x98   : > { %1305 = vmatprep.subr.bf16.mxu0 %v1989_v29 }
  0x9b   : > { %1306 = vmatpush1.bf16.msra.mxu0 %v1987_v31 }
  0x9c   : > { %1307 = vmatprep.subr.bf16.mxu0 %v1995_v32 }
  0x9f   : > { %1308 = vmatpush1.bf16.msra.mxu0 %v1993_v33 }
  0xa0   : > { %1309 = vmatprep.subr.bf16.mxu0 %v2001_v34 }
  0xa3   : > { %1310 = vmatpush1.bf16.msra.mxu0 %v1999_v35 }
  0xa4   : > { %1311 = vmatprep.subr.bf16.mxu0 %v2007_v36 }
  0xa7   : > { %1312 = vmatpush1.bf16.msra.mxu0 %v2005_v37 }
  0xaa   : > { %1314 = vmatmul.mubr.bf16.vlgmr.msra.gmra.mrb[8].mxu0 %v1035_v38 }
  0xfe   : > { %v654_v39 = vpop.f32.mrb[0].mxu1 }
  0xff   : > { %v656_v40 = vpop.f32.mrb[1].mxu1 }
 0x100   : > { %v658_v41 = vpop.f32.mrb[2].mxu1 }
 0x101   : > { %v659_v42 = vpop.f32.mrb[3].mxu1 }
 0x11d   : > { %v613_v43 = vpop.f32.mrb[0].mxu0 }
 0x11e   : > { %v655_v44 = vadd.f32 %v654_v39, %v613_v43  ;;  %v615_v45 = vpop.f32.mrb[1].mxu0 }
 0x11f   : > { %v657_v46 = vadd.f32 %v656_v40, %v615_v45  ;;  %v617_v47 = vpop.f32.mrb[2].mxu0 }
 0x120   : > { %v618_v48 = vpop.f32.mrb[3].mxu0 }
 0x13d   : > { %v979_v50 = vpop.f32.mrb[4].mxu0 }
 0x13e   : > { %v938_v49 = vpop.f32.mrb[4].mxu1  ;;  %v981_v53 = vpop.f32.mrb[5].mxu0 }
 0x13f   : > { %v939_v51 = vadd.f32 %v938_v49, %v655_v44  ;;  %v940_v52 = vpop.f32.mrb[5].mxu1  ;;  %v983_v55 = vpop.f32.mrb[6].mxu0 }
 0x140   : > { %v941_v54 = vadd.f32 %v940_v52, %v657_v46  ;;  %v942_v4 = vpop.f32.mrb[6].mxu1  ;;  %v984_v58 = vpop.f32.mrb[7].mxu0 }
 0x141   : > { %v980_v57 = vadd.f32 %v979_v50, %v939_v51  ;;  %v943_v59 = vpop.f32.mrb[7].mxu1 }
 0x142   : > { %v982_v60 = vadd.f32 %v981_v53, %v941_v54 }
 0x15e   : > { %v1356_v61 = vpop.f32.mrb[8].mxu1 }
 0x15f   : > { %v1358_v56 = vpop.f32.mrb[9].mxu1 }
 0x160   : > { %v1360_v62 = vpop.f32.mrb[10].mxu1 }
 0x161   : > { %v1361_v63 = vpop.f32.mrb[11].mxu1 }
 0x17d   : > { %v1315_v6 = vpop.f32.mrb[8].mxu0 }
 0x17e   : > { %v1357_v7 = vadd.f32 %v1356_v61, %v1315_v6  ;;  %v1317_v9 = vpop.f32.mrb[9].mxu0 }
 0x17f   : > { %v1359_v10 = vadd.f32 %v1358_v56, %v1317_v9  ;;  %v1319_v12 = vpop.f32.mrb[10].mxu0 }
 0x180   : > { %v1363_v13 = vadd.f32 %v1357_v7, %v980_v57  ;;  %v1320_v14 = vpop.f32.mrb[11].mxu0 }
 0x181   : > { %v1364_v15 = vadd.f32 %v1359_v10, %v982_v60 }
 0x182   : > { %v1377_v16 = vadd.f32 %v1370_v8, %v1363_v13 }
 0x183   : > { %v1378_v17 = vadd.f32 %v1374_v11, %v1364_v15 }
 0x184   : > { %v1379_v18 = vmax.f32 %v1377_v16, 0.0 }
 0x185   : > { %v1380_v19 = vmax.f32 %v1378_v17, 0.0 }
 0x187   : > { %v1742_v20 = vpack.c.bf16 %v1380_v19, %v1379_v18 }
 0x189   : > { %1743 = vst.sshfl [vmem:[%s206_s12] sm:$0x33 pattern:$0x76325410] %v1742_v20 }
 0x18a PF: > { %s13_s16 = sadd.s32 1, %s2046_s16   ;;  %s2600_s12 = smov %s2038_s14 }
 0x18b   : > { %p10_p7 = scmp.ge.s32.totalorder %s13_s16, 10   ;;  %s2601_s13 = smov %s2042_s15 }
 0x18c   : > { %s2602_s14 = smov %s2605_s17  ;;  %s2603_s15 = smov %s2609_s18 }
 0x18d   :  { %12 = sbr.rel (!%p10_p7) target bundleno = 3 (0x3), region = 64 }

</bundles_post_ra>
